<compile_context>
chip_gen: v7x
topology: tpu7x:2x2x1
jax: 0.10.0
libtpu: 0.0.40
codegen_flags: <defaults>
</compile_context>

<pallas_src>
import jax
import jax.numpy as jnp
from jax import lax
from jax.experimental import pallas as pl
from jax.experimental.pallas import tpu as pltpu


def resblock_kernel(xpad_ref, w1_ref, b1_ref, w2_ref, b2_ref, out_ref,
                    ypad_ref):
    """Fused conv3x3 -> BN -> ReLU -> conv3x3 -> BN -> (+x) -> ReLU, 1 sample.

    xpad_ref : (H+2, W+2, C)  VMEM  zero-padded NHWC input (batch squeezed)
    w*_ref   : (9*C, C)       VMEM  im2col weights, BN scale folded into cols
    b*_ref   : (1, C)     f32 VMEM  folded BN shift
    out_ref  : (H, W*C)   f32 VMEM  lane-dense output block
    ypad_ref : (H+2, W+2, C)  VMEM  scratch (padded conv1 output)
    """
    Hp, Wp, C = xpad_ref.shape
    H, W = Hp - 2, Wp - 2
    K = 3
    HW = H * W

    def conv3x3(src_ref, w_ref):
        # Build the im2col slab (H*W, 9*C) once: 9 shifted windows
        # concatenated along the channel (lane) axis, then a single MXU
        # matmul with f32 accumulation (BN scale is pre-folded into w).
        cols = [src_ref[dh:dh + H, dw:dw + W, :].reshape(HW, C)
                for dh in range(K) for dw in range(K)]
        slab = jnp.concatenate(cols, axis=-1)
        return jnp.dot(slab, w_ref[...], preferred_element_type=jnp.float32)

    # ---- conv1 + BN1 (scale folded into w1) + ReLU --------------------------
    y = jnp.maximum(conv3x3(xpad_ref, w1_ref) + b1_ref[...], 0.0)

    # Stage conv1's output in a padded scratch; only the 1-px halo ring needs
    # zeroing (interior is fully rewritten every grid step).  Kept
    # unconditional: on megacore a core may never see program_id 0, so gating
    # on it would leave that core's scratch halo uninitialized.
    ypad_ref[0:1, :, :] = jnp.zeros((1, Wp, C), ypad_ref.dtype)
    ypad_ref[H + 1:H + 2, :, :] = jnp.zeros((1, Wp, C), ypad_ref.dtype)
    ypad_ref[:, 0:1, :] = jnp.zeros((Hp, 1, C), ypad_ref.dtype)
    ypad_ref[:, W + 1:W + 2, :] = jnp.zeros((Hp, 1, C), ypad_ref.dtype)
    ypad_ref[1:H + 1, 1:W + 1, :] = y.reshape(H, W, C).astype(ypad_ref.dtype)

    # ---- conv2 + BN2 (scale folded into w2) + residual + ReLU ---------------
    z = (conv3x3(ypad_ref, w2_ref) + b2_ref[...]).reshape(H, W, C)
    resid = xpad_ref[1:H + 1, 1:W + 1, :].astype(jnp.float32)
    out_ref[...] = jnp.maximum(z + resid, 0.0).reshape(H, W * C)


def _vmem_limit_bytes():
    """Generation-dependent VMEM budget (raise on v5e/v6e, modest on v7x)."""
    try:
        cap = int(pltpu.get_tpu_info().vmem_capacity_bytes)
    except Exception:
        cap = 64 * 1024 * 1024
    return int(max(32 * 1024 * 1024,
                   min(cap - 16 * 1024 * 1024, 100 * 1024 * 1024)))


def resblock_forward(x_nchw, w1, w2, bn1, bn2, eps=1e-5,
                     compute_dtype=jnp.float32):
    """x_nchw: (N, C, H, W) f32; w1/w2: (C, C, 3, 3) PyTorch OIHW weights;
    bn = (gamma, beta, running_mean, running_var), each (C,)."""
    N, C, H, W = x_nchw.shape
    Hp, Wp = H + 2, W + 2

    # Glue (plain JAX): NCHW -> NHWC, zero-pad spatially by 1, compute dtype.
    x_nhwc = jnp.transpose(x_nchw, (0, 2, 3, 1)).astype(compute_dtype)
    xpad = jnp.pad(x_nhwc, ((0, 0), (1, 1), (1, 1), (0, 0)))

    def fold(w, bn):
        # BN(conv(x)) = conv(x) * s + (b - m*s); fold the per-output-channel
        # scale s into the weight columns so only the shift stays in-kernel.
        g, b, m, v = bn
        s = (g / jnp.sqrt(v + eps)).astype(jnp.float32)
        shift = (b - m * s).astype(jnp.float32).reshape(1, C)
        # OIHW -> (kh, kw, c_in, c_out) -> (9*C_in, C_out) im2col matrix;
        # row order matches the dh-major, dw-minor, c_in-inner slab order.
        wm = jnp.transpose(w, (2, 3, 1, 0)).reshape(9 * C, C)
        wm = (wm * s[None, :]).astype(compute_dtype)
        return wm, shift

    w1m, b1 = fold(w1, bn1)
    w2m, b2 = fold(w2, bn2)

    out = pl.pallas_call(
        resblock_kernel,
        out_shape=jax.ShapeDtypeStruct((N, H, W * C), jnp.float32),
        grid=(N,),
        in_specs=[
            pl.BlockSpec((None, Hp, Wp, C), lambda n: (n, 0, 0, 0)),  # xpad
            pl.BlockSpec((9 * C, C), lambda n: (0, 0)),               # w1 im2col
            pl.BlockSpec((1, C), lambda n: (0, 0)),                   # bn1 shift
            pl.BlockSpec((9 * C, C), lambda n: (0, 0)),               # w2 im2col
            pl.BlockSpec((1, C), lambda n: (0, 0)),                   # bn2 shift
        ],
        # Lane-dense output block: last dim W*C instead of C.
        out_specs=pl.BlockSpec((None, H, W * C), lambda n: (n, 0, 0)),
        scratch_shapes=[pltpu.VMEM((Hp, Wp, C), compute_dtype)],
        compiler_params=pltpu.CompilerParams(
            # Batch samples are independent -> pipelined + sharded across the
            # two TensorCores on v7x.
            dimension_semantics=("parallel",),
            vmem_limit_bytes=_vmem_limit_bytes(),
        ),
    )(xpad, w1m, b1, w2m, b2)

    # (N, H, W*C) is a contiguous relabel of (N, H, W, C); undo it and return
    # to the PyTorch NCHW convention.
    return jnp.transpose(out.reshape(N, H, W, C), (0, 3, 1, 2))


def jax_reference(x, w1, w2, bn1, bn2, eps=1e-5):
    """Pure-JAX (XLA) reference of the PyTorch forward, eval-mode BN."""
    def conv3x3(x, w):
        return lax.conv_general_dilated(
            x, w, window_strides=(1, 1), padding=((1, 1), (1, 1)),
            dimension_numbers=("NCHW", "OIHW", "NCHW"),
            precision=jax.lax.Precision.HIGHEST)

    def bn(x, p):
        g, b, m, v = p
        g, b, m, v = (t[None, :, None, None] for t in (g, b, m, v))
        return (x - m) / jnp.sqrt(v + eps) * g + b

    y = jax.nn.relu(bn(conv3x3(x, w1), bn1))
    y = bn(conv3x3(y, w2), bn2)
    return jax.nn.relu(y + x)


if __name__ == "__main__":
    N, C, H, W = 2, 4, 16, 16
    key = jax.random.PRNGKey(0)
    ks = jax.random.split(key, 11)

    x = jax.random.normal(ks[0], (N, C, H, W), jnp.float32)
    w1 = jax.random.normal(ks[1], (C, C, 3, 3), jnp.float32) * 0.2
    w2 = jax.random.normal(ks[2], (C, C, 3, 3), jnp.float32) * 0.2
    bn1 = (jax.random.uniform(ks[3], (C,), jnp.float32, 0.5, 1.5),
           jax.random.normal(ks[4], (C,), jnp.float32) * 0.1,
           jax.random.normal(ks[5], (C,), jnp.float32) * 0.1,
           jax.random.uniform(ks[6], (C,), jnp.float32, 0.5, 1.5))
    bn2 = (jax.random.uniform(ks[7], (C,), jnp.float32, 0.5, 1.5),
           jax.random.normal(ks[8], (C,), jnp.float32) * 0.1,
           jax.random.normal(ks[9], (C,), jnp.float32) * 0.1,
           jax.random.uniform(ks[10], (C,), jnp.float32, 0.5, 1.5))

    out = resblock_forward(x, w1, w2, bn1, bn2)
    out = jax.block_until_ready(out)

    ref = jax_reference(x, w1, w2, bn1, bn2)
    assert out.shape == (N, C, H, W), out.shape
    max_err = float(jnp.max(jnp.abs(out - ref)))
    # f32 MXU accumulation; 1e-3 leaves margin for matmul-pass rounding vs XLA.
    assert jnp.allclose(out, ref, atol=1e-3, rtol=1e-3), f"max_err={max_err}"

    print("KERNEL_OK")
</pallas_src>

<mosaic_0001>
module attributes {stable_mosaic.version = 11 : i64} {
  func.func @resblock_kernel(%arg0: i32, %arg1: memref<1x18x18x4xf32, #tpu.memory_space<vmem>>, %arg2: memref<36x4xf32, #tpu.memory_space<vmem>>, %arg3: memref<1x4xf32, #tpu.memory_space<vmem>>, %arg4: memref<36x4xf32, #tpu.memory_space<vmem>>, %arg5: memref<1x4xf32, #tpu.memory_space<vmem>>, %arg6: memref<1x16x64xf32, #tpu.memory_space<vmem>>, %arg7: memref<18x18x4xf32, #tpu.memory_space<vmem>>) attributes {dimension_semantics = [#tpu.dimension_semantics<parallel>], iteration_bounds = array<i64: 2>, scalar_prefetch = 0 : i64, scratch_operands = 1 : i64, tpu.core_type = #tpu.core_type<tc>, window_params = [{transform_indices = @transform_0, window_bounds = array<i64: 1, 18, 18, 4>}, {pipeline_mode = #tpu.pipeline_mode<synchronous>, transform_indices = @transform_1, window_bounds = array<i64: 36, 4>}, {pipeline_mode = #tpu.pipeline_mode<synchronous>, transform_indices = @transform_2, window_bounds = array<i64: 1, 4>}, {pipeline_mode = #tpu.pipeline_mode<synchronous>, transform_indices = @transform_3, window_bounds = array<i64: 36, 4>}, {pipeline_mode = #tpu.pipeline_mode<synchronous>, transform_indices = @transform_4, window_bounds = array<i64: 1, 4>}, {transform_indices = @transform_5, window_bounds = array<i64: 1, 16, 64>}]} {
    %c0 = arith.constant 0 : index
    %c0_0 = arith.constant 0 : index
    %c0_1 = arith.constant 0 : index
    %c0_2 = arith.constant 0 : index
    %0 = vector.load %arg1[%c0, %c0_0, %c0_1, %c0_2] : memref<1x18x18x4xf32, #tpu.memory_space<vmem>>, vector<1x16x16x4xf32>
    %1 = vector.shape_cast %0 : vector<1x16x16x4xf32> to vector<16x16x4xf32>
    %2 = vector.shape_cast %1 : vector<16x16x4xf32> to vector<256x4xf32>
    %c0_3 = arith.constant 0 : index
    %c0_4 = arith.constant 0 : index
    %c1 = arith.constant 1 : index
    %c0_5 = arith.constant 0 : index
    %3 = vector.load %arg1[%c0_3, %c0_4, %c1, %c0_5] : memref<1x18x18x4xf32, #tpu.memory_space<vmem>>, vector<1x16x16x4xf32>
    %4 = vector.shape_cast %3 : vector<1x16x16x4xf32> to vector<16x16x4xf32>
    %5 = vector.shape_cast %4 : vector<16x16x4xf32> to vector<256x4xf32>
    %c0_6 = arith.constant 0 : index
    %c0_7 = arith.constant 0 : index
    %c2 = arith.constant 2 : index
    %c0_8 = arith.constant 0 : index
    %6 = vector.load %arg1[%c0_6, %c0_7, %c2, %c0_8] : memref<1x18x18x4xf32, #tpu.memory_space<vmem>>, vector<1x16x16x4xf32>
    %7 = vector.shape_cast %6 : vector<1x16x16x4xf32> to vector<16x16x4xf32>
    %8 = vector.shape_cast %7 : vector<16x16x4xf32> to vector<256x4xf32>
    %c0_9 = arith.constant 0 : index
    %c1_10 = arith.constant 1 : index
    %c0_11 = arith.constant 0 : index
    %c0_12 = arith.constant 0 : index
    %9 = vector.load %arg1[%c0_9, %c1_10, %c0_11, %c0_12] : memref<1x18x18x4xf32, #tpu.memory_space<vmem>>, vector<1x16x16x4xf32>
    %10 = vector.shape_cast %9 : vector<1x16x16x4xf32> to vector<16x16x4xf32>
    %11 = vector.shape_cast %10 : vector<16x16x4xf32> to vector<256x4xf32>
    %c0_13 = arith.constant 0 : index
    %c1_14 = arith.constant 1 : index
    %c1_15 = arith.constant 1 : index
    %c0_16 = arith.constant 0 : index
    %12 = vector.load %arg1[%c0_13, %c1_14, %c1_15, %c0_16] : memref<1x18x18x4xf32, #tpu.memory_space<vmem>>, vector<1x16x16x4xf32>
    %13 = vector.shape_cast %12 : vector<1x16x16x4xf32> to vector<16x16x4xf32>
    %14 = vector.shape_cast %13 : vector<16x16x4xf32> to vector<256x4xf32>
    %c0_17 = arith.constant 0 : index
    %c1_18 = arith.constant 1 : index
    %c2_19 = arith.constant 2 : index
    %c0_20 = arith.constant 0 : index
    %15 = vector.load %arg1[%c0_17, %c1_18, %c2_19, %c0_20] : memref<1x18x18x4xf32, #tpu.memory_space<vmem>>, vector<1x16x16x4xf32>
    %16 = vector.shape_cast %15 : vector<1x16x16x4xf32> to vector<16x16x4xf32>
    %17 = vector.shape_cast %16 : vector<16x16x4xf32> to vector<256x4xf32>
    %c0_21 = arith.constant 0 : index
    %c2_22 = arith.constant 2 : index
    %c0_23 = arith.constant 0 : index
    %c0_24 = arith.constant 0 : index
    %18 = vector.load %arg1[%c0_21, %c2_22, %c0_23, %c0_24] : memref<1x18x18x4xf32, #tpu.memory_space<vmem>>, vector<1x16x16x4xf32>
    %19 = vector.shape_cast %18 : vector<1x16x16x4xf32> to vector<16x16x4xf32>
    %20 = vector.shape_cast %19 : vector<16x16x4xf32> to vector<256x4xf32>
    %c0_25 = arith.constant 0 : index
    %c2_26 = arith.constant 2 : index
    %c1_27 = arith.constant 1 : index
    %c0_28 = arith.constant 0 : index
    %21 = vector.load %arg1[%c0_25, %c2_26, %c1_27, %c0_28] : memref<1x18x18x4xf32, #tpu.memory_space<vmem>>, vector<1x16x16x4xf32>
    %22 = vector.shape_cast %21 : vector<1x16x16x4xf32> to vector<16x16x4xf32>
    %23 = vector.shape_cast %22 : vector<16x16x4xf32> to vector<256x4xf32>
    %c0_29 = arith.constant 0 : index
    %c2_30 = arith.constant 2 : index
    %c2_31 = arith.constant 2 : index
    %c0_32 = arith.constant 0 : index
    %24 = vector.load %arg1[%c0_29, %c2_30, %c2_31, %c0_32] : memref<1x18x18x4xf32, #tpu.memory_space<vmem>>, vector<1x16x16x4xf32>
    %25 = vector.shape_cast %24 : vector<1x16x16x4xf32> to vector<16x16x4xf32>
    %26 = vector.shape_cast %25 : vector<16x16x4xf32> to vector<256x4xf32>
    %27 = tpu.concatenate %2, %5, %8, %11, %14, %17, %20, %23, %26 in 1 : vector<256x4xf32>, vector<256x4xf32>, vector<256x4xf32>, vector<256x4xf32>, vector<256x4xf32>, vector<256x4xf32>, vector<256x4xf32>, vector<256x4xf32>, vector<256x4xf32> -> vector<256x36xf32>
    %c0_33 = arith.constant 0 : index
    %c0_34 = arith.constant 0 : index
    %28 = vector.load %arg2[%c0_33, %c0_34] : memref<36x4xf32, #tpu.memory_space<vmem>>, vector<36x4xf32>
    %cst = arith.constant dense<0.000000e+00> : vector<256x4xf32>
    %29 = tpu.matmul %27, %28, %cst {dimension_numbers = #tpu.dot_dimension_numbers<[1], [0], [0], [1], [0, 0, 1, 1], [], []>} : vector<256x36xf32>, vector<36x4xf32>, vector<256x4xf32> -> vector<256x4xf32>
    %c0_35 = arith.constant 0 : index
    %c0_36 = arith.constant 0 : index
    %30 = vector.load %arg3[%c0_35, %c0_36] : memref<1x4xf32, #tpu.memory_space<vmem>>, vector<1x4xf32>
    %31 = vector.broadcast %30 : vector<1x4xf32> to vector<256x4xf32>
    %32 = arith.addf %29, %31 : vector<256x4xf32>
    %cst_37 = arith.constant 0.000000e+00 : f32
    %33 = vector.broadcast %cst_37 : f32 to vector<256x4xf32>
    %34 = arith.maximumf %32, %33 : vector<256x4xf32>
    %cst_38 = arith.constant 0.000000e+00 : f32
    %35 = vector.broadcast %cst_38 : f32 to vector<1x18x4xf32>
    %c0_39 = arith.constant 0 : index
    %c0_40 = arith.constant 0 : index
    %c0_41 = arith.constant 0 : index
    %36 = vector.load %arg7[%c0_39, %c0_40, %c0_41] : memref<18x18x4xf32, #tpu.memory_space<vmem>>, vector<1x18x4xf32>
    tpu.vector_store %arg7[%c0_39, %c0_40, %c0_41], %35 {strides = array<i32>} : memref<18x18x4xf32, #tpu.memory_space<vmem>>, vector<1x18x4xf32>,
    %cst_42 = arith.constant 0.000000e+00 : f32
    %37 = vector.broadcast %cst_42 : f32 to vector<1x18x4xf32>
    %c17 = arith.constant 17 : index
    %c0_43 = arith.constant 0 : index
    %c0_44 = arith.constant 0 : index
    %38 = vector.load %arg7[%c17, %c0_43, %c0_44] : memref<18x18x4xf32, #tpu.memory_space<vmem>>, vector<1x18x4xf32>
    tpu.vector_store %arg7[%c17, %c0_43, %c0_44], %37 {strides = array<i32>} : memref<18x18x4xf32, #tpu.memory_space<vmem>>, vector<1x18x4xf32>,
    %cst_45 = arith.constant 0.000000e+00 : f32
    %39 = vector.broadcast %cst_45 : f32 to vector<18x1x4xf32>
    %c0_46 = arith.constant 0 : index
    %c0_47 = arith.constant 0 : index
    %c0_48 = arith.constant 0 : index
    %40 = vector.load %arg7[%c0_46, %c0_47, %c0_48] : memref<18x18x4xf32, #tpu.memory_space<vmem>>, vector<18x1x4xf32>
    tpu.vector_store %arg7[%c0_46, %c0_47, %c0_48], %39 {strides = array<i32>} : memref<18x18x4xf32, #tpu.memory_space<vmem>>, vector<18x1x4xf32>,
    %cst_49 = arith.constant 0.000000e+00 : f32
    %41 = vector.broadcast %cst_49 : f32 to vector<18x1x4xf32>
    %c0_50 = arith.constant 0 : index
    %c17_51 = arith.constant 17 : index
    %c0_52 = arith.constant 0 : index
    %42 = vector.load %arg7[%c0_50, %c17_51, %c0_52] : memref<18x18x4xf32, #tpu.memory_space<vmem>>, vector<18x1x4xf32>
    tpu.vector_store %arg7[%c0_50, %c17_51, %c0_52], %41 {strides = array<i32>} : memref<18x18x4xf32, #tpu.memory_space<vmem>>, vector<18x1x4xf32>,
    %43 = vector.shape_cast %34 : vector<256x4xf32> to vector<16x16x4xf32>
    %c1_53 = arith.constant 1 : index
    %c1_54 = arith.constant 1 : index
    %c0_55 = arith.constant 0 : index
    %44 = vector.load %arg7[%c1_53, %c1_54, %c0_55] : memref<18x18x4xf32, #tpu.memory_space<vmem>>, vector<16x16x4xf32>
    tpu.vector_store %arg7[%c1_53, %c1_54, %c0_55], %43 {strides = array<i32>} : memref<18x18x4xf32, #tpu.memory_space<vmem>>, vector<16x16x4xf32>,
    %c0_56 = arith.constant 0 : index
    %c0_57 = arith.constant 0 : index
    %c0_58 = arith.constant 0 : index
    %45 = vector.load %arg7[%c0_56, %c0_57, %c0_58] : memref<18x18x4xf32, #tpu.memory_space<vmem>>, vector<16x16x4xf32>
    %46 = vector.shape_cast %45 : vector<16x16x4xf32> to vector<256x4xf32>
    %c0_59 = arith.constant 0 : index
    %c1_60 = arith.constant 1 : index
    %c0_61 = arith.constant 0 : index
    %47 = vector.load %arg7[%c0_59, %c1_60, %c0_61] : memref<18x18x4xf32, #tpu.memory_space<vmem>>, vector<16x16x4xf32>
    %48 = vector.shape_cast %47 : vector<16x16x4xf32> to vector<256x4xf32>
    %c0_62 = arith.constant 0 : index
    %c2_63 = arith.constant 2 : index
    %c0_64 = arith.constant 0 : index
    %49 = vector.load %arg7[%c0_62, %c2_63, %c0_64] : memref<18x18x4xf32, #tpu.memory_space<vmem>>, vector<16x16x4xf32>
    %50 = vector.shape_cast %49 : vector<16x16x4xf32> to vector<256x4xf32>
    %c1_65 = arith.constant 1 : index
    %c0_66 = arith.constant 0 : index
    %c0_67 = arith.constant 0 : index
    %51 = vector.load %arg7[%c1_65, %c0_66, %c0_67] : memref<18x18x4xf32, #tpu.memory_space<vmem>>, vector<16x16x4xf32>
    %52 = vector.shape_cast %51 : vector<16x16x4xf32> to vector<256x4xf32>
    %c1_68 = arith.constant 1 : index
    %c1_69 = arith.constant 1 : index
    %c0_70 = arith.constant 0 : index
    %53 = vector.load %arg7[%c1_68, %c1_69, %c0_70] : memref<18x18x4xf32, #tpu.memory_space<vmem>>, vector<16x16x4xf32>
    %54 = vector.shape_cast %53 : vector<16x16x4xf32> to vector<256x4xf32>
    %c1_71 = arith.constant 1 : index
    %c2_72 = arith.constant 2 : index
    %c0_73 = arith.constant 0 : index
    %55 = vector.load %arg7[%c1_71, %c2_72, %c0_73] : memref<18x18x4xf32, #tpu.memory_space<vmem>>, vector<16x16x4xf32>
    %56 = vector.shape_cast %55 : vector<16x16x4xf32> to vector<256x4xf32>
    %c2_74 = arith.constant 2 : index
    %c0_75 = arith.constant 0 : index
    %c0_76 = arith.constant 0 : index
    %57 = vector.load %arg7[%c2_74, %c0_75, %c0_76] : memref<18x18x4xf32, #tpu.memory_space<vmem>>, vector<16x16x4xf32>
    %58 = vector.shape_cast %57 : vector<16x16x4xf32> to vector<256x4xf32>
    %c2_77 = arith.constant 2 : index
    %c1_78 = arith.constant 1 : index
    %c0_79 = arith.constant 0 : index
    %59 = vector.load %arg7[%c2_77, %c1_78, %c0_79] : memref<18x18x4xf32, #tpu.memory_space<vmem>>, vector<16x16x4xf32>
    %60 = vector.shape_cast %59 : vector<16x16x4xf32> to vector<256x4xf32>
    %c2_80 = arith.constant 2 : index
    %c2_81 = arith.constant 2 : index
    %c0_82 = arith.constant 0 : index
    %61 = vector.load %arg7[%c2_80, %c2_81, %c0_82] : memref<18x18x4xf32, #tpu.memory_space<vmem>>, vector<16x16x4xf32>
    %62 = vector.shape_cast %61 : vector<16x16x4xf32> to vector<256x4xf32>
    %63 = tpu.concatenate %46, %48, %50, %52, %54, %56, %58, %60, %62 in 1 : vector<256x4xf32>, vector<256x4xf32>, vector<256x4xf32>, vector<256x4xf32>, vector<256x4xf32>, vector<256x4xf32>, vector<256x4xf32>, vector<256x4xf32>, vector<256x4xf32> -> vector<256x36xf32>
    %c0_83 = arith.constant 0 : index
    %c0_84 = arith.constant 0 : index
    %64 = vector.load %arg4[%c0_83, %c0_84] : memref<36x4xf32, #tpu.memory_space<vmem>>, vector<36x4xf32>
    %cst_85 = arith.constant dense<0.000000e+00> : vector<256x4xf32>
    %65 = tpu.matmul %63, %64, %cst_85 {dimension_numbers = #tpu.dot_dimension_numbers<[1], [0], [0], [1], [0, 0, 1, 1], [], []>} : vector<256x36xf32>, vector<36x4xf32>, vector<256x4xf32> -> vector<256x4xf32>
    %c0_86 = arith.constant 0 : index
    %c0_87 = arith.constant 0 : index
    %66 = vector.load %arg5[%c0_86, %c0_87] : memref<1x4xf32, #tpu.memory_space<vmem>>, vector<1x4xf32>
    %67 = vector.broadcast %66 : vector<1x4xf32> to vector<256x4xf32>
    %68 = arith.addf %65, %67 : vector<256x4xf32>
    %69 = vector.shape_cast %68 : vector<256x4xf32> to vector<16x16x4xf32>
    %c0_88 = arith.constant 0 : index
    %c1_89 = arith.constant 1 : index
    %c1_90 = arith.constant 1 : index
    %c0_91 = arith.constant 0 : index
    %70 = vector.load %arg1[%c0_88, %c1_89, %c1_90, %c0_91] : memref<1x18x18x4xf32, #tpu.memory_space<vmem>>, vector<1x16x16x4xf32>
    %71 = vector.shape_cast %70 : vector<1x16x16x4xf32> to vector<16x16x4xf32>
    %72 = arith.addf %69, %71 : vector<16x16x4xf32>
    %cst_92 = arith.constant 0.000000e+00 : f32
    %73 = vector.broadcast %cst_92 : f32 to vector<16x16x4xf32>
    %74 = arith.maximumf %72, %73 : vector<16x16x4xf32>
    %75 = vector.shape_cast %74 : vector<16x16x4xf32> to vector<16x64xf32>
    %c0_93 = arith.constant 0 : index
    %c0_94 = arith.constant 0 : index
    %c0_95 = arith.constant 0 : index
    %76 = vector.load %arg6[%c0_93, %c0_94, %c0_95] : memref<1x16x64xf32, #tpu.memory_space<vmem>>, vector<1x16x64xf32>
    %77 = vector.shape_cast %76 : vector<1x16x64xf32> to vector<16x64xf32>
    %78 = vector.shape_cast %75 : vector<16x64xf32> to vector<1x16x64xf32>
    tpu.vector_store %arg6[%c0_93, %c0_94, %c0_95], %78 {strides = array<i32>} : memref<1x16x64xf32, #tpu.memory_space<vmem>>, vector<1x16x64xf32>,
    return
  }
  func.func @transform_0(%arg0: i32) -> (i32, i32, i32, i32) {
    %c0_i32 = arith.constant 0 : i32
    %c0_i32_0 = arith.constant 0 : i32
    %c0_i32_1 = arith.constant 0 : i32
    %c0_i32_2 = arith.constant 0 : i32
    return %arg0, %c0_i32, %c0_i32_0, %c0_i32_1 : i32, i32, i32, i32
  }
  func.func @transform_1(%arg0: i32) -> (i32, i32) {
    %c0_i32 = arith.constant 0 : i32
    %c0_i32_0 = arith.constant 0 : i32
    %c0_i32_1 = arith.constant 0 : i32
    return %c0_i32, %c0_i32_0 : i32, i32
  }
  func.func @transform_2(%arg0: i32) -> (i32, i32) {
    %c0_i32 = arith.constant 0 : i32
    %c0_i32_0 = arith.constant 0 : i32
    %c0_i32_1 = arith.constant 0 : i32
    return %c0_i32, %c0_i32_0 : i32, i32
  }
  func.func @transform_3(%arg0: i32) -> (i32, i32) {
    %c0_i32 = arith.constant 0 : i32
    %c0_i32_0 = arith.constant 0 : i32
    %c0_i32_1 = arith.constant 0 : i32
    return %c0_i32, %c0_i32_0 : i32, i32
  }
  func.func @transform_4(%arg0: i32) -> (i32, i32) {
    %c0_i32 = arith.constant 0 : i32
    %c0_i32_0 = arith.constant 0 : i32
    %c0_i32_1 = arith.constant 0 : i32
    return %c0_i32, %c0_i32_0 : i32, i32
  }
  func.func @transform_5(%arg0: i32) -> (i32, i32, i32) {
    %c0_i32 = arith.constant 0 : i32
    %c0_i32_0 = arith.constant 0 : i32
    %c0_i32_1 = arith.constant 0 : i32
    return %arg0, %c0_i32, %c0_i32_0 : i32, i32, i32
  }
}

</mosaic_0001>

<bundles_post_ra>
// kernel: tpu_custom_call.1
= control target key start
LH: loop header
LB: loop body
LE: loop exit
PB: predicated region body
PF: predicated region fallthrough
CT: control target
= control target key end

     0   :  { %10 = vsyncpa [#allocation4], 0  ;;  %s9126_s0 = inlined_call_operand.vmem [shape: f32[2,18,18,4], index: 0, kind: input, shape index: {}]   ;;  %s9127_s1 = inlined_call_operand.vmem [shape: f32[36,4], index: 1, kind: input, shape index: {}]   ;;  %s9128_s2 = inlined_call_operand.vmem [shape: f32[1,4], index: 2, kind: input, shape index: {}]   ;;  %s9129_s3 = inlined_call_operand.vmem [shape: f32[36,4], index: 3, kind: input, shape index: {}]   ;;  %s9130_s4 = inlined_call_operand.vmem [shape: f32[1,4], index: 4, kind: input, shape index: {}]   ;;  %s9131_s5 = inlined_call_operand.hbm [shape: f32[2,16,64], index: 5, kind: output, shape index: {}]  }
   0x1   :  { %12 = vsyncpa [#allocation4 + $0x1], 0  ;;  %s5740_s18 = smov 0   ;;  %s5742_s19 = smov 0  }
   0x2   :  { %s5744_s20 = smov 0   ;;  %s5746_s21 = smov 0  }
   0x3 LB: > { %s5761_s22 = sadd.s32 4294967295, %s5688_s21   ;;  %s5029_s23 = sadd.s32 4294967294, %s5688_s21   ;;  %s5688_s21 = sphi %s5746_s21, %s9612_s21   ;;  %s5684_s20 = sphi %s5744_s20, %s9611_s20   ;;  %s5680_s19 = sphi %s5742_s19, %s9610_s19   ;;  %s5676_s18 = sphi %s5740_s18, %s9609_s18  }
   0x4   : > { %s5765_s24 = sadd.s32 1, %s5688_s21   ;;  %s135_s25 = sadd.s32 1, %s5684_s20 }
   0x5   : > { %s132_s26 = ssub.s32 %s5688_s21, %s5765_s24  ;;  %p145_p0 = scmp.ne.s32.totalorder %s5684_s20, %s5680_s19 }
   0x6   : > { %p133_p1 = scmp.eq.s32.totalorder %s132_s26, 0  ;;  %p146_p2 = scmp.eq.s32.totalorder %s5761_s22, 1 }
   0x7   : > { %p151_p3 = scmp.ne.s32.totalorder %s5680_s19, %s5676_s18  ;;  %p152_p4 = scmp.eq.s32.totalorder %s5029_s23, 1 }
   0x8   : > { %s5776_s27 = scalar_select %p133_p1, %s5684_s20, %s135_s25  }
   0x9   : > { %p5778_p5 = por %p146_p2, %p145_p0  ;;  %p5782_p6 = por %p152_p4, %p151_p3 }
   0xa   : > { %p5032_p7 = scmp.ge.s32.totalorder %s5688_s21, 1  ;;  %p190_p8 = scmp.lt.s32.totalorder %s5688_s21, 3 }
   0xc   : > { %p191_p9 = pnand %p5032_p7, %p190_p8 }
   0xe   : > { %194 = sbr.rel (%p191_p9) target bundleno = 1848 (0x738), region = 40 }
  0x15   : > { %p218_p10 = scmp.lt.s32.totalorder %s5761_s22, 1  ;;  %s5690_s10 = smov 4   ;;  %vm1910_vm0 = vcmask 1043456   ;;  %vm1537_vm1 = vcmask 31744   ;;  %vm1570_vm2 = vcmask 64512   ;;  %vm1603_vm3 = vcmask 97280  }
  0x16   : > { %s5691_s11 = smov 8   ;;  %s5692_s12 = smov 12   ;;  %vm1636_vm4 = vcmask 130048   ;;  %vm1669_vm5 = vcmask 162816   ;;  %vm1702_vm6 = vcmask 195584   ;;  %vm1735_vm7 = vcmask 228352  }
  0x17   : > { %s219_s30 = scalar_select %p218_p10, %s5761_s22, 1  ;;  %vm1768_vm8 = vcmask 261120   ;;  %vm1813_vm9 = vcmask 293888   ;;  %vm2173_vm10 = vcmask 25600   ;;  %vm2179_vm11 = vcmask 24576  }
  0x18   : > { %s5693_s13 = smov 16   ;;  %s5694_s14 = smov 20   ;;  %vm4932_vm12 = vcmask 326656   ;;  %vm4935_vm13 = vcmask 359424   ;;  %vm4938_vm14 = vcmask 392192   ;;  %vm4941_vm15 = vcmask 424960  }
  0x19   : > { %s5539_s6 = smul.u32 432, %s219_s30  ;;  %s5695_s15 = smov 24  }
  0x1a   : > { %s5696_s17 = smov 28   ;;  %s5697_s23 = smov 32  }
  0x1b   : > { %s5793_s9 = scalar_lea.vmem %s9126_s0, %s5539_s6  ;;  %s5701_s25 = smov 36  }
  0x1c   : > { %v5796_v0 = vld [vmem:[%s5793_s9 + $0x19] sm:$0xff]  ;;  %v255_v1 = vld [vmem:[%s5793_s9 + $0x1] sm:$0xff]  ;;  %v256_v3 = vld [vmem:[%s5793_s9 + $0x9] sm:$0xff]  ;;  %s5702_s26 = smov 40   ;;  %s5703_s30 = smov 44  }
  0x1d   : > { %549 = vrot.lane.b32.xlu1 %v5796_v0, %s5690_s10  ;;  %545 = vrot.lane.b32.xlu0 %v255_v1, %s5690_s10  ;;  %v5803_v2 = vld [vmem:[%s5793_s9 + $0x21] sm:$0xff]  ;;  %v5810_v4 = vld [vmem:[%s5793_s9 + $0x39] sm:$0xff]  ;;  %s5704_s6 = smov 48   ;;  %s5705_s7 = smov 52  }
  0x1e   : > { %v5813_v5 = vld [vmem:[%s5793_s9 + $0x31] sm:$0xff]  ;;  %v5823_v7 = vld [vmem:[%s5793_s9 + $0x49] sm:$0xff]  ;;  %v5833_v9 = vld [vmem:[%s5793_s9 + $0x61] sm:$0xff]  ;;  %s9170_s8 = smov 56   ;;  %s9169_s16 = smov 60  }
  0x1f   : > { %v5820_v6 = vld [vmem:[%s5793_s9 + $0x51] sm:$0xff]  ;;  %v5830_v8 = vld [vmem:[%s5793_s9 + $0x69] sm:$0xff]  ;;  %v5840_v10 = vld [vmem:[%s5793_s9 + $0x81] sm:$0xff] }
  0x20   : > { %v5843_v11 = vld [vmem:[%s5793_s9 + $0x79] sm:$0xff]  ;;  %v5853_v13 = vld [vmem:[%s5793_s9 + $0x91] sm:$0xff]  ;;  %v5863_v15 = vld [vmem:[%s5793_s9 + $0xa9] sm:$0xff] }
  0x21   : > { %551 = vrot.lane.b32.xlu1 %v5803_v2, %s5690_s10  ;;  %547 = vrot.lane.b32.xlu0 %v256_v3, %s5690_s10  ;;  %v5850_v12 = vld [vmem:[%s5793_s9 + $0x99] sm:$0xff]  ;;  %v5860_v14 = vld [vmem:[%s5793_s9 + $0xb1] sm:$0xff] }
  0x22   : > { %v5870_v16 = vld [vmem:[%s5793_s9 + $0xc9] sm:$0xff]  ;;  %v5873_v17 = vld [vmem:[%s5793_s9 + $0xc1] sm:$0xff]  ;;  %v5883_v19 = vld [vmem:[%s5793_s9 + $0xd9] sm:$0xff] }
  0x23   : > { %v5880_v18 = vld [vmem:[%s5793_s9 + $0xe1] sm:$0xff]  ;;  %v5890_v20 = vld [vmem:[%s5793_s9 + $0xf9] sm:$0xff]  ;;  %v5893_v21 = vld [vmem:[%s5793_s9 + $0xf1] sm:$0xff] }
  0x24   : > { %v5900_v22 = vld [vmem:[%s5793_s9 + $0x111] sm:$0xff]  ;;  %v5903_v23 = vld [vmem:[%s5793_s9 + $0x109] sm:$0xff]  ;;  %v5913_v25 = vld [vmem:[%s5793_s9 + $0x121] sm:$0xff] }
  0x25   : > { %555 = vrot.lane.b32.xlu1 %v5810_v4, %s5690_s10  ;;  %553 = vrot.lane.b32.xlu0 %v5813_v5, %s5690_s10  ;;  %v5910_v24 = vld [vmem:[%s5793_s9 + $0x129] sm:$0xff]  ;;  %v5920_v26 = vld [vmem:[%s5793_s9 + $0x141] sm:$0xff] }
  0x26   : > { %v5923_v27 = vld [vmem:[%s5793_s9 + $0x139] sm:$0xff]  ;;  %v5933_v29 = vld [vmem:[%s5793_s9 + $0x151] sm:$0xff]  ;;  %v5943_v31 = vld [vmem:[%s5793_s9 + $0x169] sm:$0xff] }
  0x27   : > { %v5930_v28 = vld [vmem:[%s5793_s9 + $0x159] sm:$0xff]  ;;  %v5940_v30 = vld [vmem:[%s5793_s9 + $0x171] sm:$0xff]  ;;  %v287_v33 = vld [vmem:[%s5793_s9 + $0x2] sm:$0xff] }
  0x28   : > { %v288_v32 = vld [vmem:[%s5793_s9 + $0xa] sm:$0xff]  ;;  %v5954_v34 = vld [vmem:[%s5793_s9 + $0x22] sm:$0xff]  ;;  %v5957_v35 = vld [vmem:[%s5793_s9 + $0x1a] sm:$0xff] }
  0x29   : > { %559 = vrot.lane.b32.xlu1 %v5820_v6, %s5690_s10  ;;  %557 = vrot.lane.b32.xlu0 %v5823_v7, %s5690_s10  ;;  %v5964_v36 = vld [vmem:[%s5793_s9 + $0x3a] sm:$0xff]  ;;  %v5967_v37 = vld [vmem:[%s5793_s9 + $0x32] sm:$0xff] }
  0x2a   : > { %v5974_v38 = vld [vmem:[%s5793_s9 + $0x52] sm:$0xff]  ;;  %v5977_v39 = vld [vmem:[%s5793_s9 + $0x4a] sm:$0xff]  ;;  %v5987_v41 = vld [vmem:[%s5793_s9 + $0x62] sm:$0xff] }
  0x2b   : > { %v5984_v40 = vld [vmem:[%s5793_s9 + $0x6a] sm:$0xff]  ;;  %v5994_v42 = vld [vmem:[%s5793_s9 + $0x82] sm:$0xff]  ;;  %v5997_v43 = vld [vmem:[%s5793_s9 + $0x7a] sm:$0xff] }
  0x2c   : > { %v6004_v44 = vld [vmem:[%s5793_s9 + $0x9a] sm:$0xff]  ;;  %v6007_v45 = vld [vmem:[%s5793_s9 + $0x92] sm:$0xff]  ;;  %v6017_v47 = vld [vmem:[%s5793_s9 + $0xaa] sm:$0xff] }
  0x2d   : > { %563 = vrot.lane.b32.xlu1 %v5830_v8, %s5690_s10  ;;  %561 = vrot.lane.b32.xlu0 %v5833_v9, %s5690_s10  ;;  %v6014_v46 = vld [vmem:[%s5793_s9 + $0xb2] sm:$0xff]  ;;  %v6024_v48 = vld [vmem:[%s5793_s9 + $0xca] sm:$0xff] }
  0x2e   : > { %v6027_v49 = vld [vmem:[%s5793_s9 + $0xc2] sm:$0xff]  ;;  %v6037_v51 = vld [vmem:[%s5793_s9 + $0xda] sm:$0xff]  ;;  %v6047_v53 = vld [vmem:[%s5793_s9 + $0xf2] sm:$0xff] }
  0x2f   : > { %v6034_v50 = vld [vmem:[%s5793_s9 + $0xe2] sm:$0xff]  ;;  %v6044_v52 = vld [vmem:[%s5793_s9 + $0xfa] sm:$0xff]  ;;  %v6054_v54 = vld [vmem:[%s5793_s9 + $0x112] sm:$0xff] }
  0x30   : > { %v6057_v55 = vld [vmem:[%s5793_s9 + $0x10a] sm:$0xff]  ;;  %v6067_v57 = vld [vmem:[%s5793_s9 + $0x122] sm:$0xff]  ;;  %v6077_v59 = vld [vmem:[%s5793_s9 + $0x13a] sm:$0xff] }
  0x31   : > { %567 = vrot.lane.b32.xlu1 %v5840_v10, %s5690_s10  ;;  %565 = vrot.lane.b32.xlu0 %v5843_v11, %s5690_s10  ;;  %v6064_v56 = vld [vmem:[%s5793_s9 + $0x12a] sm:$0xff]  ;;  %v6074_v58 = vld [vmem:[%s5793_s9 + $0x142] sm:$0xff]  ;;  %9174 = vst [vmem:[#allocation7_spill] sm:$0xff] %v6077_v59 }
  0x32   : > { %9173 = vst [vmem:[#allocation6_spill] sm:$0xff] %v6074_v58  ;;  %v6088_v62 = vld [vmem:[%s5793_s9 + $0x15a] sm:$0xff]  ;;  %v6091_v63 = vld [vmem:[%s5793_s9 + $0x152] sm:$0xff] }
  0x33   : > { %9177 = vst [vmem:[#allocation10_spill] sm:$0xff] %v6088_v62  ;;  %9178 = vst [vmem:[#allocation11_spill] sm:$0xff] %v6091_v63 }
  0x35   : > { %571 = vrot.lane.b32.xlu1 %v5850_v12, %s5690_s10  ;;  %569 = vrot.lane.b32.xlu0 %v5853_v13, %s5690_s10 }
  0x39   : > { %575 = vrot.lane.b32.xlu1 %v5860_v14, %s5690_s10  ;;  %573 = vrot.lane.b32.xlu0 %v5863_v15, %s5690_s10 }
  0x3d   : > { %579 = vrot.lane.b32.xlu1 %v5870_v16, %s5690_s10  ;;  %577 = vrot.lane.b32.xlu0 %v5873_v17, %s5690_s10 }
  0x41   : > { %583 = vrot.lane.b32.xlu1 %v5880_v18, %s5690_s10  ;;  %581 = vrot.lane.b32.xlu0 %v5883_v19, %s5690_s10 }
  0x45   : > { %587 = vrot.lane.b32.xlu1 %v5890_v20, %s5690_s10  ;;  %585 = vrot.lane.b32.xlu0 %v5893_v21, %s5690_s10 }
  0x49   : > { %591 = vrot.lane.b32.xlu1 %v5900_v22, %s5690_s10  ;;  %589 = vrot.lane.b32.xlu0 %v5903_v23, %s5690_s10 }
  0x4d   : > { %595 = vrot.lane.b32.xlu1 %v5910_v24, %s5690_s10  ;;  %593 = vrot.lane.b32.xlu0 %v5913_v25, %s5690_s10 }
  0x51   : > { %599 = vrot.lane.b32.xlu1 %v5920_v26, %s5690_s10  ;;  %597 = vrot.lane.b32.xlu0 %v5923_v27, %s5690_s10 }
  0x55   : > { %603 = vrot.lane.b32.xlu1 %v5930_v28, %s5690_s10  ;;  %601 = vrot.lane.b32.xlu0 %v5933_v29, %s5690_s10 }
  0x59   : > { %607 = vrot.lane.b32.xlu1 %v5940_v30, %s5690_s10  ;;  %605 = vrot.lane.b32.xlu0 %v5943_v31, %s5690_s10 }
  0x5d   : > { %675 = vrot.lane.b32.xlu1 %v288_v32, %s5691_s11  ;;  %673 = vrot.lane.b32.xlu0 %v287_v33, %s5691_s11  ;;  %v6102_v32 = vld [vmem:[%s5793_s9 + $0x172] sm:$0xff]  ;;  %v6105_v33 = vld [vmem:[%s5793_s9 + $0x16a] sm:$0xff] }
  0x5e   : > { %9181 = vst [vmem:[#allocation14_spill] sm:$0xff] %v6102_v32  ;;  %9182 = vst [vmem:[#allocation15_spill] sm:$0xff] %v6105_v33 }
  0x61   : > { %679 = vrot.lane.b32.xlu1 %v5954_v34, %s5691_s11  ;;  %677 = vrot.lane.b32.xlu0 %v5957_v35, %s5691_s11 }
  0x65   : > { %683 = vrot.lane.b32.xlu1 %v5964_v36, %s5691_s11  ;;  %681 = vrot.lane.b32.xlu0 %v5967_v37, %s5691_s11 }
  0x69   : > { %687 = vrot.lane.b32.xlu1 %v5974_v38, %s5691_s11  ;;  %685 = vrot.lane.b32.xlu0 %v5977_v39, %s5691_s11 }
  0x6d   : > { %691 = vrot.lane.b32.xlu1 %v5984_v40, %s5691_s11  ;;  %689 = vrot.lane.b32.xlu0 %v5987_v41, %s5691_s11 }
  0x71   : > { %695 = vrot.lane.b32.xlu1 %v5994_v42, %s5691_s11  ;;  %693 = vrot.lane.b32.xlu0 %v5997_v43, %s5691_s11 }
  0x75   : > { %699 = vrot.lane.b32.xlu1 %v6004_v44, %s5691_s11  ;;  %697 = vrot.lane.b32.xlu0 %v6007_v45, %s5691_s11 }
  0x79   : > { %703 = vrot.lane.b32.xlu1 %v6014_v46, %s5691_s11  ;;  %701 = vrot.lane.b32.xlu0 %v6017_v47, %s5691_s11 }
  0x7d   : > { %707 = vrot.lane.b32.xlu1 %v6024_v48, %s5691_s11  ;;  %705 = vrot.lane.b32.xlu0 %v6027_v49, %s5691_s11 }
  0x81   : > { %711 = vrot.lane.b32.xlu1 %v6034_v50, %s5691_s11  ;;  %709 = vrot.lane.b32.xlu0 %v6037_v51, %s5691_s11 }
  0x85   : > { %715 = vrot.lane.b32.xlu1 %v6044_v52, %s5691_s11  ;;  %713 = vrot.lane.b32.xlu0 %v6047_v53, %s5691_s11 }
  0x89   : > { %719 = vrot.lane.b32.xlu1 %v6054_v54, %s5691_s11  ;;  %717 = vrot.lane.b32.xlu0 %v6057_v55, %s5691_s11 }
  0x8d   : > { %723 = vrot.lane.b32.xlu1 %v6064_v56, %s5691_s11  ;;  %721 = vrot.lane.b32.xlu0 %v6067_v57, %s5691_s11 }
  0x8f   : > { %v6079_v60 = vpop.permute.xlu1 %549  ;;  %v6081_v61 = vpop.permute.xlu0 %545 }
  0x90   : > { %9175 = vst [vmem:[#allocation8_spill] sm:$0xff] %v6079_v60  ;;  %9176 = vst [vmem:[#allocation9_spill] sm:$0xff] %v6081_v61 }
  0x91   : > { %727 = vrot.lane.b32.xlu1 %v6074_v58, %s5691_s11  ;;  %725 = vrot.lane.b32.xlu0 %v6077_v59, %s5691_s11  ;;  %v253_v59 = vld [vmem:[%s5793_s9 + $0x168] sm:$0xff] }
  0x93   : > { %v6093_v1 = vpop.permute.xlu1 %551  ;;  %v6095_v3 = vpop.permute.xlu0 %547 }
  0x94   : > { %9179 = vst [vmem:[#allocation12_spill] sm:$0xff] %v6093_v1  ;;  %9180 = vst [vmem:[#allocation13_spill] sm:$0xff] %v6095_v3 }
  0x95   : > { %731 = vrot.lane.b32.xlu1 %v6088_v62, %s5691_s11  ;;  %729 = vrot.lane.b32.xlu0 %v6091_v63, %s5691_s11  ;;  %v6120_v63 = vld [vmem:[%s5793_s9 + $0x18] sm:$0xff]  ;;  %v6123_v62 = vld [vmem:[%s5793_s9 + $0x20] sm:$0xff] }
  0x96   : > { %9187 = vst [vmem:[#allocation20_spill] sm:$0xff] %v6120_v63  ;;  %9188 = vst [vmem:[#allocation21_spill] sm:$0xff] %v6123_v62 }
  0x97   : > { %v6107_v60 = vpop.permute.xlu1 %555  ;;  %v6109_v61 = vpop.permute.xlu0 %553 }
  0x98   : > { %9183 = vst [vmem:[#allocation16_spill] sm:$0xff] %v6107_v60  ;;  %9184 = vst [vmem:[#allocation17_spill] sm:$0xff] %v6109_v61 }
  0x99   : > { %735 = vrot.lane.b32.xlu1 %v6102_v32, %s5691_s11  ;;  %733 = vrot.lane.b32.xlu0 %v6105_v33, %s5691_s11  ;;  %v6148_v33 = vld [vmem:[%s5793_s9 + $0x50] sm:$0xff] }
  0x9a   : > { %9195 = vst [vmem:[#allocation28_spill] sm:$0xff] %v6148_v33 }
  0x9b   : > { %v6115_v1 = vpop.permute.xlu1 %559  ;;  %v6117_v3 = vpop.permute.xlu0 %557 }
  0x9c   : > { %9185 = vst [vmem:[#allocation18_spill] sm:$0xff] %v6115_v1  ;;  %9186 = vst [vmem:[#allocation19_spill] sm:$0xff] %v6117_v3  ;;  %v6134_v1 = vld [vmem:[%s5793_s9 + $0x38] sm:$0xff]  ;;  %v6137_v3 = vld [vmem:[%s5793_s9 + $0x30] sm:$0xff] }
  0x9d   : > { %803 = vrot.lane.b32.xlu1 %v6123_v62, %s5692_s12  ;;  %801 = vrot.lane.b32.xlu0 %v6120_v63, %s5692_s12  ;;  %9191 = vst [vmem:[#allocation24_spill] sm:$0xff] %v6134_v1  ;;  %9192 = vst [vmem:[#allocation25_spill] sm:$0xff] %v6137_v3 }
  0x9f   : > { %v6129_v60 = vpop.permute.xlu1 %563  ;;  %v6131_v61 = vpop.permute.xlu0 %561 }
  0xa0   : > { %9189 = vst [vmem:[#allocation22_spill] sm:$0xff] %v6129_v60  ;;  %9190 = vst [vmem:[#allocation23_spill] sm:$0xff] %v6131_v61  ;;  %v6151_v60 = vld [vmem:[%s5793_s9 + $0x48] sm:$0xff] }
  0xa1   : > { %807 = vrot.lane.b32.xlu1 %v6134_v1, %s5692_s12  ;;  %805 = vrot.lane.b32.xlu0 %v6137_v3, %s5692_s12  ;;  %9196 = vst [vmem:[#allocation29_spill] sm:$0xff] %v6151_v60  ;;  %v6162_v1 = vld [vmem:[%s5793_s9 + $0x68] sm:$0xff] }
  0xa2   : > { %9199 = vst [vmem:[#allocation32_spill] sm:$0xff] %v6162_v1 }
  0xa3   : > { %v6143_v62 = vpop.permute.xlu1 %567  ;;  %v6145_v63 = vpop.permute.xlu0 %565 }
  0xa4   : > { %9193 = vst [vmem:[#allocation26_spill] sm:$0xff] %v6143_v62  ;;  %9194 = vst [vmem:[#allocation27_spill] sm:$0xff] %v6145_v63  ;;  %v6165_v62 = vld [vmem:[%s5793_s9 + $0x60] sm:$0xff] }
  0xa5   : > { %811 = vrot.lane.b32.xlu1 %v6148_v33, %s5692_s12  ;;  %809 = vrot.lane.b32.xlu0 %v6151_v60, %s5692_s12  ;;  %9200 = vst [vmem:[#allocation33_spill] sm:$0xff] %v6165_v62  ;;  %v6176_v33 = vld [vmem:[%s5793_s9 + $0x80] sm:$0xff] }
  0xa6   : > { %9203 = vst [vmem:[#allocation36_spill] sm:$0xff] %v6176_v33 }
  0xa7   : > { %v6157_v61 = vpop.permute.xlu1 %571  ;;  %v6159_v3 = vpop.permute.xlu0 %569 }
  0xa8   : > { %9197 = vst [vmem:[#allocation30_spill] sm:$0xff] %v6157_v61  ;;  %9198 = vst [vmem:[#allocation31_spill] sm:$0xff] %v6159_v3  ;;  %v6179_v61 = vld [vmem:[%s5793_s9 + $0x78] sm:$0xff] }
  0xa9   : > { %815 = vrot.lane.b32.xlu1 %v6162_v1, %s5692_s12  ;;  %813 = vrot.lane.b32.xlu0 %v6165_v62, %s5692_s12  ;;  %9204 = vst [vmem:[#allocation37_spill] sm:$0xff] %v6179_v61  ;;  %v6190_v1 = vld [vmem:[%s5793_s9 + $0x98] sm:$0xff] }
  0xaa   : > { %9207 = vst [vmem:[#allocation40_spill] sm:$0xff] %v6190_v1 }
  0xab   : > { %v6171_v63 = vpop.permute.xlu1 %575  ;;  %v6173_v60 = vpop.permute.xlu0 %573 }
  0xac   : > { %9201 = vst [vmem:[#allocation34_spill] sm:$0xff] %v6171_v63  ;;  %9202 = vst [vmem:[#allocation35_spill] sm:$0xff] %v6173_v60  ;;  %v6193_v63 = vld [vmem:[%s5793_s9 + $0x90] sm:$0xff] }
  0xad   : > { %819 = vrot.lane.b32.xlu1 %v6176_v33, %s5692_s12  ;;  %817 = vrot.lane.b32.xlu0 %v6179_v61, %s5692_s12  ;;  %9208 = vst [vmem:[#allocation41_spill] sm:$0xff] %v6193_v63  ;;  %v6204_v33 = vld [vmem:[%s5793_s9 + $0xb0] sm:$0xff] }
  0xae   : > { %9211 = vst [vmem:[#allocation44_spill] sm:$0xff] %v6204_v33 }
  0xaf   : > { %v6185_v3 = vpop.permute.xlu1 %579  ;;  %v6187_v62 = vpop.permute.xlu0 %577 }
  0xb0   : > { %9205 = vst [vmem:[#allocation38_spill] sm:$0xff] %v6185_v3  ;;  %9206 = vst [vmem:[#allocation39_spill] sm:$0xff] %v6187_v62  ;;  %v6207_v3 = vld [vmem:[%s5793_s9 + $0xa8] sm:$0xff] }
  0xb1   : > { %823 = vrot.lane.b32.xlu1 %v6190_v1, %s5692_s12  ;;  %821 = vrot.lane.b32.xlu0 %v6193_v63, %s5692_s12  ;;  %9212 = vst [vmem:[#allocation45_spill] sm:$0xff] %v6207_v3  ;;  %v6218_v1 = vld [vmem:[%s5793_s9 + $0xc8] sm:$0xff] }
  0xb2   : > { %9215 = vst [vmem:[#allocation48_spill] sm:$0xff] %v6218_v1 }
  0xb3   : > { %v6199_v60 = vpop.permute.xlu1 %583  ;;  %v6201_v61 = vpop.permute.xlu0 %581 }
  0xb4   : > { %9209 = vst [vmem:[#allocation42_spill] sm:$0xff] %v6199_v60  ;;  %9210 = vst [vmem:[#allocation43_spill] sm:$0xff] %v6201_v61  ;;  %v6221_v60 = vld [vmem:[%s5793_s9 + $0xc0] sm:$0xff] }
  0xb5   : > { %827 = vrot.lane.b32.xlu1 %v6204_v33, %s5692_s12  ;;  %825 = vrot.lane.b32.xlu0 %v6207_v3, %s5692_s12  ;;  %9216 = vst [vmem:[#allocation49_spill] sm:$0xff] %v6221_v60  ;;  %v6232_v33 = vld [vmem:[%s5793_s9 + $0xe0] sm:$0xff] }
  0xb6   : > { %9219 = vst [vmem:[#allocation52_spill] sm:$0xff] %v6232_v33 }
  0xb7   : > { %v6213_v62 = vpop.permute.xlu1 %587  ;;  %v6215_v63 = vpop.permute.xlu0 %585 }
  0xb8   : > { %9213 = vst [vmem:[#allocation46_spill] sm:$0xff] %v6213_v62  ;;  %9214 = vst [vmem:[#allocation47_spill] sm:$0xff] %v6215_v63  ;;  %v6235_v62 = vld [vmem:[%s5793_s9 + $0xd8] sm:$0xff] }
  0xb9   : > { %831 = vrot.lane.b32.xlu1 %v6218_v1, %s5692_s12  ;;  %829 = vrot.lane.b32.xlu0 %v6221_v60, %s5692_s12  ;;  %9220 = vst [vmem:[#allocation53_spill] sm:$0xff] %v6235_v62  ;;  %v6246_v1 = vld [vmem:[%s5793_s9 + $0xf8] sm:$0xff] }
  0xba   : > { %9223 = vst [vmem:[#allocation56_spill] sm:$0xff] %v6246_v1 }
  0xbb   : > { %v6227_v61 = vpop.permute.xlu1 %591  ;;  %v6229_v3 = vpop.permute.xlu0 %589 }
  0xbc   : > { %9217 = vst [vmem:[#allocation50_spill] sm:$0xff] %v6227_v61  ;;  %9218 = vst [vmem:[#allocation51_spill] sm:$0xff] %v6229_v3  ;;  %v6249_v61 = vld [vmem:[%s5793_s9 + $0xf0] sm:$0xff] }
  0xbd   : > { %835 = vrot.lane.b32.xlu1 %v6232_v33, %s5692_s12  ;;  %833 = vrot.lane.b32.xlu0 %v6235_v62, %s5692_s12  ;;  %9224 = vst [vmem:[#allocation57_spill] sm:$0xff] %v6249_v61  ;;  %v6260_v33 = vld [vmem:[%s5793_s9 + $0x110] sm:$0xff] }
  0xbe   : > { %9227 = vst [vmem:[#allocation60_spill] sm:$0xff] %v6260_v33 }
  0xbf   : > { %v6241_v63 = vpop.permute.xlu1 %595  ;;  %v6243_v60 = vpop.permute.xlu0 %593 }
  0xc0   : > { %9221 = vst [vmem:[#allocation54_spill] sm:$0xff] %v6241_v63  ;;  %9222 = vst [vmem:[#allocation55_spill] sm:$0xff] %v6243_v60  ;;  %v6263_v63 = vld [vmem:[%s5793_s9 + $0x108] sm:$0xff] }
  0xc1   : > { %839 = vrot.lane.b32.xlu1 %v6246_v1, %s5692_s12  ;;  %837 = vrot.lane.b32.xlu0 %v6249_v61, %s5692_s12  ;;  %9228 = vst [vmem:[#allocation61_spill] sm:$0xff] %v6263_v63  ;;  %v6274_v1 = vld [vmem:[%s5793_s9 + $0x128] sm:$0xff] }
  0xc2   : > { %9231 = vst [vmem:[#allocation64_spill] sm:$0xff] %v6274_v1 }
  0xc3   : > { %v6255_v3 = vpop.permute.xlu1 %599  ;;  %v6257_v62 = vpop.permute.xlu0 %597 }
  0xc4   : > { %9225 = vst [vmem:[#allocation58_spill] sm:$0xff] %v6255_v3  ;;  %9226 = vst [vmem:[#allocation59_spill] sm:$0xff] %v6257_v62  ;;  %v6277_v3 = vld [vmem:[%s5793_s9 + $0x120] sm:$0xff] }
  0xc5   : > { %843 = vrot.lane.b32.xlu1 %v6260_v33, %s5692_s12  ;;  %841 = vrot.lane.b32.xlu0 %v6263_v63, %s5692_s12  ;;  %9232 = vst [vmem:[#allocation65_spill] sm:$0xff] %v6277_v3  ;;  %v6288_v33 = vld [vmem:[%s5793_s9 + $0x140] sm:$0xff] }
  0xc6   : > { %9235 = vst [vmem:[#allocation68_spill] sm:$0xff] %v6288_v33 }
  0xc7   : > { %v6269_v60 = vpop.permute.xlu1 %603  ;;  %v6271_v61 = vpop.permute.xlu0 %601 }
  0xc8   : > { %9229 = vst [vmem:[#allocation62_spill] sm:$0xff] %v6269_v60  ;;  %9230 = vst [vmem:[#allocation63_spill] sm:$0xff] %v6271_v61  ;;  %v6291_v61 = vld [vmem:[%s5793_s9 + $0x138] sm:$0xff] }
  0xc9   : > { %847 = vrot.lane.b32.xlu1 %v6274_v1, %s5692_s12  ;;  %845 = vrot.lane.b32.xlu0 %v6277_v3, %s5692_s12  ;;  %9236 = vst [vmem:[#allocation69_spill] sm:$0xff] %v6291_v61  ;;  %v252_v1 = vld [vmem:[%s5793_s9 + $0x158] sm:$0xff] }
  0xcb   : > { %v6283_v62 = vpop.permute.xlu1 %607  ;;  %v6285_v63 = vpop.permute.xlu0 %605 }
  0xcc   : > { %9233 = vst [vmem:[#allocation66_spill] sm:$0xff] %v6283_v62  ;;  %9234 = vst [vmem:[#allocation67_spill] sm:$0xff] %v6285_v63  ;;  %v6303_v62 = vld [vmem:[%s5793_s9 + $0x150] sm:$0xff] }
  0xcd   : > { %851 = vrot.lane.b32.xlu1 %v6288_v33, %s5692_s12  ;;  %849 = vrot.lane.b32.xlu0 %v6291_v61, %s5692_s12  ;;  %v254_v33 = vld [vmem:[%s5793_s9 + $0x170] sm:$0xff] }
  0xcf   : > { %v6297_v60 = vpop.permute.xlu1 %675  ;;  %v6299_v3 = vpop.permute.xlu0 %673 }
  0xd0   : > { %9237 = vst [vmem:[#allocation70_spill] sm:$0xff] %v6297_v60  ;;  %9238 = vst [vmem:[#allocation71_spill] sm:$0xff] %v6299_v3  ;;  %v5066_v60 = vld [vmem:[%s5793_s9 + $0x188] sm:$0xff]  ;;  %v5065_v3 = vld [vmem:[%s5793_s9 + $0x180] sm:$0xff] }
  0xd1   : > { %855 = vrot.lane.b32.xlu1 %v252_v1, %s5692_s12  ;;  %853 = vrot.lane.b32.xlu0 %v6303_v62, %s5692_s12 }
  0xd3   : > { %v6308_v63 = vpop.permute.xlu1 %679  ;;  %v6310_v32 = vpop.permute.xlu0 %677 }
  0xd4   : > { %9239 = vst [vmem:[#allocation72_spill] sm:$0xff] %v6308_v63 }
  0xd5   : > { %859 = vrot.lane.b32.xlu1 %v254_v33, %s5692_s12  ;;  %857 = vrot.lane.b32.xlu0 %v253_v59, %s5692_s12 }
  0xd7   : > { %v6318_v61 = vpop.permute.xlu1 %683  ;;  %v6320_v58 = vpop.permute.xlu0 %681 }
  0xd9   : > { %863 = vrot.lane.b32.xlu1 %v5066_v60, %s5692_s12  ;;  %861 = vrot.lane.b32.xlu0 %v5065_v3, %s5692_s12 }
  0xdb   : > { %v6324_v1 = vpop.permute.xlu1 %687  ;;  %v6326_v63 = vpop.permute.xlu0 %685 }
  0xdd   : > { %931 = vrot.lane.b32.xlu1 %v5803_v2, %s5693_s13  ;;  %929 = vrot.lane.b32.xlu0 %v5796_v0, %s5693_s13 }
  0xdf   : > { %v6332_v59 = vpop.permute.xlu1 %691  ;;  %v6334_v33 = vpop.permute.xlu0 %689 }
  0xe1   : > { %935 = vrot.lane.b32.xlu1 %v5810_v4, %s5693_s13  ;;  %933 = vrot.lane.b32.xlu0 %v5813_v5, %s5693_s13 }
  0xe3   : > { %v6340_v60 = vpop.permute.xlu1 %695  ;;  %v6342_v3 = vpop.permute.xlu0 %693 }
  0xe4   : > { %9240 = vst [vmem:[#allocation73_spill] sm:$0xff] %v6340_v60 }
  0xe5   : > { %939 = vrot.lane.b32.xlu1 %v5820_v6, %s5693_s13  ;;  %937 = vrot.lane.b32.xlu0 %v5823_v7, %s5693_s13 }
  0xe7   : > { %v6348_v0 = vpop.permute.xlu1 %699  ;;  %v6350_v2 = vpop.permute.xlu0 %697 }
  0xe8   : > { %9241 = vst [vmem:[#allocation74_spill] sm:$0xff] %v6348_v0  ;;  %9242 = vst [vmem:[#allocation75_spill] sm:$0xff] %v6350_v2 }
  0xe9   : > { %943 = vrot.lane.b32.xlu1 %v5830_v8, %s5693_s13  ;;  %941 = vrot.lane.b32.xlu0 %v5833_v9, %s5693_s13 }
  0xeb   : > { %v6356_v4 = vpop.permute.xlu1 %703  ;;  %v6358_v5 = vpop.permute.xlu0 %701 }
  0xec   : > { %9243 = vst [vmem:[#allocation76_spill] sm:$0xff] %v6356_v4  ;;  %9244 = vst [vmem:[#allocation77_spill] sm:$0xff] %v6358_v5  ;;  %v5170_v4 = vld [vmem:[%s5793_s9 + $0x81] sm:$0xff] }
  0xed   : > { %947 = vrot.lane.b32.xlu1 %v5840_v10, %s5693_s13  ;;  %945 = vrot.lane.b32.xlu0 %v5843_v11, %s5693_s13 }
  0xef   : > { %v6364_v6 = vpop.permute.xlu1 %707  ;;  %v6366_v7 = vpop.permute.xlu0 %705 }
  0xf0   : > { %9245 = vst [vmem:[#allocation78_spill] sm:$0xff] %v6364_v6  ;;  %9246 = vst [vmem:[#allocation79_spill] sm:$0xff] %v6366_v7  ;;  %v5198_v6 = vld [vmem:[%s5793_s9 + $0x52] sm:$0xff] }
  0xf1   : > { %951 = vrot.lane.b32.xlu1 %v5850_v12, %s5693_s13  ;;  %949 = vrot.lane.b32.xlu0 %v5853_v13, %s5693_s13 }
  0xf3   : > { %v6372_v8 = vpop.permute.xlu1 %711  ;;  %v6374_v9 = vpop.permute.xlu0 %709 }
  0xf4   : > { %9247 = vst [vmem:[#allocation80_spill] sm:$0xff] %v6372_v8  ;;  %9248 = vst [vmem:[#allocation81_spill] sm:$0xff] %v6374_v9 }
  0xf5   : > { %955 = vrot.lane.b32.xlu1 %v5860_v14, %s5693_s13  ;;  %953 = vrot.lane.b32.xlu0 %v5863_v15, %s5693_s13 }
  0xf7   : > { %v6380_v10 = vpop.permute.xlu1 %715  ;;  %v6382_v11 = vpop.permute.xlu0 %713 }
  0xf8   : > { %9249 = vst [vmem:[#allocation82_spill] sm:$0xff] %v6380_v10  ;;  %9250 = vst [vmem:[#allocation83_spill] sm:$0xff] %v6382_v11 }
  0xf9   : > { %959 = vrot.lane.b32.xlu1 %v5870_v16, %s5693_s13  ;;  %957 = vrot.lane.b32.xlu0 %v5873_v17, %s5693_s13 }
  0xfb   : > { %v6388_v12 = vpop.permute.xlu1 %719  ;;  %v6390_v13 = vpop.permute.xlu0 %717 }
  0xfc   : > { %9251 = vst [vmem:[#allocation84_spill] sm:$0xff] %v6388_v12  ;;  %9252 = vst [vmem:[#allocation85_spill] sm:$0xff] %v6390_v13 }
  0xfd   : > { %963 = vrot.lane.b32.xlu1 %v5880_v18, %s5693_s13  ;;  %961 = vrot.lane.b32.xlu0 %v5883_v19, %s5693_s13 }
  0xff   : > { %v6396_v14 = vpop.permute.xlu1 %723  ;;  %v6398_v15 = vpop.permute.xlu0 %721 }
 0x100   : > { %9253 = vst [vmem:[#allocation86_spill] sm:$0xff] %v6396_v14  ;;  %9254 = vst [vmem:[#allocation87_spill] sm:$0xff] %v6398_v15  ;;  %v9291_v15 = vld [vmem:[#allocation28_spill] sm:$0xff]  ;;  %v9292_v14 = vld [vmem:[#allocation29_spill] sm:$0xff] }
 0x101   : > { %967 = vrot.lane.b32.xlu1 %v5890_v20, %s5693_s13  ;;  %965 = vrot.lane.b32.xlu0 %v5893_v21, %s5693_s13 }
 0x103   : > { %v6404_v16 = vpop.permute.xlu1 %727  ;;  %v6406_v17 = vpop.permute.xlu0 %725 }
 0x104   : > { %9255 = vst [vmem:[#allocation88_spill] sm:$0xff] %v6404_v16  ;;  %9256 = vst [vmem:[#allocation89_spill] sm:$0xff] %v6406_v17  ;;  %v9290_v16 = vld [vmem:[#allocation25_spill] sm:$0xff] }
 0x105   : > { %971 = vrot.lane.b32.xlu1 %v5900_v22, %s5693_s13  ;;  %969 = vrot.lane.b32.xlu0 %v5903_v23, %s5693_s13 }
 0x107   : > { %v6412_v18 = vpop.permute.xlu1 %731  ;;  %v6414_v19 = vpop.permute.xlu0 %729 }
 0x108   : > { %9257 = vst [vmem:[#allocation90_spill] sm:$0xff] %v6412_v18  ;;  %9258 = vst [vmem:[#allocation91_spill] sm:$0xff] %v6414_v19 }
 0x109   : > { %975 = vrot.lane.b32.xlu1 %v5910_v24, %s5693_s13  ;;  %973 = vrot.lane.b32.xlu0 %v5913_v25, %s5693_s13 }
 0x10b   : > { %v6420_v20 = vpop.permute.xlu1 %735  ;;  %v6422_v21 = vpop.permute.xlu0 %733 }
 0x10c   : > { %9259 = vst [vmem:[#allocation92_spill] sm:$0xff] %v6420_v20  ;;  %9260 = vst [vmem:[#allocation93_spill] sm:$0xff] %v6422_v21 }
 0x10d   : > { %979 = vrot.lane.b32.xlu1 %v5920_v26, %s5693_s13  ;;  %977 = vrot.lane.b32.xlu0 %v5923_v27, %s5693_s13  ;;  %v6445_v26 = vld [vmem:[%s5793_s9 + $0x189] sm:$0xff]  ;;  %v6448_v27 = vld [vmem:[%s5793_s9 + $0x181] sm:$0xff] }
 0x10f   : > { %v6428_v22 = vpop.permute.xlu1 %803  ;;  %v6430_v23 = vpop.permute.xlu0 %801 }
 0x111   : > { %983 = vrot.lane.b32.xlu1 %v5930_v28, %s5693_s13  ;;  %981 = vrot.lane.b32.xlu0 %v5933_v29, %s5693_s13 }
 0x113   : > { %v6436_v24 = vpop.permute.xlu1 %807  ;;  %v6438_v25 = vpop.permute.xlu0 %805 }
 0x115   : > { %987 = vrot.lane.b32.xlu1 %v5940_v30, %s5693_s13  ;;  %985 = vrot.lane.b32.xlu0 %v5943_v31, %s5693_s13 }
 0x117   : > { %v6450_v21 = vpop.permute.xlu1 %811  ;;  %v6452_v28 = vpop.permute.xlu0 %809 }
 0x119   : > { %991 = vrot.lane.b32.xlu1 %v6445_v26, %s5693_s13  ;;  %989 = vrot.lane.b32.xlu0 %v6448_v27, %s5693_s13 }
 0x11b   : > { %v6458_v29 = vpop.permute.xlu1 %815  ;;  %v6460_v30 = vpop.permute.xlu0 %813 }
 0x11d   : > { %1059 = vrot.lane.b32.xlu1 %v5954_v34, %s5694_s14  ;;  %1057 = vrot.lane.b32.xlu0 %v5957_v35, %s5694_s14 }
 0x11f   : > { %v6466_v31 = vpop.permute.xlu1 %819  ;;  %v6468_v20 = vpop.permute.xlu0 %817 }
 0x121   : > { %1063 = vrot.lane.b32.xlu1 %v5964_v36, %s5694_s14  ;;  %1061 = vrot.lane.b32.xlu0 %v5967_v37, %s5694_s14 }
 0x123   : > { %v6474_v19 = vpop.permute.xlu1 %823  ;;  %v6476_v18 = vpop.permute.xlu0 %821 }
 0x124   : > { %9261 = vst [vmem:[#allocation94_spill] sm:$0xff] %v6474_v19  ;;  %9262 = vst [vmem:[#allocation95_spill] sm:$0xff] %v6476_v18  ;;  %v5186_v19 = vld [vmem:[%s5793_s9 + $0x141] sm:$0xff] }
 0x125   : > { %1067 = vrot.lane.b32.xlu1 %v5974_v38, %s5694_s14  ;;  %1065 = vrot.lane.b32.xlu0 %v5977_v39, %s5694_s14 }
 0x127   : > { %v6482_v34 = vpop.permute.xlu1 %827  ;;  %v6484_v35 = vpop.permute.xlu0 %825 }
 0x128   : > { %9263 = vst [vmem:[#allocation96_spill] sm:$0xff] %v6482_v34  ;;  %9264 = vst [vmem:[#allocation97_spill] sm:$0xff] %v6484_v35  ;;  %v5182_v34 = vld [vmem:[%s5793_s9 + $0x111] sm:$0xff]  ;;  %v5184_v35 = vld [vmem:[%s5793_s9 + $0x129] sm:$0xff] }
 0x129   : > { %1071 = vrot.lane.b32.xlu1 %v5984_v40, %s5694_s14  ;;  %1069 = vrot.lane.b32.xlu0 %v5987_v41, %s5694_s14 }
 0x12b   : > { %v6490_v36 = vpop.permute.xlu1 %831  ;;  %v6492_v37 = vpop.permute.xlu0 %829 }
 0x12c   : > { %9265 = vst [vmem:[#allocation98_spill] sm:$0xff] %v6490_v36  ;;  %9266 = vst [vmem:[#allocation99_spill] sm:$0xff] %v6492_v37  ;;  %v5202_v37 = vld [vmem:[%s5793_s9 + $0x82] sm:$0xff] }
 0x12d   : > { %1075 = vrot.lane.b32.xlu1 %v5994_v42, %s5694_s14  ;;  %1073 = vrot.lane.b32.xlu0 %v5997_v43, %s5694_s14 }
 0x12f   : > { %v6498_v38 = vpop.permute.xlu1 %835  ;;  %v6500_v39 = vpop.permute.xlu0 %833 }
 0x130   : > { %9267 = vst [vmem:[#allocation100_spill] sm:$0xff] %v6498_v38  ;;  %9268 = vst [vmem:[#allocation101_spill] sm:$0xff] %v6500_v39  ;;  %v5168_v39 = vld [vmem:[%s5793_s9 + $0x69] sm:$0xff] }
 0x131   : > { %1079 = vrot.lane.b32.xlu1 %v6004_v44, %s5694_s14  ;;  %1077 = vrot.lane.b32.xlu0 %v6007_v45, %s5694_s14 }
 0x133   : > { %v6506_v40 = vpop.permute.xlu1 %839  ;;  %v6508_v41 = vpop.permute.xlu0 %837 }
 0x134   : > { %9269 = vst [vmem:[#allocation102_spill] sm:$0xff] %v6506_v40  ;;  %9270 = vst [vmem:[#allocation103_spill] sm:$0xff] %v6508_v41  ;;  %v9307_v40 = vld [vmem:[#allocation44_spill] sm:$0xff] }
 0x135   : > { %1083 = vrot.lane.b32.xlu1 %v6014_v46, %s5694_s14  ;;  %1081 = vrot.lane.b32.xlu0 %v6017_v47, %s5694_s14  ;;  %v9311_v41 = vld [vmem:[#allocation48_spill] sm:$0xff] }
 0x137   : > { %v6514_v42 = vpop.permute.xlu1 %843  ;;  %v6516_v43 = vpop.permute.xlu0 %841 }
 0x138   : > { %9271 = vst [vmem:[#allocation104_spill] sm:$0xff] %v6514_v42  ;;  %9272 = vst [vmem:[#allocation105_spill] sm:$0xff] %v6516_v43  ;;  %v9299_v42 = vld [vmem:[#allocation36_spill] sm:$0xff] }
 0x139   : > { %1087 = vrot.lane.b32.xlu1 %v6024_v48, %s5694_s14  ;;  %1085 = vrot.lane.b32.xlu0 %v6027_v49, %s5694_s14  ;;  %v9303_v43 = vld [vmem:[#allocation40_spill] sm:$0xff] }
 0x13b   : > { %v6522_v44 = vpop.permute.xlu1 %847  ;;  %v6524_v45 = vpop.permute.xlu0 %845 }
 0x13c   : > { %9273 = vst [vmem:[#allocation106_spill] sm:$0xff] %v6522_v44  ;;  %9274 = vst [vmem:[#allocation107_spill] sm:$0xff] %v6524_v45  ;;  %v9295_v45 = vld [vmem:[#allocation32_spill] sm:$0xff] }
 0x13d   : > { %1091 = vrot.lane.b32.xlu1 %v6034_v50, %s5694_s14  ;;  %1089 = vrot.lane.b32.xlu0 %v6037_v51, %s5694_s14 }
 0x13f   : > { %v6530_v46 = vpop.permute.xlu1 %851  ;;  %v6532_v47 = vpop.permute.xlu0 %849 }
 0x140   : > { %9275 = vst [vmem:[#allocation108_spill] sm:$0xff] %v6530_v46  ;;  %9276 = vst [vmem:[#allocation109_spill] sm:$0xff] %v6532_v47 }
 0x141   : > { %1095 = vrot.lane.b32.xlu1 %v6044_v52, %s5694_s14  ;;  %1093 = vrot.lane.b32.xlu0 %v6047_v53, %s5694_s14 }
 0x143   : > { %v6538_v48 = vpop.permute.xlu1 %855  ;;  %v6540_v49 = vpop.permute.xlu0 %853 }
 0x144   : > { %9277 = vst [vmem:[#allocation110_spill] sm:$0xff] %v6538_v48  ;;  %9278 = vst [vmem:[#allocation111_spill] sm:$0xff] %v6540_v49  ;;  %v9285_v49 = vld [vmem:[#allocation10_spill] sm:$0xff]  ;;  %v6582_v48 = vld [vmem:[%s5793_s9 + $0x182] sm:$0xff] }
 0x145   : > { %1099 = vrot.lane.b32.xlu1 %v6054_v54, %s5694_s14  ;;  %1097 = vrot.lane.b32.xlu0 %v6057_v55, %s5694_s14  ;;  %v9283_v54 = vld [vmem:[#allocation6_spill] sm:$0xff]  ;;  %v9284_v55 = vld [vmem:[#allocation7_spill] sm:$0xff] }
 0x147   : > { %v6546_v50 = vpop.permute.xlu1 %859  ;;  %v6548_v51 = vpop.permute.xlu0 %857 }
 0x148   : > { %9279 = vst [vmem:[#allocation112_spill] sm:$0xff] %v6546_v50  ;;  %9280 = vst [vmem:[#allocation113_spill] sm:$0xff] %v6548_v51 }
 0x149   : > { %1103 = vrot.lane.b32.xlu1 %v6064_v56, %s5694_s14  ;;  %1101 = vrot.lane.b32.xlu0 %v6067_v57, %s5694_s14  ;;  %v9286_v56 = vld [vmem:[#allocation11_spill] sm:$0xff] }
 0x14b   : > { %v6554_v52 = vpop.permute.xlu1 %863  ;;  %v6556_v53 = vpop.permute.xlu0 %861 }
 0x14c   : > { %9281 = vst [vmem:[#allocation114_spill] sm:$0xff] %v6554_v52  ;;  %9282 = vst [vmem:[#allocation115_spill] sm:$0xff] %v6556_v53  ;;  %v9287_v53 = vld [vmem:[#allocation14_spill] sm:$0xff] }
 0x14d   : > { %1107 = vrot.lane.b32.xlu1 %v9283_v54, %s5694_s14  ;;  %1105 = vrot.lane.b32.xlu0 %v9284_v55, %s5694_s14  ;;  %v9288_v54 = vld [vmem:[#allocation15_spill] sm:$0xff]  ;;  %v6579_v55 = vld [vmem:[%s5793_s9 + $0x18a] sm:$0xff] }
 0x14f   : > { %v6562_v50 = vpop.permute.xlu1 %931  ;;  %v6564_v51 = vpop.permute.xlu0 %929 }
 0x151   : > { %1111 = vrot.lane.b32.xlu1 %v9285_v49, %s5694_s14  ;;  %1109 = vrot.lane.b32.xlu0 %v9286_v56, %s5694_s14 }
 0x153   : > { %v6570_v57 = vpop.permute.xlu1 %935  ;;  %v6572_v52 = vpop.permute.xlu0 %933 }
 0x155   : > { %1115 = vrot.lane.b32.xlu1 %v9287_v53, %s5694_s14  ;;  %1113 = vrot.lane.b32.xlu0 %v9288_v54, %s5694_s14  ;;  %v9289_v54 = vld [vmem:[#allocation24_spill] sm:$0xff] }
 0x157   : > { %v6584_v17 = vpop.permute.xlu1 %939  ;;  %v6586_v49 = vpop.permute.xlu0 %937 }
 0x159   : > { %1119 = vrot.lane.b32.xlu1 %v6579_v55, %s5694_s14  ;;  %1117 = vrot.lane.b32.xlu0 %v6582_v48, %s5694_s14 }
 0x15b   : > { %v6592_v56 = vpop.permute.xlu1 %943  ;;  %v6594_v53 = vpop.permute.xlu0 %941 }
 0x15d   : > { %1187 = vrot.lane.b32.xlu1 %v9289_v54, %s5695_s15  ;;  %1185 = vrot.lane.b32.xlu0 %v9290_v16, %s5695_s15  ;;  %v9296_v54 = vld [vmem:[#allocation33_spill] sm:$0xff] }
 0x15f   : > { %v6600_v47 = vpop.permute.xlu1 %947  ;;  %v6602_v46 = vpop.permute.xlu0 %945 }
 0x161   : > { %1191 = vrot.lane.b32.xlu1 %v9291_v15, %s5695_s15  ;;  %1189 = vrot.lane.b32.xlu0 %v9292_v14, %s5695_s15  ;;  %v9300_v15 = vld [vmem:[#allocation37_spill] sm:$0xff] }
 0x163   : > { %v6608_v44 = vpop.permute.xlu1 %951  ;;  %v6610_v12 = vpop.permute.xlu0 %949 }
 0x164   : > { %9293 = vst [vmem:[#allocation6_spill] sm:$0xff] %v6608_v44  ;;  %9294 = vst [vmem:[#allocation7_spill] sm:$0xff] %v6610_v12  ;;  %v5222_v12 = vld [vmem:[%s5793_s9 + $0x172] sm:$0xff] }
 0x165   : > { %1195 = vrot.lane.b32.xlu1 %v9295_v45, %s5695_s15  ;;  %1193 = vrot.lane.b32.xlu0 %v9296_v54, %s5695_s15  ;;  %v9304_v45 = vld [vmem:[#allocation41_spill] sm:$0xff] }
 0x167   : > { %v6616_v16 = vpop.permute.xlu1 %955  ;;  %v6618_v13 = vpop.permute.xlu0 %953 }
 0x168   : > { %9297 = vst [vmem:[#allocation10_spill] sm:$0xff] %v6616_v16  ;;  %9298 = vst [vmem:[#allocation11_spill] sm:$0xff] %v6618_v13 }
 0x169   : > { %1199 = vrot.lane.b32.xlu1 %v9299_v42, %s5695_s15  ;;  %1197 = vrot.lane.b32.xlu0 %v9300_v15, %s5695_s15  ;;  %v9308_v42 = vld [vmem:[#allocation45_spill] sm:$0xff] }
 0x16b   : > { %v6624_v14 = vpop.permute.xlu1 %959  ;;  %v6626_v10 = vpop.permute.xlu0 %957 }
 0x16c   : > { %9301 = vst [vmem:[#allocation14_spill] sm:$0xff] %v6624_v14  ;;  %9302 = vst [vmem:[#allocation15_spill] sm:$0xff] %v6626_v10  ;;  %v5200_v14 = vld [vmem:[%s5793_s9 + $0x6a] sm:$0xff] }
 0x16d   : > { %1203 = vrot.lane.b32.xlu1 %v9303_v43, %s5695_s15  ;;  %1201 = vrot.lane.b32.xlu0 %v9304_v45, %s5695_s15  ;;  %v9312_v43 = vld [vmem:[#allocation49_spill] sm:$0xff] }
 0x16f   : > { %v6632_v54 = vpop.permute.xlu1 %963  ;;  %v6634_v11 = vpop.permute.xlu0 %961 }
 0x170   : > { %9305 = vst [vmem:[#allocation24_spill] sm:$0xff] %v6632_v54  ;;  %9306 = vst [vmem:[#allocation25_spill] sm:$0xff] %v6634_v11  ;;  %v9315_v54 = vld [vmem:[#allocation52_spill] sm:$0xff] }
 0x171   : > { %1207 = vrot.lane.b32.xlu1 %v9307_v40, %s5695_s15  ;;  %1205 = vrot.lane.b32.xlu0 %v9308_v42, %s5695_s15  ;;  %v9316_v40 = vld [vmem:[#allocation53_spill] sm:$0xff] }
 0x173   : > { %v6640_v15 = vpop.permute.xlu1 %967  ;;  %v6642_v8 = vpop.permute.xlu0 %965 }
 0x174   : > { %9309 = vst [vmem:[#allocation28_spill] sm:$0xff] %v6640_v15  ;;  %9310 = vst [vmem:[#allocation29_spill] sm:$0xff] %v6642_v8  ;;  %v9323_v8 = vld [vmem:[#allocation60_spill] sm:$0xff] }
 0x175   : > { %1211 = vrot.lane.b32.xlu1 %v9311_v41, %s5695_s15  ;;  %1209 = vrot.lane.b32.xlu0 %v9312_v43, %s5695_s15  ;;  %v1801_v41 = vld [vmem:[%s9127_s1] sm:$0xff] }
 0x176   : > { %v9319_v43 = vld [vmem:[#allocation56_spill] sm:$0xff] }
 0x177   : > { %v6648_v45 = vpop.permute.xlu1 %971  ;;  %v6650_v9 = vpop.permute.xlu0 %969 }
 0x178   : > { %9313 = vst [vmem:[#allocation32_spill] sm:$0xff] %v6648_v45  ;;  %9314 = vst [vmem:[#allocation33_spill] sm:$0xff] %v6650_v9  ;;  %v9320_v45 = vld [vmem:[#allocation57_spill] sm:$0xff] }
 0x179   : > { %1215 = vrot.lane.b32.xlu1 %v9315_v54, %s5695_s15  ;;  %1213 = vrot.lane.b32.xlu0 %v9316_v40, %s5695_s15  ;;  %v1802_v54 = vld [vmem:[%s9127_s1 + $0x8] sm:$0xff] }
 0x17a   : > { %v5523_v9 = vpack.c.bf16 %v1802_v54, %v1801_v41 }
 0x17b   : > { %v6656_v42 = vpop.permute.xlu1 %975  ;;  %v6658_v15 = vpop.permute.xlu0 %973 }
 0x17c   : > { %9317 = vst [vmem:[#allocation36_spill] sm:$0xff] %v6656_v42  ;;  %9318 = vst [vmem:[#allocation37_spill] sm:$0xff] %v6658_v15  ;;  %5524 = vmatprep.subr.bf16.mxu0 %v5523_v9  ;;  %v1803_v15 = vld [vmem:[%s9127_s1 + $0x10] sm:$0xff] }
 0x17d   : > { %1219 = vrot.lane.b32.xlu1 %v9319_v43, %s5695_s15  ;;  %1217 = vrot.lane.b32.xlu0 %v9320_v45, %s5695_s15  ;;  %v9324_v43 = vld [vmem:[#allocation61_spill] sm:$0xff]  ;;  %v1804_v45 = vld [vmem:[%s9127_s1 + $0x18] sm:$0xff] }
 0x17e   : > { %5526 = vmatpush3.bf16.msra.mxu0 %v5523_v9  ;;  %v5527_v41 = vpack.c.bf16 %v1804_v45, %v1803_v15  ;;  %v9331_v45 = vld [vmem:[#allocation68_spill] sm:$0xff] }
 0x17f   : > { %v6670_v40 = vpop.permute.xlu1 %979  ;;  %v6672_v42 = vpop.permute.xlu0 %977 }
 0x180   : > { %9321 = vst [vmem:[#allocation40_spill] sm:$0xff] %v6670_v40  ;;  %9322 = vst [vmem:[#allocation41_spill] sm:$0xff] %v6672_v42  ;;  %5528 = vmatprep.subr.bf16.mxu0 %v5527_v41  ;;  %v9327_v40 = vld [vmem:[#allocation64_spill] sm:$0xff] }
 0x181   : > { %1223 = vrot.lane.b32.xlu1 %v9323_v8, %s5695_s15  ;;  %1221 = vrot.lane.b32.xlu0 %v9324_v43, %s5695_s15  ;;  %v9328_v8 = vld [vmem:[#allocation65_spill] sm:$0xff]  ;;  %v1805_v43 = vld [vmem:[%s9127_s1 + $0x20] sm:$0xf] }
 0x182   : > { %5530 = vmatpush3.bf16.msra.mxu0 %v5527_v41  ;;  %v5163_v41 = vld [vmem:[%s5793_s9 + $0x31] sm:$0xff] }
 0x183   : > { %v6684_v54 = vpop.permute.xlu1 %983  ;;  %v6686_v42 = vpop.permute.xlu0 %981  ;;  %5415 = vmatprep.subr.msk.mxu0 %vm1910_vm0, %v1805_v43 }
 0x184   : > { %9325 = vst [vmem:[#allocation44_spill] sm:$0xff] %v6684_v54  ;;  %9326 = vst [vmem:[#allocation45_spill] sm:$0xff] %v6686_v42  ;;  %v5166_v54 = vld [vmem:[%s5793_s9 + $0x51] sm:$0xff] }
 0x185   : > { %1227 = vrot.lane.b32.xlu1 %v9327_v40, %s5695_s15  ;;  %1225 = vrot.lane.b32.xlu0 %v9328_v8, %s5695_s15  ;;  %v9332_v40 = vld [vmem:[#allocation69_spill] sm:$0xff] }
 0x186   : > { %5416 = vmatpush3.msk.msra.mxu0 %vm1910_vm0, %v1805_v43  ;;  %v5165_v43 = vld [vmem:[%s5793_s9 + $0x49] sm:$0xff] }
 0x187   : > { %v6695_v9 = vpop.permute.xlu1 %987  ;;  %v6697_v15 = vpop.permute.xlu0 %985 }
 0x188   : > { %9329 = vst [vmem:[#allocation48_spill] sm:$0xff] %v6695_v9  ;;  %9330 = vst [vmem:[#allocation49_spill] sm:$0xff] %v6697_v15  ;;  %v5164_v15 = vld [vmem:[%s5793_s9 + $0x39] sm:$0xff] }
 0x189   : > { %1231 = vrot.lane.b32.xlu1 %v9331_v45, %s5695_s15  ;;  %1229 = vrot.lane.b32.xlu0 %v9332_v40, %s5695_s15  ;;  %v5195_v45 = vld [vmem:[%s5793_s9 + $0x32] sm:$0xff] }
 0x18b   : > { %v6706_v8 = vpop.permute.xlu1 %991  ;;  %v6708_v42 = vpop.permute.xlu0 %989 }
 0x18c   : > { %9333 = vst [vmem:[#allocation52_spill] sm:$0xff] %v6706_v8  ;;  %9334 = vst [vmem:[#allocation53_spill] sm:$0xff] %v6708_v42  ;;  %v5196_v42 = vld [vmem:[%s5793_s9 + $0x3a] sm:$0xff] }
 0x18d   : > { %1313 = vrot.lane.b32.xlu1 %v5163_v41, %s5696_s17  ;;  %1233 = vrot.lane.b32.xlu0 %v6303_v62, %s5695_s15  ;;  %v5197_v62 = vld [vmem:[%s5793_s9 + $0x4a] sm:$0xff] }
 0x18f   : > { %v6715_v9 = vpop.permute.xlu1 %1059  ;;  %v6717_v40 = vpop.permute.xlu0 %1057 }
 0x191   : > { %1441 = vrot.lane.b32.xlu1 %v5195_v45, %s5697_s23  ;;  %1315 = vrot.lane.b32.xlu0 %v5164_v15, %s5696_s17  ;;  %v5167_v15 = vld [vmem:[%s5793_s9 + $0x61] sm:$0xff] }
 0x193   : > { %v6723_v41 = vpop.permute.xlu1 %1063  ;;  %v6725_v8 = vpop.permute.xlu0 %1061 }
 0x195   : > { %1317 = vrot.lane.b32.xlu1 %v5165_v43, %s5696_s17  ;;  %1443 = vrot.lane.b32.xlu0 %v5196_v42, %s5697_s23  ;;  %v5199_v42 = vld [vmem:[%s5793_s9 + $0x62] sm:$0xff] }
 0x197   : > { %v6731_v38 = vpop.permute.xlu1 %1067  ;;  %v6733_v45 = vpop.permute.xlu0 %1065 }
 0x199   : > { %1445 = vrot.lane.b32.xlu1 %v5197_v62, %s5697_s23  ;;  %1319 = vrot.lane.b32.xlu0 %v5166_v54, %s5696_s17  ;;  %v5169_v54 = vld [vmem:[%s5793_s9 + $0x79] sm:$0xff] }
 0x19b   : > { %v6739_v11 = vpop.permute.xlu1 %1071  ;;  %v6741_v43 = vpop.permute.xlu0 %1069 }
 0x19d   : > { %1321 = vrot.lane.b32.xlu1 %v5167_v15, %s5696_s17  ;;  %1447 = vrot.lane.b32.xlu0 %v5198_v6, %s5697_s23  ;;  %v5201_v6 = vld [vmem:[%s5793_s9 + $0x7a] sm:$0xff] }
 0x19f   : > { %v6747_v7 = vpop.permute.xlu1 %1075  ;;  %v6749_v62 = vpop.permute.xlu0 %1073 }
 0x1a1   : > { %1449 = vrot.lane.b32.xlu1 %v5199_v42, %s5697_s23  ;;  %1323 = vrot.lane.b32.xlu0 %v5168_v39, %s5696_s17  ;;  %v5171_v39 = vld [vmem:[%s5793_s9 + $0x91] sm:$0xff] }
 0x1a3   : > { %v6755_v36 = vpop.permute.xlu1 %1079  ;;  %v6757_v15 = vpop.permute.xlu0 %1077 }
 0x1a4   : > { %9335 = vst [vmem:[#allocation56_spill] sm:$0xff] %v6755_v36  ;;  %9336 = vst [vmem:[#allocation57_spill] sm:$0xff] %v6757_v15  ;;  %v5216_v36 = vld [vmem:[%s5793_s9 + $0x12a] sm:$0xff] }
 0x1a5   : > { %1325 = vrot.lane.b32.xlu1 %v5169_v54, %s5696_s17  ;;  %1451 = vrot.lane.b32.xlu0 %v5200_v14, %s5697_s23  ;;  %v5203_v14 = vld [vmem:[%s5793_s9 + $0x92] sm:$0xff] }
 0x1a7   : > { %v6763_v10 = vpop.permute.xlu1 %1083  ;;  %v6765_v42 = vpop.permute.xlu0 %1081 }
 0x1a8   : > { %9337 = vst [vmem:[#allocation60_spill] sm:$0xff] %v6763_v10  ;;  %9338 = vst [vmem:[#allocation61_spill] sm:$0xff] %v6765_v42  ;;  %v5172_v10 = vld [vmem:[%s5793_s9 + $0x99] sm:$0xff] }
 0x1a9   : > { %1453 = vrot.lane.b32.xlu1 %v5201_v6, %s5697_s23  ;;  %1327 = vrot.lane.b32.xlu0 %v5170_v4, %s5696_s17  ;;  %v5173_v4 = vld [vmem:[%s5793_s9 + $0xa9] sm:$0xff]  ;;  %v5214_v42 = vld [vmem:[%s5793_s9 + $0x112] sm:$0xff] }
 0x1ab   : > { %v6771_v5 = vpop.permute.xlu1 %1087  ;;  %v6773_v54 = vpop.permute.xlu0 %1085 }
 0x1ac   : > { %9339 = vst [vmem:[#allocation64_spill] sm:$0xff] %v6771_v5  ;;  %9340 = vst [vmem:[#allocation65_spill] sm:$0xff] %v6773_v54  ;;  %v5204_v5 = vld [vmem:[%s5793_s9 + $0x9a] sm:$0xff] }
 0x1ad   : > { %1329 = vrot.lane.b32.xlu1 %v5171_v39, %s5696_s17  ;;  %1455 = vrot.lane.b32.xlu0 %v5202_v37, %s5697_s23  ;;  %v5205_v37 = vld [vmem:[%s5793_s9 + $0xaa] sm:$0xff] }
 0x1af   : > { %v6779_v16 = vpop.permute.xlu1 %1091  ;;  %v6781_v6 = vpop.permute.xlu0 %1089 }
 0x1b0   : > { %9341 = vst [vmem:[#allocation68_spill] sm:$0xff] %v6779_v16  ;;  %9342 = vst [vmem:[#allocation69_spill] sm:$0xff] %v6781_v6  ;;  %v5174_v16 = vld [vmem:[%s5793_s9 + $0xb1] sm:$0xff] }
 0x1b1   : > { %1457 = vrot.lane.b32.xlu1 %v5203_v14, %s5697_s23  ;;  %1331 = vrot.lane.b32.xlu0 %v5172_v10, %s5696_s17  ;;  %v5175_v10 = vld [vmem:[%s5793_s9 + $0xc1] sm:$0xff] }
 0x1b3   : > { %v6787_v54 = vpop.permute.xlu1 %1095  ;;  %v6789_v39 = vpop.permute.xlu0 %1093 }
 0x1b4   : > { %9343 = vst [vmem:[#allocation116_spill] sm:$0xff] %v6787_v54  ;;  %9344 = vst [vmem:[#allocation117_spill] sm:$0xff] %v6789_v39  ;;  %v5206_v54 = vld [vmem:[%s5793_s9 + $0xb2] sm:$0xff] }
 0x1b5   : > { %1333 = vrot.lane.b32.xlu1 %v5173_v4, %s5696_s17  ;;  %1459 = vrot.lane.b32.xlu0 %v5204_v5, %s5697_s23  ;;  %v5207_v5 = vld [vmem:[%s5793_s9 + $0xc2] sm:$0xff] }
 0x1b7   : > { %v6795_v6 = vpop.permute.xlu1 %1099  ;;  %v6797_v14 = vpop.permute.xlu0 %1097 }
 0x1b8   : > { %9345 = vst [vmem:[#allocation118_spill] sm:$0xff] %v6795_v6  ;;  %9346 = vst [vmem:[#allocation119_spill] sm:$0xff] %v6797_v14  ;;  %v5176_v6 = vld [vmem:[%s5793_s9 + $0xc9] sm:$0xff] }
 0x1b9   : > { %1461 = vrot.lane.b32.xlu1 %v5205_v37, %s5697_s23  ;;  %1335 = vrot.lane.b32.xlu0 %v5174_v16, %s5696_s17  ;;  %v5177_v16 = vld [vmem:[%s5793_s9 + $0xd9] sm:$0xff] }
 0x1bb   : > { %v6803_v39 = vpop.permute.xlu1 %1103  ;;  %v6805_v4 = vpop.permute.xlu0 %1101 }
 0x1bc   : > { %9347 = vst [vmem:[#allocation120_spill] sm:$0xff] %v6803_v39  ;;  %9348 = vst [vmem:[#allocation121_spill] sm:$0xff] %v6805_v4  ;;  %v5208_v39 = vld [vmem:[%s5793_s9 + $0xca] sm:$0xff] }
 0x1bd   : > { %1337 = vrot.lane.b32.xlu1 %v5175_v10, %s5696_s17  ;;  %1463 = vrot.lane.b32.xlu0 %v5206_v54, %s5697_s23  ;;  %v5209_v54 = vld [vmem:[%s5793_s9 + $0xda] sm:$0xff] }
 0x1bf   : > { %v6811_v14 = vpop.permute.xlu1 %1107  ;;  %v6813_v37 = vpop.permute.xlu0 %1105 }
 0x1c0   : > { %9349 = vst [vmem:[#allocation122_spill] sm:$0xff] %v6811_v14  ;;  %9350 = vst [vmem:[#allocation123_spill] sm:$0xff] %v6813_v37  ;;  %v5178_v14 = vld [vmem:[%s5793_s9 + $0xe1] sm:$0xff] }
 0x1c1   : > { %1465 = vrot.lane.b32.xlu1 %v5207_v5, %s5697_s23  ;;  %1339 = vrot.lane.b32.xlu0 %v5176_v6, %s5696_s17  ;;  %v5179_v6 = vld [vmem:[%s5793_s9 + $0xf1] sm:$0xff] }
 0x1c3   : > { %v6819_v4 = vpop.permute.xlu1 %1111  ;;  %v6821_v10 = vpop.permute.xlu0 %1109 }
 0x1c4   : > { %9351 = vst [vmem:[#allocation124_spill] sm:$0xff] %v6819_v4  ;;  %9352 = vst [vmem:[#allocation125_spill] sm:$0xff] %v6821_v10  ;;  %v5210_v4 = vld [vmem:[%s5793_s9 + $0xe2] sm:$0xff] }
 0x1c5   : > { %1341 = vrot.lane.b32.xlu1 %v5177_v16, %s5696_s17  ;;  %1467 = vrot.lane.b32.xlu0 %v5208_v39, %s5697_s23  ;;  %v5211_v39 = vld [vmem:[%s5793_s9 + $0xf2] sm:$0xff] }
 0x1c7   : > { %v6827_v37 = vpop.permute.xlu1 %1115  ;;  %v6829_v5 = vpop.permute.xlu0 %1113 }
 0x1c8   : > { %9353 = vst [vmem:[#allocation126_spill] sm:$0xff] %v6827_v37  ;;  %9354 = vst [vmem:[#allocation127_spill] sm:$0xff] %v6829_v5  ;;  %v5180_v37 = vld [vmem:[%s5793_s9 + $0xf9] sm:$0xff] }
 0x1c9   : > { %1469 = vrot.lane.b32.xlu1 %v5209_v54, %s5697_s23  ;;  %1343 = vrot.lane.b32.xlu0 %v5178_v14, %s5696_s17  ;;  %v5181_v14 = vld [vmem:[%s5793_s9 + $0x109] sm:$0xff] }
 0x1cb   : > { %v6835_v10 = vpop.permute.xlu1 %1119  ;;  %v6837_v16 = vpop.permute.xlu0 %1117 }
 0x1cc   : > { %9355 = vst [vmem:[#allocation128_spill] sm:$0xff] %v6835_v10  ;;  %9356 = vst [vmem:[#allocation129_spill] sm:$0xff] %v6837_v16  ;;  %v5212_v10 = vld [vmem:[%s5793_s9 + $0xfa] sm:$0xff] }
 0x1cd   : > { %1345 = vrot.lane.b32.xlu1 %v5179_v6, %s5696_s17  ;;  %1471 = vrot.lane.b32.xlu0 %v5210_v4, %s5697_s23  ;;  %v5213_v4 = vld [vmem:[%s5793_s9 + $0x10a] sm:$0xff] }
 0x1cf   : > { %v6843_v5 = vpop.permute.xlu1 %1187  ;;  %v6845_v54 = vpop.permute.xlu0 %1185 }
 0x1d1   : > { %1473 = vrot.lane.b32.xlu1 %v5211_v39, %s5697_s23  ;;  %1347 = vrot.lane.b32.xlu0 %v5180_v37, %s5696_s17  ;;  %v5183_v37 = vld [vmem:[%s5793_s9 + $0x121] sm:$0xff] }
 0x1d3   : > { %v6851_v16 = vpop.permute.xlu1 %1191  ;;  %v6853_v6 = vpop.permute.xlu0 %1189 }
 0x1d5   : > { %1349 = vrot.lane.b32.xlu1 %v5181_v14, %s5696_s17  ;;  %1475 = vrot.lane.b32.xlu0 %v5212_v10, %s5697_s23  ;;  %v5215_v10 = vld [vmem:[%s5793_s9 + $0x122] sm:$0xff] }
 0x1d7   : > { %v6859_v0 = vpop.permute.xlu1 %1195  ;;  %v6861_v39 = vpop.permute.xlu0 %1193 }
 0x1d9   : > { %1477 = vrot.lane.b32.xlu1 %v5213_v4, %s5697_s23  ;;  %1351 = vrot.lane.b32.xlu0 %v5182_v34, %s5696_s17  ;;  %v5185_v34 = vld [vmem:[%s5793_s9 + $0x139] sm:$0xff] }
 0x1db   : > { %v6867_v13 = vpop.permute.xlu1 %1199  ;;  %v6869_v14 = vpop.permute.xlu0 %1197 }
 0x1dd   : > { %1353 = vrot.lane.b32.xlu1 %v5183_v37, %s5696_s17  ;;  %1479 = vrot.lane.b32.xlu0 %v5214_v42, %s5697_s23  ;;  %v5217_v42 = vld [vmem:[%s5793_s9 + $0x13a] sm:$0xff] }
 0x1df   : > { %v6875_v2 = vpop.permute.xlu1 %1203  ;;  %v6877_v4 = vpop.permute.xlu0 %1201 }
 0x1e1   : > { %1481 = vrot.lane.b32.xlu1 %v5215_v10, %s5697_s23  ;;  %1355 = vrot.lane.b32.xlu0 %v5184_v35, %s5696_s17  ;;  %v5156_v35 = vld [vmem:[%s5793_s9 + $0x158] sm:$0xff] }
 0x1e3   : > { %v6883_v44 = vpop.permute.xlu1 %1207  ;;  %v6885_v37 = vpop.permute.xlu0 %1205 }
 0x1e4   : > { %9357 = vst [vmem:[#allocation130_spill] sm:$0xff] %v6883_v44  ;;  %9358 = vst [vmem:[#allocation131_spill] sm:$0xff] %v6885_v37  ;;  %v5218_v44 = vld [vmem:[%s5793_s9 + $0x142] sm:$0xff] }
 0x1e5   : > { %1357 = vrot.lane.b32.xlu1 %v5185_v34, %s5696_s17  ;;  %1483 = vrot.lane.b32.xlu0 %v5216_v36, %s5697_s23  ;;  %v5188_v36 = vld [vmem:[%s5793_s9 + $0x159] sm:$0xff] }
 0x1e7   : > { %v6891_v60 = vpop.permute.xlu1 %1211  ;;  %v6893_v10 = vpop.permute.xlu0 %1209 }
 0x1e8   : > { %9359 = vst [vmem:[#allocation132_spill] sm:$0xff] %v6891_v60  ;;  %9360 = vst [vmem:[#allocation133_spill] sm:$0xff] %v6893_v10  ;;  %v5187_v60 = vld [vmem:[%s5793_s9 + $0x151] sm:$0xff] }
 0x1e9   : > { %1485 = vrot.lane.b32.xlu1 %v5217_v42, %s5697_s23  ;;  %1359 = vrot.lane.b32.xlu0 %v5186_v19, %s5696_s17  ;;  %v5220_v19 = vld [vmem:[%s5793_s9 + $0x15a] sm:$0xff]  ;;  %v5219_v42 = vld [vmem:[%s5793_s9 + $0x152] sm:$0xff] }
 0x1eb   : > { %v6899_v37 = vpop.permute.xlu1 %1215  ;;  %v6901_v34 = vpop.permute.xlu0 %1213 }
 0x1ec   : > { %9361 = vst [vmem:[#allocation134_spill] sm:$0xff] %v6899_v37  ;;  %9362 = vst [vmem:[#allocation135_spill] sm:$0xff] %v6901_v34 }
 0x1ed   : > { %1235 = vrot.lane.b32.xlu1 %v5156_v35, %s5695_s15  ;;  %1487 = vrot.lane.b32.xlu0 %v5218_v44, %s5697_s23  ;;  %v5158_v44 = vld [vmem:[%s5793_s9 + $0x170] sm:$0xff] }
 0x1ef   : > { %v6907_v10 = vpop.permute.xlu1 %1219  ;;  %v6909_v15 = vpop.permute.xlu0 %1217 }
 0x1f0   : > { %9363 = vst [vmem:[#allocation136_spill] sm:$0xff] %v6907_v10  ;;  %9364 = vst [vmem:[#allocation137_spill] sm:$0xff] %v6909_v15  ;;  %v5157_v10 = vld [vmem:[%s5793_s9 + $0x168] sm:$0xff] }
 0x1f1   : > { %1363 = vrot.lane.b32.xlu1 %v5188_v36, %s5696_s17  ;;  %1361 = vrot.lane.b32.xlu0 %v5187_v60, %s5696_s17  ;;  %v223_v60 = vld [vmem:[%s5793_s9] sm:$0xff] }
 0x1f3   : > { %v6915_v37 = vpop.permute.xlu1 %1223  ;;  %v6917_v35 = vpop.permute.xlu0 %1221 }
 0x1f4   : > { %9365 = vst [vmem:[#allocation138_spill] sm:$0xff] %v6915_v37  ;;  %9366 = vst [vmem:[#allocation139_spill] sm:$0xff] %v6917_v35  ;;  %v5190_v37 = vld [vmem:[%s5793_s9 + $0x171] sm:$0xff]  ;;  %v5189_v35 = vld [vmem:[%s5793_s9 + $0x169] sm:$0xff] }
 0x1f5   : > { %1491 = vrot.lane.b32.xlu1 %v5220_v19, %s5697_s23  ;;  %1489 = vrot.lane.b32.xlu0 %v5219_v42, %s5697_s23 }
 0x1f7   : > { %v6923_v15 = vpop.permute.xlu1 %1227  ;;  %v6925_v36 = vpop.permute.xlu0 %1225 }
 0x1f8   : > { %9367 = vst [vmem:[#allocation140_spill] sm:$0xff] %v6923_v15  ;;  %9368 = vst [vmem:[#allocation141_spill] sm:$0xff] %v6925_v36  ;;  %v9371_v15 = vld [vmem:[#allocation9_spill] sm:$0xff] }
 0x1f9   : > { %1239 = vrot.lane.b32.xlu1 %v5158_v44, %s5695_s15  ;;  %1237 = vrot.lane.b32.xlu0 %v5157_v10, %s5695_s15  ;;  %v1538_v34 = vsel %vm1537_vm1, %v223_v60, %v9371_v15  ;;  %v224_v10 = vld [vmem:[%s5793_s9 + $0x8] sm:$0xff]  ;;  %v9372_v44 = vld [vmem:[#allocation71_spill] sm:$0xff] }
 0x1fa   : > { %v1571_v36 = vsel %vm1570_vm2, %v1538_v34, %v9372_v44 }
 0x1fb   : > { %v6932_v19 = vpop.permute.xlu1 %1231  ;;  %v6934_v42 = vpop.permute.xlu0 %1229 }
 0x1fc   : > { %9369 = vst [vmem:[#allocation142_spill] sm:$0xff] %v6932_v19  ;;  %9370 = vst [vmem:[#allocation143_spill] sm:$0xff] %v6934_v42  ;;  %v5221_v19 = vld [vmem:[%s5793_s9 + $0x16a] sm:$0xff]  ;;  %v1604_v42 = vsel %vm1603_vm3, %v1571_v36, %v6430_v23 }
 0x1fd   : > { %1367 = vrot.lane.b32.xlu1 %v5190_v37, %s5696_s17  ;;  %1365 = vrot.lane.b32.xlu0 %v5189_v35, %s5696_s17  ;;  %v1637_v37 = vsel %vm1636_vm4, %v1604_v42, %v6564_v51  ;;  %v9374_v35 = vld [vmem:[#allocation13_spill] sm:$0xff]  ;;  %v9375_v23 = vld [vmem:[#allocation70_spill] sm:$0xff]  ;;  %v5159_v51 = vld [vmem:[%s5793_s9 + $0x180] sm:$0xff] }
 0x1fe   : > { %v1539_v60 = vsel %vm1537_vm1, %v224_v10, %v9374_v35  ;;  %v1670_v34 = vsel %vm1669_vm5, %v1637_v37, %v6717_v40  ;;  %v9376_v37 = vld [vmem:[#allocation8_spill] sm:$0xff] }
 0x1ff   : > { %v1314_v18 = vpop.permute.xlu1 %1313  ;;  %v6947_v15 = vpop.permute.xlu0 %1233  ;;  %v1572_v36 = vsel %vm1570_vm2, %v1539_v60, %v9375_v23  ;;  %v1703_v44 = vsel %vm1702_vm6, %v1670_v34, %v6845_v54  ;;  %v9377_v60 = vld [vmem:[#allocation20_spill] sm:$0xff] }
 0x200   : > { %9373 = vst [vmem:[#allocation9_spill] sm:$0xff] %v6947_v15  ;;  %v5160_v15 = vld [vmem:[%s5793_s9 + $0x188] sm:$0xff]  ;;  %v1605_v42 = vsel %vm1603_vm3, %v1572_v36, %v6428_v22  ;;  %v1736_v10 = vsel %vm1735_vm7, %v1703_v44, %v1314_v18  ;;  %v1540_v23 = vsel %vm1537_vm1, %v9377_v60, %v9376_v37 }
 0x201   : > { %1495 = vrot.lane.b32.xlu1 %v5222_v12, %s5697_s23  ;;  %1493 = vrot.lane.b32.xlu0 %v5221_v19, %s5697_s23  ;;  %v1638_v12 = vsel %vm1636_vm4, %v1605_v42, %v6562_v50  ;;  %v1573_v18 = vsel %vm1570_vm2, %v1540_v23, %v6310_v32  ;;  %v9379_v32 = vld [vmem:[#allocation21_spill] sm:$0xff]  ;;  %v5162_v23 = vld [vmem:[%s5793_s9 + $0x1a0] sm:$0xff] }
 0x202   : > { %v1671_v54 = vsel %vm1669_vm5, %v1638_v12, %v6715_v9  ;;  %v1606_v50 = vsel %vm1603_vm3, %v1573_v18, %v6438_v25  ;;  %v9380_v25 = vld [vmem:[#allocation72_spill] sm:$0xff]  ;;  %v9381_v37 = vld [vmem:[#allocation17_spill] sm:$0xff] }
 0x203   : > { %v1442_v35 = vpop.permute.xlu1 %1441  ;;  %v1316_v40 = vpop.permute.xlu0 %1315  ;;  %v1704_v22 = vsel %vm1702_vm6, %v1671_v54, %v6843_v5  ;;  %v1639_v9 = vsel %vm1636_vm4, %v1606_v50, %v6572_v52  ;;  %v5161_v54 = vld [vmem:[%s5793_s9 + $0x198] sm:$0xff] }
 0x204   : > { %v1769_v19 = vsel %vm1768_vm8, %v1736_v10, %v1442_v35  ;;  %v1737_v34 = vsel %vm1735_vm7, %v1704_v22, %v1316_v40  ;;  %v1672_v5 = vsel %vm1669_vm5, %v1639_v9, %v6725_v8  ;;  %v5599_v50 = vld [vmem:[%s5793_s9 + $0x38] sm:$0xff] }
 0x205   : > { %1243 = vrot.lane.b32.xlu1 %v5160_v15, %s5695_s15  ;;  %1241 = vrot.lane.b32.xlu0 %v5159_v51, %s5695_s15  ;;  %v9378_v51 = vld [vmem:[#allocation12_spill] sm:$0xff]  ;;  %v1705_v52 = vsel %vm1702_vm6, %v1672_v5, %v6853_v6  ;;  %v5600_v5 = vld [vmem:[%s5793_s9 + $0x48] sm:$0xff] }
 0x206   : > { %5417 = vmatprep.mubr.msk.f32.mxu0 %vm1813_vm9, %v1769_v19  ;;  %v1541_v42 = vsel %vm1537_vm1, %v9379_v32, %v9378_v51  ;;  %v5598_v19 = vld [vmem:[%s5793_s9 + $0x30] sm:$0xff]  ;;  %v5193_v9 = vld [vmem:[%s5793_s9 + $0x199] sm:$0xff] }
 0x207   : > { %v1318_v36 = vpop.permute.xlu1 %1317  ;;  %v1444_v44 = vpop.permute.xlu0 %1443  ;;  %v1574_v10 = vsel %vm1570_vm2, %v1541_v42, %v9380_v25  ;;  %v1542_v6 = vsel %vm1537_vm1, %v5598_v19, %v9381_v37  ;;  %v9384_v19 = vld [vmem:[#allocation18_spill] sm:$0xff] }
 0x208   : > { %v1770_v15 = vsel %vm1768_vm8, %v1737_v34, %v1444_v44  ;;  %v1607_v35 = vsel %vm1603_vm3, %v1574_v10, %v6436_v24  ;;  %v1738_v8 = vsel %vm1735_vm7, %v1705_v52, %v1318_v36  ;;  %v1575_v24 = vsel %vm1570_vm2, %v1542_v6, %v6320_v58  ;;  %v5194_v44 = vld [vmem:[%s5793_s9 + $0x1a1] sm:$0xff] }
 0x209   : > { %1371 = vrot.lane.b32.xlu1 %v6445_v26, %s5696_s17  ;;  %1369 = vrot.lane.b32.xlu0 %v6448_v27, %s5696_s17  ;;  %v1640_v27 = vsel %vm1636_vm4, %v1607_v35, %v6570_v57  ;;  %v5226_v52 = vld [vmem:[%s5793_s9 + $0x1a2] sm:$0xff]  ;;  %v5225_v35 = vld [vmem:[%s5793_s9 + $0x19a] sm:$0xff] }
 0x20a   : > { %5418 = vmatmul.mubr.msk.f32.vlgmr.msra.gmra.mrb[0].mxu0 %vm1813_vm9, %v1770_v15  ;;  %v1673_v60 = vsel %vm1669_vm5, %v1640_v27, %v6723_v41  ;;  %v1608_v41 = vsel %vm1603_vm3, %v1575_v24, %v6452_v28 }
 0x20b   : > { %v1446_v40 = vpop.permute.xlu1 %1445  ;;  %v1320_v26 = vpop.permute.xlu0 %1319  ;;  %v1706_v57 = vsel %vm1702_vm6, %v1673_v60, %v6851_v16  ;;  %v9382_v16 = vld [vmem:[#allocation16_spill] sm:$0xff] }
 0x20c   : > { %v1771_v12 = vsel %vm1768_vm8, %v1738_v8, %v1446_v40  ;;  %v1543_v34 = vsel %vm1537_vm1, %v5599_v50, %v9382_v16  ;;  %v5603_v50 = vld [vmem:[%s5793_s9 + $0x68] sm:$0xff]  ;;  %v9386_v16 = vld [vmem:[#allocation22_spill] sm:$0xff] }
 0x20d   : > { %1499 = vrot.lane.b32.xlu1 %v6579_v55, %s5697_s23  ;;  %1497 = vrot.lane.b32.xlu0 %v6582_v48, %s5697_s23  ;;  %v1739_v55 = vsel %vm1735_vm7, %v1706_v57, %v1320_v26  ;;  %v1641_v48 = vsel %vm1636_vm4, %v1608_v41, %v6586_v49  ;;  %v1576_v28 = vsel %vm1570_vm2, %v1543_v34, %v6318_v61 }
 0x20e   : > { %5420 = vmatprep.mubr.msk.f32.mxu0 %vm1813_vm9, %v1771_v12  ;;  %v1674_v36 = vsel %vm1669_vm5, %v1641_v48, %v6733_v45  ;;  %v1609_v15 = vsel %vm1603_vm3, %v1576_v28, %v6450_v21  ;;  %v5601_v12 = vld [vmem:[%s5793_s9 + $0x50] sm:$0xff] }
 0x20f   : > { %v1322_v18 = vpop.permute.xlu1 %1321  ;;  %v1448_v22 = vpop.permute.xlu0 %1447  ;;  %v1707_v49 = vsel %vm1702_vm6, %v1674_v36, %v6861_v39  ;;  %v1642_v42 = vsel %vm1636_vm4, %v1609_v15, %v6584_v17  ;;  %v9383_v39 = vld [vmem:[#allocation19_spill] sm:$0xff] }
 0x210   : > { %v1772_v58 = vsel %vm1768_vm8, %v1739_v55, %v1448_v22  ;;  %v1740_v45 = vsel %vm1735_vm7, %v1707_v49, %v1322_v18  ;;  %v1544_v25 = vsel %vm1537_vm1, %v5600_v5, %v9383_v39  ;;  %v1675_v10 = vsel %vm1669_vm5, %v1642_v42, %v6731_v38  ;;  %v9387_v15 = vld [vmem:[#allocation27_spill] sm:$0xff] }
 0x211   : > { %1247 = vrot.lane.b32.xlu1 %v5162_v23, %s5695_s15  ;;  %1245 = vrot.lane.b32.xlu0 %v5161_v54, %s5695_s15  ;;  %v1577_v21 = vsel %vm1570_vm2, %v1544_v25, %v6326_v63  ;;  %v1708_v17 = vsel %vm1702_vm6, %v1675_v10, %v6859_v0  ;;  %v1545_v0 = vsel %vm1537_vm1, %v5601_v12, %v9384_v19  ;;  %v5602_v54 = vld [vmem:[%s5793_s9 + $0x60] sm:$0xff]  ;;  %v9389_v5 = vld [vmem:[#allocation7_spill] sm:$0xff]  ;;  %v9390_v10 = vld [vmem:[#allocation26_spill] sm:$0xff] }
 0x212   : > { %5421 = vmatmul.mubr.msk.f32.gmra.mrb[2].mxu0 %vm1813_vm9, %v1772_v58  ;;  %v1610_v8 = vsel %vm1603_vm3, %v1577_v21, %v6460_v30  ;;  %v1578_v30 = vsel %vm1570_vm2, %v1545_v0, %v6324_v1  ;;  %v9385_v1 = vld [vmem:[#allocation23_spill] sm:$0xff]  ;;  %v5605_v25 = vld [vmem:[%s5793_s9 + $0x80] sm:$0xff]  ;;  %v9391_v21 = vld [vmem:[#allocation57_spill] sm:$0xff] }
 0x213   : > { %v1450_v51 = vpop.permute.xlu1 %1449  ;;  %v1324_v32 = vpop.permute.xlu0 %1323  ;;  %v1643_v27 = vsel %vm1636_vm4, %v1610_v8, %v6594_v53  ;;  %v1611_v6 = vsel %vm1603_vm3, %v1578_v30, %v6458_v29  ;;  %v1546_v41 = vsel %vm1537_vm1, %v5602_v54, %v9385_v1  ;;  %v9395_v12 = vld [vmem:[#allocation6_spill] sm:$0xff]  ;;  %v9396_v30 = vld [vmem:[#allocation31_spill] sm:$0xff]  ;;  %v9400_v54 = vld [vmem:[#allocation97_spill] sm:$0xff] }
 0x214   : > { %v1773_v61 = vsel %vm1768_vm8, %v1740_v45, %v1450_v51  ;;  %v1741_v40 = vsel %vm1735_vm7, %v1708_v17, %v1324_v32  ;;  %v1676_v37 = vsel %vm1669_vm5, %v1643_v27, %v6741_v43  ;;  %v1644_v57 = vsel %vm1636_vm4, %v1611_v6, %v6592_v56  ;;  %v9388_v51 = vld [vmem:[#allocation95_spill] sm:$0xff]  ;;  %v9392_v17 = vld [vmem:[#allocation73_spill] sm:$0xff]  ;;  %v9397_v6 = vld [vmem:[#allocation56_spill] sm:$0xff] }
 0x215   : > { %1375 = vrot.lane.b32.xlu1 %v5194_v44, %s5696_s17  ;;  %1373 = vrot.lane.b32.xlu0 %v5193_v9, %s5696_s17  ;;  %v1709_v53 = vsel %vm1702_vm6, %v1676_v37, %v6869_v14  ;;  %v1677_v14 = vsel %vm1669_vm5, %v1644_v57, %v6739_v11  ;;  %v1579_v29 = vsel %vm1570_vm2, %v1546_v41, %v6334_v33  ;;  %v5604_v9 = vld [vmem:[%s5793_s9 + $0x78] sm:$0xff]  ;;  %v5606_v37 = vld [vmem:[%s5793_s9 + $0x90] sm:$0xff] }
 0x216   : > { %5423 = vmatprep.mubr.msk.f32.mxu0 %vm1813_vm9, %v1773_v61  ;;  %v1710_v55 = vsel %vm1702_vm6, %v1677_v14, %v6867_v13  ;;  %v1612_v56 = vsel %vm1603_vm3, %v1579_v29, %v6468_v20  ;;  %v1547_v33 = vsel %vm1537_vm1, %v5603_v50, %v9386_v16  ;;  %v9399_v57 = vld [vmem:[#allocation130_spill] sm:$0xff] }
 0x217   : > { %v1326_v38 = vpop.permute.xlu1 %1325  ;;  %v1452_v26 = vpop.permute.xlu0 %1451  ;;  %v1645_v58 = vsel %vm1636_vm4, %v1612_v56, %v6602_v46  ;;  %v1580_v20 = vsel %vm1570_vm2, %v1547_v33, %v6332_v59  ;;  %v1548_v59 = vsel %vm1537_vm1, %v5604_v9, %v9387_v15  ;;  %v9404_v16 = vld [vmem:[#allocation74_spill] sm:$0xff]  ;;  %v5608_v15 = vld [vmem:[%s5793_s9 + $0xa8] sm:$0xff] }
 0x218   : > { %v1774_v63 = vsel %vm1768_vm8, %v1741_v40, %v1452_v26  ;;  %v1742_v60 = vsel %vm1735_vm7, %v1709_v53, %v1326_v38  ;;  %v1678_v13 = vsel %vm1669_vm5, %v1645_v58, %v6749_v62  ;;  %v1613_v46 = vsel %vm1603_vm3, %v1580_v20, %v6466_v31  ;;  %v9394_v40 = vld [vmem:[#allocation94_spill] sm:$0xff] }
 0x219   : > { %1503 = vrot.lane.b32.xlu1 %v5226_v52, %s5697_s23  ;;  %1501 = vrot.lane.b32.xlu0 %v5225_v35, %s5697_s23  ;;  %v1711_v34 = vsel %vm1702_vm6, %v1678_v13, %v6877_v4  ;;  %v1646_v44 = vsel %vm1636_vm4, %v1613_v46, %v6600_v47  ;;  %v1581_v31 = vsel %vm1570_vm2, %v1548_v59, %v6342_v3  ;;  %v9393_v35 = vld [vmem:[#allocation131_spill] sm:$0xff]  ;;  %v9405_v13 = vld [vmem:[#allocation133_spill] sm:$0xff] }
 0x21a   : > { %5424 = vmatmul.mubr.msk.f32.gmra.mrb[4].mxu0 %vm1813_vm9, %v1774_v63  ;;  %v1679_v4 = vsel %vm1669_vm5, %v1646_v44, %v6747_v7  ;;  %v1614_v47 = vsel %vm1603_vm3, %v1581_v31, %v9388_v51  ;;  %v1549_v3 = vsel %vm1537_vm1, %v5605_v25, %v9390_v10  ;;  %v1550_v53 = vsel %vm1537_vm1, %v5606_v37, %v9396_v30  ;;  %v9407_v44 = vld [vmem:[#allocation10_spill] sm:$0xff]  ;;  %v9408_v59 = vld [vmem:[#allocation35_spill] sm:$0xff]  ;;  %v9409_v31 = vld [vmem:[#allocation60_spill] sm:$0xff] }
 0x21b   : > { %v1454_v24 = vpop.permute.xlu1 %1453  ;;  %v1328_v43 = vpop.permute.xlu0 %1327  ;;  %v1712_v45 = vsel %vm1702_vm6, %v1679_v4, %v6875_v2  ;;  %v1647_v39 = vsel %vm1636_vm4, %v1614_v47, %v9389_v5  ;;  %v1582_v52 = vsel %vm1570_vm2, %v1549_v3, %v9392_v17  ;;  %v1552_v4 = vsel %vm1537_vm1, %v5608_v15, %v9408_v59  ;;  %v9410_v51 = vld [vmem:[#allocation77_spill] sm:$0xff]  ;;  %v9413_v10 = vld [vmem:[#allocation15_spill] sm:$0xff]  ;;  %v9414_v17 = vld [vmem:[#allocation34_spill] sm:$0xff] }
 0x21c   : > { %v1775_v23 = vsel %vm1768_vm8, %v1742_v60, %v1454_v24  ;;  %v1743_v18 = vsel %vm1735_vm7, %v1710_v55, %v1328_v43  ;;  %v1680_v2 = vsel %vm1669_vm5, %v1647_v39, %v9391_v21  ;;  %v1615_v38 = vsel %vm1603_vm3, %v1582_v52, %v9394_v40  ;;  %v9398_v24 = vld [vmem:[#allocation75_spill] sm:$0xff]  ;;  %v9416_v40 = vld [vmem:[#allocation76_spill] sm:$0xff]  ;;  %v9419_v30 = vld [vmem:[#allocation14_spill] sm:$0xff] }
 0x21d   : > { %5426 = vmatprep.mubr.msk.f32.mxu0 %vm1813_vm9, %v1775_v23  ;;  %v1713_v8 = vsel %vm1702_vm6, %v1680_v2, %v9393_v35  ;;  %v1648_v19 = vsel %vm1636_vm4, %v1615_v38, %v9395_v12  ;;  %v1583_v43 = vsel %vm1570_vm2, %v1550_v53, %v9398_v24  ;;  %v9401_v55 = vld [vmem:[#allocation11_spill] sm:$0xff]  ;;  %v1585_v47 = vsel %vm1570_vm2, %v1552_v4, %v9410_v51  ;;  %v5609_v2 = vld [vmem:[%s5793_s9 + $0xb0] sm:$0xff]  ;;  %v9415_v35 = vld [vmem:[#allocation65_spill] sm:$0xff] }
 0x21e   : > { %v1681_v60 = vsel %vm1669_vm5, %v1648_v19, %v9397_v6  ;;  %v1616_v1 = vsel %vm1603_vm3, %v1583_v43, %v9400_v54  ;;  %v1553_v52 = vsel %vm1537_vm1, %v5609_v2, %v9414_v17  ;;  %v9420_v24 = vld [vmem:[#allocation39_spill] sm:$0xff]  ;;  %v9431_v59 = vld [vmem:[#allocation24_spill] sm:$0xff]  ;;  %v9437_v17 = vld [vmem:[#allocation29_spill] sm:$0xff] }
 0x21f   : > { %v1330_v22 = vpop.permute.xlu1 %1329  ;;  %v1456_v48 = vpop.permute.xlu0 %1455  ;;  %v1714_v23 = vsel %vm1702_vm6, %v1681_v60, %v9399_v57  ;;  %v1649_v56 = vsel %vm1636_vm4, %v1616_v1, %v9401_v55  ;;  %v1586_v38 = vsel %vm1570_vm2, %v1553_v52, %v9416_v40  ;;  %v5610_v60 = vld [vmem:[%s5793_s9 + $0xc0] sm:$0xff]  ;;  %v9422_v54 = vld [vmem:[#allocation79_spill] sm:$0xff]  ;;  %v9438_v40 = vld [vmem:[#allocation42_spill] sm:$0xff] }
 0x220   : > { %v1776_v11 = vsel %vm1768_vm8, %v1743_v18, %v1456_v48  ;;  %v1744_v36 = vsel %vm1735_vm7, %v1711_v34, %v1330_v22  ;;  %v5607_v22 = vld [vmem:[%s5793_s9 + $0x98] sm:$0xff]  ;;  %v9402_v48 = vld [vmem:[#allocation30_spill] sm:$0xff]  ;;  %v9406_v34 = vld [vmem:[#allocation96_spill] sm:$0xff]  ;;  %v1554_v43 = vsel %vm1537_vm1, %v5610_v60, %v9420_v24 }
 0x221   : > { %5427 = vmatmul.mubr.msk.f32.gmra.mrb[6].mxu0 %vm1813_vm9, %v1776_v11  ;;  %v1551_v58 = vsel %vm1537_vm1, %v5607_v22, %v9402_v48  ;;  %v9403_v11 = vld [vmem:[#allocation61_spill] sm:$0xff]  ;;  %v9421_v57 = vld [vmem:[#allocation64_spill] sm:$0xff]  ;;  %v1587_v1 = vsel %vm1570_vm2, %v1554_v43, %v9422_v54  ;;  %v9432_v51 = vld [vmem:[#allocation43_spill] sm:$0xff] }
 0x222   : > { %v1682_v50 = vsel %vm1669_vm5, %v1649_v56, %v9403_v11  ;;  %v1584_v33 = vsel %vm1570_vm2, %v1551_v58, %v9404_v16  ;;  %v9425_v48 = vld [vmem:[#allocation25_spill] sm:$0xff]  ;;  %v9426_v16 = vld [vmem:[#allocation38_spill] sm:$0xff]  ;;  %v9443_v24 = vld [vmem:[#allocation28_spill] sm:$0xff] }
 0x223   : > { %v1458_v28 = vpop.permute.xlu1 %1457  ;;  %v1332_v49 = vpop.permute.xlu0 %1331  ;;  %v1715_v20 = vsel %vm1702_vm6, %v1682_v50, %v9405_v13  ;;  %v1617_v46 = vsel %vm1603_vm3, %v1584_v33, %v9406_v34  ;;  %v5611_v50 = vld [vmem:[%s5793_s9 + $0xc8] sm:$0xff]  ;;  %v9428_v34 = vld [vmem:[#allocation78_spill] sm:$0xff]  ;;  %v9444_v54 = vld [vmem:[#allocation47_spill] sm:$0xff] }
 0x224   : > { %v1777_v62 = vsel %vm1768_vm8, %v1744_v36, %v1458_v28  ;;  %v1745_v32 = vsel %vm1735_vm7, %v1712_v45, %v1332_v49  ;;  %v1555_v33 = vsel %vm1537_vm1, %v5611_v50, %v9426_v16  ;;  %v9427_v13 = vld [vmem:[#allocation69_spill] sm:$0xff] }
 0x225   : > { %5429 = vmatprep.mubr.msk.f32.mxu0 %vm1813_vm9, %v1777_v62  ;;  %v1650_v62 = vsel %vm1636_vm4, %v1617_v46, %v9407_v44  ;;  %v1588_v46 = vsel %vm1570_vm2, %v1555_v33, %v9428_v34  ;;  %v9449_v16 = vld [vmem:[#allocation33_spill] sm:$0xff]  ;;  %v9450_v34 = vld [vmem:[#allocation46_spill] sm:$0xff] }
 0x226   : > { %v1683_v45 = vsel %vm1669_vm5, %v1650_v62, %v9409_v31 }
 0x227   : > { %v1334_v42 = vpop.permute.xlu1 %1333  ;;  %v1460_v61 = vpop.permute.xlu0 %1459 }
 0x228   : > { %v1778_v7 = vsel %vm1768_vm8, %v1745_v32, %v1460_v61  ;;  %v1746_v26 = vsel %vm1735_vm7, %v1713_v8, %v1334_v42  ;;  %v9411_v32 = vld [vmem:[#allocation132_spill] sm:$0xff]  ;;  %v9412_v61 = vld [vmem:[#allocation99_spill] sm:$0xff] }
 0x229   : > { %5430 = vmatmul.mubr.msk.f32.gmra.mrb[8].mxu0 %vm1813_vm9, %v1778_v7  ;;  %v1716_v42 = vsel %vm1702_vm6, %v1683_v45, %v9411_v32  ;;  %v1618_v5 = vsel %vm1603_vm3, %v1585_v47, %v9412_v61  ;;  %v5612_v45 = vld [vmem:[%s5793_s9 + $0xd8] sm:$0xff]  ;;  %v9433_v32 = vld [vmem:[#allocation68_spill] sm:$0xff]  ;;  %v9434_v61 = vld [vmem:[#allocation81_spill] sm:$0xff] }
 0x22a   : > { %v1651_v3 = vsel %vm1636_vm4, %v1618_v5, %v9413_v10  ;;  %v1556_v47 = vsel %vm1537_vm1, %v5612_v45, %v9432_v51  ;;  %v9455_v51 = vld [vmem:[#allocation32_spill] sm:$0xff] }
 0x22b   : > { %v1462_v27 = vpop.permute.xlu1 %1461  ;;  %v1336_v63 = vpop.permute.xlu0 %1335  ;;  %v1684_v8 = vsel %vm1669_vm5, %v1651_v3, %v9415_v35  ;;  %v1589_v5 = vsel %vm1570_vm2, %v1556_v47, %v9434_v61  ;;  %v9456_v61 = vld [vmem:[#allocation51_spill] sm:$0xff] }
 0x22c   : > { %v1779_v0 = vsel %vm1768_vm8, %v1746_v26, %v1462_v27  ;;  %v1747_v41 = vsel %vm1735_vm7, %v1714_v23, %v1336_v63  ;;  %v9417_v26 = vld [vmem:[#allocation135_spill] sm:$0xff]  ;;  %v9418_v63 = vld [vmem:[#allocation98_spill] sm:$0xff] }
 0x22d   : > { %5432 = vmatprep.mubr.msk.f32.mxu0 %vm1813_vm9, %v1779_v0  ;;  %v1717_v27 = vsel %vm1702_vm6, %v1684_v8, %v9417_v26  ;;  %v1619_v12 = vsel %vm1603_vm3, %v1586_v38, %v9418_v63  ;;  %v5613_v8 = vld [vmem:[%s5793_s9 + $0xe0] sm:$0xff]  ;;  %v9439_v26 = vld [vmem:[#allocation117_spill] sm:$0xff] }
 0x22e   : > { %v1652_v53 = vsel %vm1636_vm4, %v1619_v12, %v9419_v30  ;;  %v1557_v38 = vsel %vm1537_vm1, %v5613_v8, %v9438_v40  ;;  %v9440_v63 = vld [vmem:[#allocation80_spill] sm:$0xff]  ;;  %v9461_v40 = vld [vmem:[#allocation37_spill] sm:$0xff] }
 0x22f   : > { %v1338_v14 = vpop.permute.xlu1 %1337  ;;  %v1464_v29 = vpop.permute.xlu0 %1463  ;;  %v1685_v23 = vsel %vm1669_vm5, %v1652_v53, %v9421_v57  ;;  %v1590_v12 = vsel %vm1570_vm2, %v1557_v38, %v9440_v63  ;;  %v9462_v63 = vld [vmem:[#allocation50_spill] sm:$0xff] }
 0x230   : > { %v1780_v18 = vsel %vm1768_vm8, %v1747_v41, %v1464_v29  ;;  %v1748_v36 = vsel %vm1735_vm7, %v1715_v20, %v1338_v14  ;;  %v9423_v41 = vld [vmem:[#allocation134_spill] sm:$0xff]  ;;  %v9424_v29 = vld [vmem:[#allocation101_spill] sm:$0xff] }
 0x231   : > { %5433 = vmatmul.mubr.msk.f32.gmra.mrb[10].mxu0 %vm1813_vm9, %v1780_v18  ;;  %v1718_v14 = vsel %vm1702_vm6, %v1685_v23, %v9423_v41  ;;  %v1620_v55 = vsel %vm1603_vm3, %v1587_v1, %v9424_v29  ;;  %v5614_v23 = vld [vmem:[%s5793_s9 + $0xf0] sm:$0xff]  ;;  %v9445_v41 = vld [vmem:[#allocation116_spill] sm:$0xff]  ;;  %v9446_v29 = vld [vmem:[#allocation83_spill] sm:$0xff] }
 0x232   : > { %v1653_v58 = vsel %vm1636_vm4, %v1620_v55, %v9425_v48  ;;  %v1558_v1 = vsel %vm1537_vm1, %v5614_v23, %v9444_v54  ;;  %v9467_v54 = vld [vmem:[#allocation36_spill] sm:$0xff] }
 0x233   : > { %v1466_v28 = vpop.permute.xlu1 %1465  ;;  %v1340_v49 = vpop.permute.xlu0 %1339  ;;  %v1686_v20 = vsel %vm1669_vm5, %v1653_v58, %v9427_v13  ;;  %v1591_v55 = vsel %vm1570_vm2, %v1558_v1, %v9446_v29 }
 0x234   : > { %v1781_v9 = vsel %vm1768_vm8, %v1748_v36, %v1466_v28  ;;  %v1749_v39 = vsel %vm1735_vm7, %v1716_v42, %v1340_v49  ;;  %v9429_v36 = vld [vmem:[#allocation137_spill] sm:$0xff]  ;;  %v9430_v49 = vld [vmem:[#allocation100_spill] sm:$0xff] }
 0x235   : > { %5435 = vmatprep.mubr.msk.f32.mxu0 %vm1813_vm9, %v1781_v9  ;;  %v1719_v28 = vsel %vm1702_vm6, %v1686_v20, %v9429_v36  ;;  %v1621_v44 = vsel %vm1603_vm3, %v1588_v46, %v9430_v49  ;;  %v5615_v20 = vld [vmem:[%s5793_s9 + $0xf8] sm:$0xff]  ;;  %v9452_v49 = vld [vmem:[#allocation82_spill] sm:$0xff] }
 0x236   : > { %v1654_v4 = vsel %vm1636_vm4, %v1621_v44, %v9431_v59  ;;  %v1559_v46 = vsel %vm1537_vm1, %v5615_v20, %v9450_v34  ;;  %v9451_v36 = vld [vmem:[#allocation119_spill] sm:$0xff] }
 0x237   : > { %v1342_v7 = vpop.permute.xlu1 %1341  ;;  %v1468_v25 = vpop.permute.xlu0 %1467  ;;  %v1687_v42 = vsel %vm1669_vm5, %v1654_v4, %v9433_v32  ;;  %v1592_v44 = vsel %vm1570_vm2, %v1559_v46, %v9452_v49  ;;  %v9471_v20 = vld [vmem:[#allocation55_spill] sm:$0xff]  ;;  %v9472_v46 = vld [vmem:[#allocation86_spill] sm:$0xff] }
 0x238   : > { %v1782_v21 = vsel %vm1768_vm8, %v1749_v39, %v1468_v25  ;;  %v1750_v19 = vsel %vm1735_vm7, %v1717_v27, %v1342_v7  ;;  %v9435_v39 = vld [vmem:[#allocation136_spill] sm:$0xff]  ;;  %v9436_v25 = vld [vmem:[#allocation103_spill] sm:$0xff] }
 0x239   : > { %5436 = vmatmul.mubr.msk.f32.gmra.mrb[12].mxu0 %vm1813_vm9, %v1782_v21  ;;  %v1720_v7 = vsel %vm1702_vm6, %v1687_v42, %v9435_v39  ;;  %v1622_v10 = vsel %vm1603_vm3, %v1589_v5, %v9436_v25  ;;  %v5616_v42 = vld [vmem:[%s5793_s9 + $0x108] sm:$0xff]  ;;  %v9457_v39 = vld [vmem:[#allocation118_spill] sm:$0xff] }
 0x23a   : > { %v1655_v52 = vsel %vm1636_vm4, %v1622_v10, %v9437_v17  ;;  %v1560_v5 = vsel %vm1537_vm1, %v5616_v42, %v9456_v61  ;;  %v9458_v25 = vld [vmem:[#allocation85_spill] sm:$0xff]  ;;  %v9479_v61 = vld [vmem:[#allocation123_spill] sm:$0xff] }
 0x23b   : > { %v1470_v0 = vpop.permute.xlu1 %1469  ;;  %v1344_v37 = vpop.permute.xlu0 %1343  ;;  %v1688_v27 = vsel %vm1669_vm5, %v1655_v52, %v9439_v26  ;;  %v1593_v10 = vsel %vm1570_vm2, %v1560_v5, %v9458_v25 }
 0x23c   : > { %v1783_v6 = vsel %vm1768_vm8, %v1750_v19, %v1470_v0  ;;  %v1751_v56 = vsel %vm1735_vm7, %v1718_v14, %v1344_v37  ;;  %v9441_v19 = vld [vmem:[#allocation139_spill] sm:$0xff]  ;;  %v9442_v37 = vld [vmem:[#allocation102_spill] sm:$0xff] }
 0x23d   : > { %5438 = vmatprep.mubr.msk.f32.mxu0 %vm1813_vm9, %v1783_v6  ;;  %v1721_v0 = vsel %vm1702_vm6, %v1688_v27, %v9441_v19  ;;  %v1623_v30 = vsel %vm1603_vm3, %v1590_v12, %v9442_v37  ;;  %v5617_v27 = vld [vmem:[%s5793_s9 + $0x110] sm:$0xff]  ;;  %v9463_v19 = vld [vmem:[#allocation121_spill] sm:$0xff]  ;;  %v9464_v37 = vld [vmem:[#allocation84_spill] sm:$0xff] }
 0x23e   : > { %v1656_v43 = vsel %vm1636_vm4, %v1623_v30, %v9443_v24  ;;  %v1561_v12 = vsel %vm1537_vm1, %v5617_v27, %v9462_v63  ;;  %v9481_v27 = vld [vmem:[#allocation58_spill] sm:$0xff] }
 0x23f   : > { %v1346_v18 = vpop.permute.xlu1 %1345  ;;  %v1472_v22 = vpop.permute.xlu0 %1471  ;;  %v1689_v14 = vsel %vm1669_vm5, %v1656_v43, %v9445_v41  ;;  %v1594_v30 = vsel %vm1570_vm2, %v1561_v12, %v9464_v37  ;;  %v5621_v12 = vld [vmem:[%s5793_s9 + $0x138] sm:$0xff]  ;;  %v9483_v37 = vld [vmem:[#allocation88_spill] sm:$0xff] }
 0x240   : > { %v1784_v11 = vsel %vm1768_vm8, %v1751_v56, %v1472_v22  ;;  %v1752_v62 = vsel %vm1735_vm7, %v1719_v28, %v1346_v18  ;;  %v9447_v56 = vld [vmem:[#allocation138_spill] sm:$0xff]  ;;  %v9448_v22 = vld [vmem:[#allocation105_spill] sm:$0xff] }
 0x241   : > { %5439 = vmatmul.mubr.msk.f32.gmra.mrb[14].mxu0 %vm1813_vm9, %v1784_v11  ;;  %v1722_v18 = vsel %vm1702_vm6, %v1689_v14, %v9447_v56  ;;  %v1624_v48 = vsel %vm1603_vm3, %v1591_v55, %v9448_v22  ;;  %v9468_v14 = vld [vmem:[#allocation120_spill] sm:$0xff]  ;;  %v9469_v55 = vld [vmem:[#allocation142_spill] sm:$0xff] }
 0x242   : > { %v1657_v33 = vsel %vm1636_vm4, %v1624_v48, %v9449_v16  ;;  %v9470_v16 = vld [vmem:[#allocation54_spill] sm:$0xff] }
 0x243   : > { %v1474_v9 = vpop.permute.xlu1 %1473  ;;  %v1348_v15 = vpop.permute.xlu0 %1347  ;;  %v1690_v28 = vsel %vm1669_vm5, %v1657_v33, %v9451_v36 }
 0x244   : > { %v1785_v31 = vsel %vm1768_vm8, %v1752_v62, %v1474_v9  ;;  %v1753_v3 = vsel %vm1735_vm7, %v1720_v7, %v1348_v15  ;;  %v9453_v62 = vld [vmem:[#allocation141_spill] sm:$0xff]  ;;  %v9454_v15 = vld [vmem:[#allocation104_spill] sm:$0xff] }
 0x245   : > { %5441 = vmatprep.mubr.msk.f32.mxu0 %vm1813_vm9, %v1785_v31  ;;  %v1723_v9 = vsel %vm1702_vm6, %v1690_v28, %v9453_v62  ;;  %v1625_v59 = vsel %vm1603_vm3, %v1592_v44, %v9454_v15  ;;  %v9473_v28 = vld [vmem:[#allocation87_spill] sm:$0xff]  ;;  %v9474_v44 = vld [vmem:[#allocation108_spill] sm:$0xff] }
 0x246   : > { %v1658_v47 = vsel %vm1636_vm4, %v1625_v59, %v9455_v51  ;;  %v9477_v51 = vld [vmem:[#allocation41_spill] sm:$0xff] }
 0x247   : > { %v1350_v21 = vpop.permute.xlu1 %1349  ;;  %v1476_v2 = vpop.permute.xlu0 %1475  ;;  %v1691_v7 = vsel %vm1669_vm5, %v1658_v47, %v9457_v39 }
 0x248   : > { %v1786_v35 = vsel %vm1768_vm8, %v1753_v3, %v1476_v2  ;;  %v1754_v53 = vsel %vm1735_vm7, %v1721_v0, %v1350_v21  ;;  %v9459_v3 = vld [vmem:[#allocation140_spill] sm:$0xff]  ;;  %v9460_v2 = vld [vmem:[#allocation107_spill] sm:$0xff] }
 0x249   : > { %5442 = vmatmul.mubr.msk.f32.gmra.mrb[16].mxu0 %vm1813_vm9, %v1786_v35  ;;  %v1724_v21 = vsel %vm1702_vm6, %v1691_v7, %v9459_v3  ;;  %v1626_v17 = vsel %vm1603_vm3, %v1593_v10, %v9460_v2  ;;  %v9480_v7 = vld [vmem:[#allocation9_spill] sm:$0xff] }
 0x24a   : > { %v1659_v38 = vsel %vm1636_vm4, %v1626_v17, %v9461_v40 }
 0x24b   : > { %v1478_v6 = vpop.permute.xlu1 %1477  ;;  %v1352_v60 = vpop.permute.xlu0 %1351  ;;  %v1692_v0 = vsel %vm1669_vm5, %v1659_v38, %v9463_v19  ;;  %v9482_v19 = vld [vmem:[#allocation59_spill] sm:$0xff] }
 0x24c   : > { %v1787_v57 = vsel %vm1768_vm8, %v1754_v53, %v1478_v6  ;;  %v1755_v58 = vsel %vm1735_vm7, %v1722_v18, %v1352_v60  ;;  %v9465_v53 = vld [vmem:[#allocation143_spill] sm:$0xff]  ;;  %v9466_v60 = vld [vmem:[#allocation106_spill] sm:$0xff]  ;;  %v5698_v18 = vmov 0.0  }
 0x24d   : > { %5444 = vmatprep.mubr.msk.f32.mxu0 %vm1813_vm9, %v1787_v57  ;;  %v1725_v6 = vsel %vm1702_vm6, %v1692_v0, %v9465_v53  ;;  %v1627_v24 = vsel %vm1603_vm3, %v1594_v30, %v9466_v60  ;;  %2172 = vst.msk [vmem:[#allocation2 + $0x8] sm:$0xff] %vm1537_vm1, %v5698_v18  ;;  %2171 = vst.msk [vmem:[#allocation2] sm:$0xff] %vm1537_vm1, %v5698_v18  ;;  %v1564_v0 = vsel %vm1537_vm1, %v5621_v12, %v9482_v19  ;;  %v9484_v53 = vld [vmem:[#allocation89_spill] sm:$0xff]  ;;  %v9485_v60 = vld [vmem:[#allocation110_spill] sm:$0xff] }
 0x24e   : > { %v1660_v1 = vsel %vm1636_vm4, %v1627_v24, %v9467_v54  ;;  %2174 = vst.msk [vmem:[#allocation2 + $0x10] sm:$0x3] %vm2173_vm10, %v5698_v18  ;;  %2178 = vst.msk [vmem:[#allocation2 + $0x1a8] sm:$0x3] %vm2173_vm10, %v5698_v18  ;;  %v5624_v19 = vld [vmem:[%s5793_s9 + $0x170] sm:$0xff]  ;;  %vm4947_vm10 = vcmask 490496  }
 0x24f   : > { %v1354_v11 = vpop.permute.xlu1 %1353  ;;  %v1480_v50 = vpop.permute.xlu0 %1479  ;;  %v1693_v29 = vsel %vm1669_vm5, %v1660_v1, %v9468_v14  ;;  %2176 = vst.msk [vmem:[#allocation2 + $0x198] sm:$0xff] %vm1537_vm1, %v5698_v18  ;;  %2177 = vst.msk [vmem:[#allocation2 + $0x1a0] sm:$0xff] %vm1537_vm1, %v5698_v18  ;;  %v9487_v1 = vld [vmem:[#allocation44_spill] sm:$0xff]  ;;  %v9488_v14 = vld [vmem:[#allocation45_spill] sm:$0xff] }
 0x250   : > { %v1788_v13 = vsel %vm1768_vm8, %v1755_v58, %v1480_v50  ;;  %v1756_v4 = vsel %vm1735_vm7, %v1723_v9, %v1354_v11  ;;  %v1726_v56 = vsel %vm1702_vm6, %v1693_v29, %v9469_v55  ;;  %v5618_v50 = vld [vmem:[%s5793_s9 + $0x128] sm:$0xff]  ;;  %2180 = vst.msk [vmem:[#allocation2] sm:$0x1] %vm2179_vm11, %v5698_v18  ;;  %2181 = vst.msk [vmem:[#allocation2 + $0x18] sm:$0x1] %vm2179_vm11, %v5698_v18  ;;  %v9489_v55 = vld [vmem:[#allocation124_spill] sm:$0xff] }
 0x251   : > { %5445 = vmatmul.mubr.msk.f32.gmra.mrb[18].mxu0 %vm1813_vm9, %v1788_v13  ;;  %v1563_v33 = vsel %vm1537_vm1, %v5618_v50, %v9470_v16  ;;  %v5619_v13 = vld [vmem:[%s5793_s9 + $0x120] sm:$0xff]  ;;  %2182 = vst.msk [vmem:[#allocation2 + $0x30] sm:$0x1] %vm2179_vm11, %v5698_v18  ;;  %2183 = vst.msk [vmem:[#allocation2 + $0x48] sm:$0x1] %vm2179_vm11, %v5698_v18  ;;  %v9475_v9 = vld [vmem:[#allocation109_spill] sm:$0xff] }
 0x252   : > { %v1562_v34 = vsel %vm1537_vm1, %v5619_v13, %v9471_v20  ;;  %v1596_v36 = vsel %vm1570_vm2, %v1563_v33, %v9472_v46  ;;  %2184 = vst.msk [vmem:[#allocation2 + $0x60] sm:$0x1] %vm2179_vm11, %v5698_v18  ;;  %2185 = vst.msk [vmem:[#allocation2 + $0x78] sm:$0x1] %vm2179_vm11, %v5698_v18 }
 0x253   : > { %v1482_v31 = vpop.permute.xlu1 %1481  ;;  %v1356_v45 = vpop.permute.xlu0 %1355  ;;  %v1595_v49 = vsel %vm1570_vm2, %v1562_v34, %v9473_v28  ;;  %2186 = vst.msk [vmem:[#allocation2 + $0x90] sm:$0x1] %vm2179_vm11, %v5698_v18  ;;  %2187 = vst.msk [vmem:[#allocation2 + $0xa8] sm:$0x1] %vm2179_vm11, %v5698_v18  ;;  %v1629_v62 = vsel %vm1603_vm3, %v1596_v36, %v9474_v44  ;;  %v5622_v36 = vld [vmem:[%s5793_s9 + $0x158] sm:$0xff]  ;;  %v9491_v28 = vld [vmem:[#allocation62_spill] sm:$0xff] }
 0x254   : > { %v1789_v32 = vsel %vm1768_vm8, %v1756_v4, %v1482_v31  ;;  %v1757_v52 = vsel %vm1735_vm7, %v1724_v21, %v1356_v45  ;;  %2188 = vst.msk [vmem:[#allocation2 + $0xc0] sm:$0x1] %vm2179_vm11, %v5698_v18  ;;  %2189 = vst.msk [vmem:[#allocation2 + $0xd8] sm:$0x1] %vm2179_vm11, %v5698_v18  ;;  %v1628_v15 = vsel %vm1603_vm3, %v1595_v49, %v9475_v9  ;;  %v9476_v31 = vld [vmem:[#allocation40_spill] sm:$0xff]  ;;  %v5623_v44 = vld [vmem:[%s5793_s9 + $0x150] sm:$0xff] }
 0x255   : > { %5447 = vmatprep.mubr.msk.f32.mxu0 %vm1813_vm9, %v1789_v32  ;;  %2190 = vst.msk [vmem:[#allocation2 + $0xf0] sm:$0x1] %vm2179_vm11, %v5698_v18  ;;  %2191 = vst.msk [vmem:[#allocation2 + $0x108] sm:$0x1] %vm2179_vm11, %v5698_v18  ;;  %v1662_v45 = vsel %vm1636_vm4, %v1629_v62, %v9476_v31  ;;  %v1661_v47 = vsel %vm1636_vm4, %v1628_v15, %v9477_v51  ;;  %v9478_v32 = vld [vmem:[#allocation122_spill] sm:$0xff]  ;;  %v2281_v3 = vld [vmem:[#allocation2 + $0x1] sm:$0xff]  ;;  %v1567_v49 = vsel %vm1537_vm1, %v5622_v36, %v9491_v28 }
 0x256   : > { %2192 = vst.msk [vmem:[#allocation2 + $0x120] sm:$0x1] %vm2179_vm11, %v5698_v18  ;;  %2193 = vst.msk [vmem:[#allocation2 + $0x138] sm:$0x1] %vm2179_vm11, %v5698_v18  ;;  %v1695_v42 = vsel %vm1669_vm5, %v1662_v45, %v9478_v32  ;;  %v1694_v5 = vsel %vm1669_vm5, %v1661_v47, %v9479_v61  ;;  %v2282_v39 = vld [vmem:[#allocation2 + $0x9] sm:$0xff]  ;;  %2570 = vrot.lane.b32.xlu0 %v2281_v3, %s5690_s10  ;;  %v9492_v62 = vld [vmem:[#allocation63_spill] sm:$0xff] }
 0x257   : > { %v1358_v35 = vpop.permute.xlu1 %1357  ;;  %v1484_v8 = vpop.permute.xlu0 %1483  ;;  %2194 = vst.msk [vmem:[#allocation2 + $0x150] sm:$0x1] %vm2179_vm11, %v5698_v18  ;;  %2195 = vst.msk [vmem:[#allocation2 + $0x168] sm:$0x1] %vm2179_vm11, %v5698_v18  ;;  %v1727_v25 = vsel %vm1702_vm6, %v1694_v5, %v9480_v7  ;;  %2572 = vrot.lane.b32.xlu1 %v2282_v39, %s5690_s10  ;;  %v1566_v9 = vsel %vm1537_vm1, %v5623_v44, %v9492_v62  ;;  %v9493_v15 = vld [vmem:[#allocation90_spill] sm:$0xff]  ;;  %v9495_v45 = vld [vmem:[#allocation112_spill] sm:$0xff] }
 0x258   : > { %v1790_v26 = vsel %vm1768_vm8, %v1757_v52, %v1484_v8  ;;  %v1758_v43 = vsel %vm1735_vm7, %v1725_v6, %v1358_v35  ;;  %2196 = vst.msk [vmem:[#allocation2 + $0x180] sm:$0x1] %vm2179_vm11, %v5698_v18  ;;  %2197 = vst.msk [vmem:[#allocation2 + $0x198] sm:$0x1] %vm2179_vm11, %v5698_v18  ;;  %v1597_v6 = vsel %vm1570_vm2, %v1564_v0, %v9484_v53  ;;  %v9496_v47 = vld [vmem:[#allocation113_spill] sm:$0xff]  ;;  %v9497_v5 = vld [vmem:[#allocation48_spill] sm:$0xff] }
 0x259   : > { %5448 = vmatmul.mubr.msk.f32.gmra.mrb[20].mxu0 %vm1813_vm9, %v1790_v26  ;;  %2198 = vst.msk [vmem:[#allocation2 + $0x11] sm:$0x1] %vm2179_vm11, %v5698_v18  ;;  %2199 = vst.msk [vmem:[#allocation2 + $0x29] sm:$0x1] %vm2179_vm11, %v5698_v18  ;;  %v5620_v26 = vld [vmem:[%s5793_s9 + $0x140] sm:$0xff]  ;;  %v9498_v7 = vld [vmem:[#allocation49_spill] sm:$0xff] }
 0x25a   : > { %2200 = vst.msk [vmem:[#allocation2 + $0x41] sm:$0x1] %vm2179_vm11, %v5698_v18  ;;  %2201 = vst.msk [vmem:[#allocation2 + $0x59] sm:$0x1] %vm2179_vm11, %v5698_v18  ;;  %v1565_v63 = vsel %vm1537_vm1, %v5620_v26, %v9481_v27  ;;  %v9501_v0 = vld [vmem:[#allocation66_spill] sm:$0xff]  ;;  %v9502_v53 = vld [vmem:[#allocation67_spill] sm:$0xff] }
 0x25b   : > { %v1486_v57 = vpop.permute.xlu1 %1485  ;;  %v1360_v23 = vpop.permute.xlu0 %1359  ;;  %2202 = vst.msk [vmem:[#allocation2 + $0x71] sm:$0x1] %vm2179_vm11, %v5698_v18  ;;  %2203 = vst.msk [vmem:[#allocation2 + $0x89] sm:$0x1] %vm2179_vm11, %v5698_v18  ;;  %v1598_v30 = vsel %vm1570_vm2, %v1565_v63, %v9483_v37  ;;  %v1569_v37 = vsel %vm1537_vm1, %v5624_v19, %v9501_v0 }
 0x25c   : > { %v1791_v41 = vsel %vm1768_vm8, %v1758_v43, %v1486_v57  ;;  %v1759_v22 = vsel %vm1735_vm7, %v1726_v56, %v1360_v23  ;;  %2204 = vst.msk [vmem:[#allocation2 + $0xa1] sm:$0x1] %vm2179_vm11, %v5698_v18  ;;  %2205 = vst.msk [vmem:[#allocation2 + $0xb9] sm:$0x1] %vm2179_vm11, %v5698_v18  ;;  %v1631_v24 = vsel %vm1603_vm3, %v1598_v30, %v9485_v60  ;;  %v9486_v43 = vld [vmem:[#allocation111_spill] sm:$0xff]  ;;  %v5625_v30 = vld [vmem:[%s5793_s9 + $0x168] sm:$0xff] }
 0x25d   : > { %5450 = vmatprep.mubr.msk.f32.mxu0 %vm1813_vm9, %v1791_v41  ;;  %2206 = vst.msk [vmem:[#allocation2 + $0xd1] sm:$0x1] %vm2179_vm11, %v5698_v18  ;;  %2207 = vst.msk [vmem:[#allocation2 + $0xe9] sm:$0x1] %vm2179_vm11, %v5698_v18  ;;  %v1630_v57 = vsel %vm1603_vm3, %v1597_v6, %v9486_v43  ;;  %v1664_v41 = vsel %vm1636_vm4, %v1631_v24, %v9487_v1  ;;  %v1568_v6 = vsel %vm1537_vm1, %v5625_v30, %v9502_v53  ;;  %v9503_v60 = vld [vmem:[#allocation92_spill] sm:$0xff]  ;;  %v9504_v43 = vld [vmem:[#allocation93_spill] sm:$0xff] }
 0x25e   : > { %2208 = vst.msk [vmem:[#allocation2 + $0x101] sm:$0x1] %vm2179_vm11, %v5698_v18  ;;  %2209 = vst.msk [vmem:[#allocation2 + $0x119] sm:$0x1] %vm2179_vm11, %v5698_v18  ;;  %v1663_v29 = vsel %vm1636_vm4, %v1630_v57, %v9488_v14  ;;  %v1697_v56 = vsel %vm1669_vm5, %v1664_v41, %v9489_v55  ;;  %v1602_v24 = vsel %vm1570_vm2, %v1569_v37, %v9503_v60  ;;  %v9506_v1 = vld [vmem:[#allocation115_spill] sm:$0xff]  ;;  %v9507_v55 = vld [vmem:[#allocation52_spill] sm:$0xff] }
 0x25f   : > { %v1236_v48 = vpop.permute.xlu1 %1235  ;;  %v1488_v58 = vpop.permute.xlu0 %1487  ;;  %2210 = vst.msk [vmem:[#allocation2 + $0x131] sm:$0x1] %vm2179_vm11, %v5698_v18  ;;  %2211 = vst.msk [vmem:[#allocation2 + $0x149] sm:$0x1] %vm2179_vm11, %v5698_v18  ;;  %v1601_v57 = vsel %vm1570_vm2, %v1568_v6, %v9504_v43 }
 0x260   : > { %v1792_v11 = vsel %vm1768_vm8, %v1759_v22, %v1488_v58  ;;  %2212 = vst.msk [vmem:[#allocation2 + $0x161] sm:$0x1] %vm2179_vm11, %v5698_v18  ;;  %2213 = vst.msk [vmem:[#allocation2 + $0x179] sm:$0x1] %vm2179_vm11, %v5698_v18  ;;  %v1728_v10 = vsel %vm1702_vm6, %v1695_v42, %v1236_v48  ;;  %v1634_v41 = vsel %vm1603_vm3, %v1601_v57, %v9506_v1 }
 0x261   : > { %5451 = vmatmul.mubr.msk.f32.gmra.mrb[22].mxu0 %vm1813_vm9, %v1792_v11  ;;  %2214 = vst.msk [vmem:[#allocation2 + $0x191] sm:$0x1] %vm2179_vm11, %v5698_v18  ;;  %2215 = vst.msk [vmem:[#allocation2 + $0x1a9] sm:$0x1] %vm2179_vm11, %v5698_v18  ;;  %v9490_v18 = vld [vmem:[#allocation125_spill] sm:$0xff]  ;;  %vm4950_vm11 = vcmask 523264  }
 0x262   : > { %v1696_v22 = vsel %vm1669_vm5, %v1663_v29, %v9490_v18  ;;  %v9508_v18 = vld [vmem:[#allocation53_spill] sm:$0xff] }
 0x263   : > { %v1364_v59 = vpop.permute.xlu1 %1363  ;;  %v1362_v4 = vpop.permute.xlu0 %1361 }
 0x264   : > { %v1761_v21 = vsel %vm1735_vm7, %v1728_v10, %v1364_v59  ;;  %v1760_v2 = vsel %vm1735_vm7, %v1727_v25, %v1362_v4  ;;  %v1600_v59 = vsel %vm1570_vm2, %v1567_v49, %v9493_v15  ;;  %v9494_v4 = vld [vmem:[#allocation91_spill] sm:$0xff]  ;;  %v9499_v10 = vld [vmem:[#allocation126_spill] sm:$0xff]  ;;  %v7517_v49 = vld [vmem:[%s9128_s2] ss:$0 sm:$0xff] }
 0x265   : > { %v1599_v31 = vsel %vm1570_vm2, %v1566_v9, %v9494_v4  ;;  %v1633_v51 = vsel %vm1603_vm3, %v1600_v59, %v9495_v45 }
 0x266   : > { %v1632_v32 = vsel %vm1603_vm3, %v1599_v31, %v9496_v47  ;;  %v1666_v39 = vsel %vm1636_vm4, %v1633_v51, %v9497_v5 }
 0x267   : > { %v1492_v17 = vpop.permute.xlu1 %1491  ;;  %v1490_v52 = vpop.permute.xlu0 %1489  ;;  %v1665_v25 = vsel %vm1636_vm4, %v1632_v32, %v9498_v7  ;;  %v1699_v3 = vsel %vm1669_vm5, %v1666_v39, %v9499_v10 }
 0x268   : > { %v1794_v35 = vsel %vm1768_vm8, %v1761_v21, %v1492_v17  ;;  %v1793_v8 = vsel %vm1768_vm8, %v1760_v2, %v1490_v52  ;;  %v9500_v21 = vld [vmem:[#allocation127_spill] sm:$0xff] }
 0x269   : > { %5453 = vmatprep.mubr.msk.f32.mxu0 %vm1813_vm9, %v1793_v8  ;;  %v1698_v2 = vsel %vm1669_vm5, %v1665_v25, %v9500_v21 }
 0x26a   : > { %5454 = vmatmul.mubr.msk.f32.gmra.mrb[24].mxu0 %vm1813_vm9, %v1794_v35 }
 0x26b   : > { %v1240_v40 = vpop.permute.xlu1 %1239  ;;  %v1238_v38 = vpop.permute.xlu0 %1237 }
 0x26c   : > { %v1730_v48 = vsel %vm1702_vm6, %v1697_v56, %v1240_v40  ;;  %v1729_v58 = vsel %vm1702_vm6, %v1696_v22, %v1238_v38  ;;  %v1667_v22 = vsel %vm1636_vm4, %v1634_v41, %v9508_v18 }
 0x26f   : > { %v1368_v23 = vpop.permute.xlu1 %1367  ;;  %v1366_v54 = vpop.permute.xlu0 %1365 }
 0x270   : > { %v1763_v11 = vsel %vm1735_vm7, %v1730_v48, %v1368_v23  ;;  %v1762_v50 = vsel %vm1735_vm7, %v1729_v58, %v1366_v54  ;;  %v9505_v23 = vld [vmem:[#allocation114_spill] sm:$0xff]  ;;  %v9509_v48 = vld [vmem:[#allocation128_spill] sm:$0xff] }
 0x271   : > { %v1635_v54 = vsel %vm1603_vm3, %v1602_v24, %v9505_v23 }
 0x272   : > { %v1668_v56 = vsel %vm1636_vm4, %v1635_v54, %v9507_v55 }
 0x273   : > { %v1496_v16 = vpop.permute.xlu1 %1495  ;;  %v1494_v33 = vpop.permute.xlu0 %1493  ;;  %v1701_v58 = vsel %vm1669_vm5, %v1668_v56, %v9509_v48 }
 0x274   : > { %v1796_v13 = vsel %vm1768_vm8, %v1763_v11, %v1496_v16  ;;  %v1795_v20 = vsel %vm1768_vm8, %v1762_v50, %v1494_v33  ;;  %v9510_v11 = vld [vmem:[#allocation129_spill] sm:$0xff] }
 0x275   : > { %5456 = vmatprep.mubr.msk.f32.mxu0 %vm1813_vm9, %v1795_v20  ;;  %v1700_v50 = vsel %vm1669_vm5, %v1667_v22, %v9510_v11 }
 0x276   : > { %5457 = vmatmul.mubr.msk.f32.gmra.mrb[26].mxu0 %vm1813_vm9, %v1796_v13 }
 0x277   : > { %v1244_v34 = vpop.permute.xlu1 %1243  ;;  %v1242_v46 = vpop.permute.xlu0 %1241 }
 0x278   : > { %v1732_v17 = vsel %vm1702_vm6, %v1699_v3, %v1244_v34  ;;  %v1731_v52 = vsel %vm1702_vm6, %v1698_v2, %v1242_v46 }
 0x27b   : > { %v1372_v42 = vpop.permute.xlu1 %1371  ;;  %v1370_v61 = vpop.permute.xlu0 %1369 }
 0x27c   : > { %v1765_v35 = vsel %vm1735_vm7, %v1732_v17, %v1372_v42  ;;  %v1764_v8 = vsel %vm1735_vm7, %v1731_v52, %v1370_v61 }
 0x27f   : > { %v1500_v40 = vpop.permute.xlu1 %1499  ;;  %v1498_v38 = vpop.permute.xlu0 %1497 }
 0x280   : > { %v1798_v26 = vsel %vm1768_vm8, %v1765_v35, %v1500_v40  ;;  %v1797_v27 = vsel %vm1768_vm8, %v1764_v8, %v1498_v38 }
 0x281   : > { %5459 = vmatprep.mubr.msk.f32.mxu0 %vm1813_vm9, %v1797_v27 }
 0x282   : > { %5460 = vmatmul.mubr.msk.f32.gmra.mrb[28].mxu0 %vm1813_vm9, %v1798_v26 }
 0x283   : > { %v1248_v63 = vpop.permute.xlu1 %1247  ;;  %v1246_v12 = vpop.permute.xlu0 %1245 }
 0x284   : > { %v1734_v16 = vsel %vm1702_vm6, %v1701_v58, %v1248_v63  ;;  %v1733_v33 = vsel %vm1702_vm6, %v1700_v50, %v1246_v12 }
 0x287   : > { %v1376_v14 = vpop.permute.xlu1 %1375  ;;  %v1374_v29 = vpop.permute.xlu0 %1373 }
 0x288   : > { %v1767_v13 = vsel %vm1735_vm7, %v1734_v16, %v1376_v14  ;;  %v1766_v20 = vsel %vm1735_vm7, %v1733_v33, %v1374_v29 }
 0x28b   : > { %v1504_v34 = vpop.permute.xlu1 %1503  ;;  %v1502_v46 = vpop.permute.xlu0 %1501 }
 0x28c   : > { %v1800_v36 = vsel %vm1768_vm8, %v1767_v13, %v1504_v34  ;;  %v1799_v28 = vsel %vm1768_vm8, %v1766_v20, %v1502_v46 }
 0x28d   : > { %5462 = vmatprep.mubr.msk.f32.mxu0 %vm1813_vm9, %v1799_v28 }
 0x28e   : > { %5463 = vmatmul.mubr.msk.f32.gmra.mrb[30].mxu0 %vm1813_vm9, %v1800_v36 }
 0x2dd   : > { %v5419_v44 = vpop.f32.mrb[0].mxu0 }
 0x2de   : > { %v1986_v62 = vadd.f32 %v5419_v44, %v7517_v49  ;;  %v1980_v9 = vpop.f32.mrb[1].mxu0 }
 0x2df   : > { %v1981_v15 = vadd.f32 %v7517_v49, %v1980_v9 }
 0x2e0   : > { %v2140_v59 = vmax.f32 %v1986_v62, 0.0 }
 0x2e1   : > { %v2139_v4 = vmax.f32 %v1981_v15, 0.0 }
 0x2e2   : > { %2218 = vst.msk [vmem:[#allocation2 + $0x21] sm:$0xff] %vm1537_vm1, %v2140_v59 }
 0x2e3   : > { %2217 = vst.msk [vmem:[#allocation2 + $0x19] sm:$0xff] %vm1537_vm1, %v2139_v4 }
 0x2e5   : > { %v5422_v31 = vpop.f32.mrb[2].mxu0 }
 0x2e6   : > { %v1996_v45 = vadd.f32 %v5422_v31, %v7517_v49  ;;  %v1990_v51 = vpop.f32.mrb[3].mxu0 }
 0x2e7   : > { %v1991_v47 = vadd.f32 %v7517_v49, %v1990_v51 }
 0x2e8   : > { %v2142_v32 = vmax.f32 %v1996_v45, 0.0 }
 0x2e9   : > { %v2141_v42 = vmax.f32 %v1991_v47, 0.0  ;;  %v7525_v61 = vld [vmem:[#allocation2 + $0x21] sm:$0xff] }
 0x2ea   : > { %2220 = vst.msk [vmem:[#allocation2 + $0x39] sm:$0xff] %vm1537_vm1, %v2142_v32  ;;  %2576 = vrot.lane.b32.xlu1 %v7525_v61, %s5690_s10  ;;  %v7530_v5 = vld [vmem:[#allocation2 + $0x19] sm:$0xff] }
 0x2eb   : > { %2219 = vst.msk [vmem:[#allocation2 + $0x31] sm:$0xff] %vm1537_vm1, %v2141_v42  ;;  %2574 = vrot.lane.b32.xlu0 %v7530_v5, %s5690_s10 }
 0x2ed   : > { %v5425_v39 = vpop.f32.mrb[4].mxu0 }
 0x2ee   : > { %v2006_v7 = vadd.f32 %v5425_v39, %v7517_v49  ;;  %v2000_v25 = vpop.f32.mrb[5].mxu0 }
 0x2ef   : > { %v2001_v10 = vadd.f32 %v7517_v49, %v2000_v25 }
 0x2f0   : > { %v2144_v3 = vmax.f32 %v2006_v7, 0.0 }
 0x2f1   : > { %v2143_v21 = vmax.f32 %v2001_v10, 0.0  ;;  %v7537_v2 = vld [vmem:[#allocation2 + $0x39] sm:$0xff] }
 0x2f2   : > { %2222 = vst.msk [vmem:[#allocation2 + $0x51] sm:$0xff] %vm1537_vm1, %v2144_v3  ;;  %2580 = vrot.lane.b32.xlu1 %v7537_v2, %s5690_s10  ;;  %v7542_v17 = vld [vmem:[#allocation2 + $0x31] sm:$0xff] }
 0x2f3   : > { %2221 = vst.msk [vmem:[#allocation2 + $0x49] sm:$0xff] %vm1537_vm1, %v2143_v21  ;;  %2578 = vrot.lane.b32.xlu0 %v7542_v17, %s5690_s10 }
 0x2f4   : > { %v5428_v52 = vpop.f32.mrb[6].mxu0 }
 0x2f5   : > { %v2016_v35 = vadd.f32 %v5428_v52, %v7517_v49  ;;  %v2010_v8 = vpop.f32.mrb[7].mxu0 }
 0x2f6   : > { %v2011_v40 = vadd.f32 %v7517_v49, %v2010_v8 }
 0x2f7   : > { %v2146_v38 = vmax.f32 %v2016_v35, 0.0 }
 0x2f8   : > { %v2145_v26 = vmax.f32 %v2011_v40, 0.0 }
 0x2f9   : > { %2224 = vst.msk [vmem:[#allocation2 + $0x69] sm:$0xff] %vm1537_vm1, %v2146_v38  ;;  %v7550_v27 = vld [vmem:[#allocation2 + $0x51] sm:$0xff] }
 0x2fa   : > { %2223 = vst.msk [vmem:[#allocation2 + $0x61] sm:$0xff] %vm1537_vm1, %v2145_v26  ;;  %2584 = vrot.lane.b32.xlu1 %v7550_v27, %s5690_s10  ;;  %v7555_v63 = vld [vmem:[#allocation2 + $0x49] sm:$0xff] }
 0x2fb   : > { %2582 = vrot.lane.b32.xlu0 %v7555_v63, %s5690_s10 }
 0x2fc   : > { %v5431_v12 = vpop.f32.mrb[8].mxu0 }
 0x2fd   : > { %v2026_v19 = vadd.f32 %v5431_v12, %v7517_v49  ;;  %v2020_v0 = vpop.f32.mrb[9].mxu0 }
 0x2fe   : > { %v2021_v37 = vadd.f32 %v7517_v49, %v2020_v0 }
 0x2ff   : > { %v2148_v30 = vmax.f32 %v2026_v19, 0.0 }
 0x300   : > { %v2147_v53 = vmax.f32 %v2021_v37, 0.0  ;;  %v7561_v6 = vld [vmem:[#allocation2 + $0x69] sm:$0xff] }
 0x301   : > { %2226 = vst.msk [vmem:[#allocation2 + $0x81] sm:$0xff] %vm1537_vm1, %v2148_v30  ;;  %2588 = vrot.lane.b32.xlu1 %v7561_v6, %s5690_s10  ;;  %v7566_v60 = vld [vmem:[#allocation2 + $0x61] sm:$0xff] }
 0x302   : > { %2225 = vst.msk [vmem:[#allocation2 + $0x79] sm:$0xff] %vm1537_vm1, %v2147_v53  ;;  %2586 = vrot.lane.b32.xlu0 %v7566_v60, %s5690_s10 }
 0x304   : > { %v5434_v24 = vpop.f32.mrb[10].mxu0 }
 0x305   : > { %v2036_v43 = vadd.f32 %v5434_v24, %v7517_v49  ;;  %v2030_v57 = vpop.f32.mrb[11].mxu0 }
 0x306   : > { %v2031_v23 = vadd.f32 %v7517_v49, %v2030_v57 }
 0x307   : > { %v2150_v54 = vmax.f32 %v2036_v43, 0.0 }
 0x308   : > { %v2149_v1 = vmax.f32 %v2031_v23, 0.0  ;;  %v7573_v41 = vld [vmem:[#allocation2 + $0x81] sm:$0xff] }
 0x309   : > { %2228 = vst.msk [vmem:[#allocation2 + $0x99] sm:$0xff] %vm1537_vm1, %v2150_v54  ;;  %2592 = vrot.lane.b32.xlu1 %v7573_v41, %s5690_s10  ;;  %v7578_v14 = vld [vmem:[#allocation2 + $0x79] sm:$0xff] }
 0x30a   : > { %2227 = vst.msk [vmem:[#allocation2 + $0x91] sm:$0xff] %vm1537_vm1, %v2149_v1  ;;  %2590 = vrot.lane.b32.xlu0 %v7578_v14, %s5690_s10 }
 0x30c   : > { %v5437_v29 = vpop.f32.mrb[12].mxu0 }
 0x30d   : > { %v2046_v55 = vadd.f32 %v5437_v29, %v7517_v49  ;;  %v2040_v56 = vpop.f32.mrb[13].mxu0 }
 0x30e   : > { %v2041_v18 = vadd.f32 %v7517_v49, %v2040_v56 }
 0x30f   : > { %v2152_v22 = vmax.f32 %v2046_v55, 0.0 }
 0x310   : > { %v2151_v48 = vmax.f32 %v2041_v18, 0.0  ;;  %v7585_v58 = vld [vmem:[#allocation2 + $0x99] sm:$0xff] }
 0x311   : > { %2230 = vst.msk [vmem:[#allocation2 + $0xb1] sm:$0xff] %vm1537_vm1, %v2152_v22  ;;  %2596 = vrot.lane.b32.xlu1 %v7585_v58, %s5690_s10  ;;  %v7590_v11 = vld [vmem:[#allocation2 + $0x91] sm:$0xff] }
 0x312   : > { %2229 = vst.msk [vmem:[#allocation2 + $0xa9] sm:$0xff] %vm1537_vm1, %v2151_v48  ;;  %2594 = vrot.lane.b32.xlu0 %v7590_v11, %s5690_s10 }
 0x314   : > { %v5440_v50 = vpop.f32.mrb[14].mxu0 }
 0x315   : > { %v2056_v16 = vadd.f32 %v5440_v50, %v7517_v49  ;;  %v2050_v33 = vpop.f32.mrb[15].mxu0 }
 0x316   : > { %v2051_v13 = vadd.f32 %v7517_v49, %v2050_v33 }
 0x317   : > { %v2154_v20 = vmax.f32 %v2056_v16, 0.0 }
 0x318   : > { %v2153_v34 = vmax.f32 %v2051_v13, 0.0  ;;  %v2296_v46 = vld [vmem:[#allocation2 + $0xb1] sm:$0xff] }
 0x319   : > { %2232 = vst.msk [vmem:[#allocation2 + $0xc9] sm:$0xff] %vm1537_vm1, %v2154_v20  ;;  %2600 = vrot.lane.b32.xlu1 %v2296_v46, %s5690_s10  ;;  %v2295_v36 = vld [vmem:[#allocation2 + $0xa9] sm:$0xff] }
 0x31a   : > { %2231 = vst.msk [vmem:[#allocation2 + $0xc1] sm:$0xff] %vm1537_vm1, %v2153_v34  ;;  %2598 = vrot.lane.b32.xlu0 %v2295_v36, %s5690_s10 }
 0x31c   : > { %v5443_v28 = vpop.f32.mrb[16].mxu0 }
 0x31d   : > { %v2066_v44 = vadd.f32 %v5443_v28, %v7517_v49  ;;  %v2060_v62 = vpop.f32.mrb[17].mxu0 }
 0x31e   : > { %v2061_v9 = vadd.f32 %v7517_v49, %v2060_v62 }
 0x31f   : > { %v2156_v15 = vmax.f32 %v2066_v44, 0.0 }
 0x320   : > { %v2155_v59 = vmax.f32 %v2061_v9, 0.0  ;;  %v2298_v4 = vld [vmem:[#allocation2 + $0xc9] sm:$0xff] }
 0x321   : > { %2234 = vst.msk [vmem:[#allocation2 + $0xe1] sm:$0xff] %vm1537_vm1, %v2156_v15  ;;  %2604 = vrot.lane.b32.xlu1 %v2298_v4, %s5690_s10  ;;  %v2297_v31 = vld [vmem:[#allocation2 + $0xc1] sm:$0xff] }
 0x322   : > { %2233 = vst.msk [vmem:[#allocation2 + $0xd9] sm:$0xff] %vm1537_vm1, %v2155_v59  ;;  %2602 = vrot.lane.b32.xlu0 %v2297_v31, %s5690_s10 }
 0x324   : > { %v5446_v45 = vpop.f32.mrb[18].mxu0 }
 0x325   : > { %v2076_v51 = vadd.f32 %v5446_v45, %v7517_v49  ;;  %v2070_v47 = vpop.f32.mrb[19].mxu0 }
 0x326   : > { %v2071_v32 = vadd.f32 %v7517_v49, %v2070_v47 }
 0x327   : > { %v2158_v42 = vmax.f32 %v2076_v51, 0.0 }
 0x328   : > { %v2157_v39 = vmax.f32 %v2071_v32, 0.0  ;;  %v2300_v7 = vld [vmem:[#allocation2 + $0xe1] sm:$0xff]  ;;  %v2314_v32 = vld [vmem:[#allocation2 + $0xa] sm:$0xff] }
 0x329   : > { %2236 = vst.msk [vmem:[#allocation2 + $0xf9] sm:$0xff] %vm1537_vm1, %v2158_v42  ;;  %2608 = vrot.lane.b32.xlu1 %v2300_v7, %s5690_s10  ;;  %v2299_v25 = vld [vmem:[#allocation2 + $0xd9] sm:$0xff] }
 0x32a   : > { %2235 = vst.msk [vmem:[#allocation2 + $0xf1] sm:$0xff] %vm1537_vm1, %v2157_v39  ;;  %2606 = vrot.lane.b32.xlu0 %v2299_v25, %s5690_s10  ;;  %v2313_v39 = vld [vmem:[#allocation2 + $0x2] sm:$0xff] }
 0x32b   : > { %v7651_v25 = vld [vmem:[#allocation2 + $0x22] sm:$0xff] }
 0x32c   : > { %v5449_v10 = vpop.f32.mrb[20].mxu0 }
 0x32d   : > { %v2086_v3 = vadd.f32 %v5449_v10, %v7517_v49  ;;  %v2080_v21 = vpop.f32.mrb[21].mxu0  ;;  %v7659_v10 = vld [vmem:[#allocation2 + $0x3a] sm:$0xff] }
 0x32e   : > { %v2081_v52 = vadd.f32 %v7517_v49, %v2080_v21  ;;  %v7667_v21 = vld [vmem:[#allocation2 + $0x52] sm:$0xff] }
 0x32f   : > { %v2160_v35 = vmax.f32 %v2086_v3, 0.0  ;;  %v7663_v3 = vld [vmem:[#allocation2 + $0x32] sm:$0xff] }
 0x330   : > { %v2159_v8 = vmax.f32 %v2081_v52, 0.0  ;;  %v2302_v40 = vld [vmem:[#allocation2 + $0xf9] sm:$0xff]  ;;  %v7671_v52 = vld [vmem:[#allocation2 + $0x4a] sm:$0xff] }
 0x331   : > { %2238 = vst.msk [vmem:[#allocation2 + $0x111] sm:$0xff] %vm1537_vm1, %v2160_v35  ;;  %2612 = vrot.lane.b32.xlu1 %v2302_v40, %s5690_s10  ;;  %v2301_v38 = vld [vmem:[#allocation2 + $0xf1] sm:$0xff]  ;;  %v7683_v40 = vld [vmem:[#allocation2 + $0x82] sm:$0xff] }
 0x332   : > { %2237 = vst.msk [vmem:[#allocation2 + $0x109] sm:$0xff] %vm1537_vm1, %v2159_v8  ;;  %2610 = vrot.lane.b32.xlu0 %v2301_v38, %s5690_s10  ;;  %v7675_v35 = vld [vmem:[#allocation2 + $0x6a] sm:$0xff]  ;;  %v7679_v8 = vld [vmem:[#allocation2 + $0x62] sm:$0xff]  ;;  %v7687_v38 = vld [vmem:[#allocation2 + $0x7a] sm:$0xff] }
 0x334   : > { %v5452_v26 = vpop.f32.mrb[22].mxu0 }
 0x335   : > { %v2096_v12 = vadd.f32 %v5452_v26, %v7517_v49  ;;  %v2090_v19 = vpop.f32.mrb[23].mxu0  ;;  %v7691_v26 = vld [vmem:[#allocation2 + $0x9a] sm:$0xff] }
 0x336   : > { %v2091_v0 = vadd.f32 %v7517_v49, %v2090_v19  ;;  %v7699_v19 = vld [vmem:[#allocation2 + $0xb2] sm:$0xff] }
 0x337   : > { %v2162_v37 = vmax.f32 %v2096_v12, 0.0  ;;  %v7695_v12 = vld [vmem:[#allocation2 + $0x92] sm:$0xff] }
 0x338   : > { %v2161_v30 = vmax.f32 %v2091_v0, 0.0  ;;  %v2304_v53 = vld [vmem:[#allocation2 + $0x111] sm:$0xff] }
 0x339   : > { %2240 = vst.msk [vmem:[#allocation2 + $0x129] sm:$0xff] %vm1537_vm1, %v2162_v37  ;;  %2616 = vrot.lane.b32.xlu1 %v2304_v53, %s5690_s10  ;;  %v2303_v24 = vld [vmem:[#allocation2 + $0x109] sm:$0xff] }
 0x33a   : > { %2239 = vst.msk [vmem:[#allocation2 + $0x121] sm:$0xff] %vm1537_vm1, %v2161_v30  ;;  %2614 = vrot.lane.b32.xlu0 %v2303_v24, %s5690_s10  ;;  %v7703_v0 = vld [vmem:[#allocation2 + $0xaa] sm:$0xff]  ;;  %v7711_v30 = vld [vmem:[#allocation2 + $0xc2] sm:$0xff]  ;;  %v7719_v24 = vld [vmem:[#allocation2 + $0xda] sm:$0xff] }
 0x33b   : > { %v7707_v37 = vld [vmem:[#allocation2 + $0xca] sm:$0xff]  ;;  %v7715_v53 = vld [vmem:[#allocation2 + $0xe2] sm:$0xff] }
 0x33d   : > { %v5455_v43 = vpop.f32.mrb[24].mxu0 }
 0x33e   : > { %v2106_v57 = vadd.f32 %v5455_v43, %v7517_v49  ;;  %v2100_v23 = vpop.f32.mrb[25].mxu0  ;;  %v7723_v43 = vld [vmem:[#allocation2 + $0xfa] sm:$0xff] }
 0x33f   : > { %v2101_v54 = vadd.f32 %v7517_v49, %v2100_v23  ;;  %v2336_v23 = vld [vmem:[#allocation2 + $0x112] sm:$0xff] }
 0x340   : > { %v2164_v1 = vmax.f32 %v2106_v57, 0.0  ;;  %v2306_v29 = vld [vmem:[#allocation2 + $0x129] sm:$0xff]  ;;  %v7727_v57 = vld [vmem:[#allocation2 + $0xf2] sm:$0xff] }
 0x341   : > { %v2163_v55 = vmax.f32 %v2101_v54, 0.0  ;;  %2620 = vrot.lane.b32.xlu1 %v2306_v29, %s5690_s10  ;;  %v2305_v56 = vld [vmem:[#allocation2 + $0x121] sm:$0xff]  ;;  %v2335_v54 = vld [vmem:[#allocation2 + $0x10a] sm:$0xff]  ;;  %v7733_v29 = vpop.permute.xlu1 %2572 }
 0x342   : > { %2242 = vst.msk [vmem:[#allocation2 + $0x141] sm:$0xff] %vm1537_vm1, %v2164_v1  ;;  %2618 = vrot.lane.b32.xlu0 %v2305_v56, %s5690_s10  ;;  %v2338_v1 = vld [vmem:[#allocation2 + $0x12a] sm:$0xff]  ;;  %v7736_v56 = vpop.permute.xlu0 %2570 }
 0x343   : > { %2241 = vst.msk [vmem:[#allocation2 + $0x139] sm:$0xff] %vm1537_vm1, %v2163_v55  ;;  %v2337_v55 = vld [vmem:[#allocation2 + $0x122] sm:$0xff] }
 0x349   : > { %v5458_v18 = vpop.f32.mrb[26].mxu0  ;;  %v2308_v22 = vld [vmem:[#allocation2 + $0x141] sm:$0xff] }
 0x34a   : > { %v2116_v48 = vadd.f32 %v5458_v18, %v7517_v49  ;;  %2624 = vrot.lane.b32.xlu1 %v2308_v22, %s5690_s10  ;;  %v2110_v50 = vpop.f32.mrb[27].mxu0  ;;  %v2307_v16 = vld [vmem:[#allocation2 + $0x139] sm:$0xff]  ;;  %v2340_v18 = vld [vmem:[#allocation2 + $0x142] sm:$0xff] }
 0x34b   : > { %v2111_v33 = vadd.f32 %v7517_v49, %v2110_v50  ;;  %2622 = vrot.lane.b32.xlu0 %v2307_v16, %s5690_s10  ;;  %v2339_v22 = vld [vmem:[#allocation2 + $0x13a] sm:$0xff] }
 0x34c   : > { %v2166_v13 = vmax.f32 %v2116_v48, 0.0 }
 0x34d   : > { %v2165_v20 = vmax.f32 %v2111_v33, 0.0 }
 0x34e   : > { %2244 = vst.msk [vmem:[#allocation2 + $0x159] sm:$0xff] %vm1537_vm1, %v2166_v13 }
 0x34f   : > { %2243 = vst.msk [vmem:[#allocation2 + $0x151] sm:$0xff] %vm1537_vm1, %v2165_v20 }
 0x355   : > { %v5461_v34 = vpop.f32.mrb[28].mxu0  ;;  %v2310_v46 = vld [vmem:[#allocation2 + $0x159] sm:$0xff] }
 0x356   : > { %v2126_v36 = vadd.f32 %v5461_v34, %v7517_v49  ;;  %2628 = vrot.lane.b32.xlu1 %v2310_v46, %s5690_s10  ;;  %v2120_v28 = vpop.f32.mrb[29].mxu0  ;;  %v2309_v44 = vld [vmem:[#allocation2 + $0x151] sm:$0xff]  ;;  %v2342_v16 = vld [vmem:[#allocation2 + $0x15a] sm:$0xff] }
 0x357   : > { %v2121_v62 = vadd.f32 %v7517_v49, %v2120_v28  ;;  %2626 = vrot.lane.b32.xlu0 %v2309_v44, %s5690_s10  ;;  %v2341_v33 = vld [vmem:[#allocation2 + $0x152] sm:$0xff]  ;;  %v7755_v28 = vld [vmem:[#allocation2 + $0x20] sm:$0xff] }
 0x358   : > { %v2168_v9 = vmax.f32 %v2126_v36, 0.0 }
 0x359   : > { %v2167_v15 = vmax.f32 %v2121_v62, 0.0  ;;  %v7759_v62 = vld [vmem:[#allocation2 + $0x18] sm:$0xff] }
 0x35a   : > { %2246 = vst.msk [vmem:[#allocation2 + $0x171] sm:$0xff] %vm1537_vm1, %v2168_v9 }
 0x35b   : > { %2245 = vst.msk [vmem:[#allocation2 + $0x169] sm:$0xff] %vm1537_vm1, %v2167_v15  ;;  %v7767_v15 = vld [vmem:[#allocation2 + $0x38] sm:$0xff] }
 0x35c   : > { %v7741_v48 = vpop.permute.xlu1 %2576 }
 0x35d   : > { %v7743_v50 = vpop.permute.xlu0 %2574 }
 0x361   : > { %v5464_v59 = vpop.f32.mrb[30].mxu0  ;;  %v2312_v4 = vld [vmem:[#allocation2 + $0x171] sm:$0xff] }
 0x362   : > { %v2136_v31 = vadd.f32 %v5464_v59, %v7517_v49  ;;  %2632 = vrot.lane.b32.xlu1 %v2312_v4, %s5690_s10  ;;  %v2130_v45 = vpop.f32.mrb[31].mxu0  ;;  %v2311_v51 = vld [vmem:[#allocation2 + $0x169] sm:$0xff]  ;;  %v2344_v34 = vld [vmem:[#allocation2 + $0x172] sm:$0xff] }
 0x363   : > { %v2131_v47 = vadd.f32 %v7517_v49, %v2130_v45  ;;  %2630 = vrot.lane.b32.xlu0 %v2311_v51, %s5690_s10  ;;  %v7655_v49 = vld [vmem:[#allocation2 + $0x1a] sm:$0xff]  ;;  %v2343_v46 = vld [vmem:[#allocation2 + $0x16a] sm:$0xff] }
 0x364   : > { %v2170_v42 = vmax.f32 %v2136_v31, 0.0  ;;  %v7747_v13 = vpop.permute.xlu1 %2580  ;;  %v7771_v4 = vld [vmem:[#allocation2 + $0x30] sm:$0xff] }
 0x365   : > { %v2169_v7 = vmax.f32 %v2131_v47, 0.0  ;;  %v7749_v20 = vpop.permute.xlu0 %2578  ;;  %v7779_v45 = vld [vmem:[#allocation2 + $0x50] sm:$0xff]  ;;  %v7783_v47 = vld [vmem:[#allocation2 + $0x48] sm:$0xff] }
 0x366   : > { %2248 = vst.msk [vmem:[#allocation2 + $0x189] sm:$0xff] %vm1537_vm1, %v2170_v42  ;;  %2700 = vrot.lane.b32.xlu1 %v2314_v32, %s5691_s11  ;;  %v7791_v42 = vld [vmem:[#allocation2 + $0x68] sm:$0xff] }
 0x367   : > { %2247 = vst.msk [vmem:[#allocation2 + $0x181] sm:$0xff] %vm1537_vm1, %v2169_v7  ;;  %2698 = vrot.lane.b32.xlu0 %v2313_v39, %s5691_s11  ;;  %v7795_v7 = vld [vmem:[#allocation2 + $0x60] sm:$0xff] }
 0x36a   : > { %2704 = vrot.lane.b32.xlu1 %v7651_v25, %s5691_s11 }
 0x36b   : > { %2702 = vrot.lane.b32.xlu0 %v7655_v49, %s5691_s11 }
 0x36c   : > { %v7753_v36 = vpop.permute.xlu1 %2584 }
 0x36d   : > { %v7757_v44 = vpop.permute.xlu0 %2582 }
 0x36e   : > { %2708 = vrot.lane.b32.xlu1 %v7659_v10, %s5691_s11 }
 0x36f   : > { %2706 = vrot.lane.b32.xlu0 %v7663_v3, %s5691_s11 }
 0x372   : > { %2712 = vrot.lane.b32.xlu1 %v7667_v21, %s5691_s11 }
 0x373   : > { %2710 = vrot.lane.b32.xlu0 %v7671_v52, %s5691_s11  ;;  %v7765_v9 = vpop.permute.xlu1 %2588 }
 0x374   : > { %v7769_v59 = vpop.permute.xlu0 %2586 }
 0x376   : > { %2716 = vrot.lane.b32.xlu1 %v7675_v35, %s5691_s11 }
 0x377   : > { %2714 = vrot.lane.b32.xlu0 %v7679_v8, %s5691_s11 }
 0x37a   : > { %2720 = vrot.lane.b32.xlu1 %v7683_v40, %s5691_s11 }
 0x37b   : > { %2718 = vrot.lane.b32.xlu0 %v7687_v38, %s5691_s11  ;;  %v7777_v31 = vpop.permute.xlu1 %2592 }
 0x37c   : > { %9511 = vst [vmem:[#allocation71_spill] sm:$0xff] %v7777_v31  ;;  %v7781_v51 = vpop.permute.xlu0 %2590 }
 0x37e   : > { %2724 = vrot.lane.b32.xlu1 %v7691_v26, %s5691_s11 }
 0x37f   : > { %2722 = vrot.lane.b32.xlu0 %v7695_v12, %s5691_s11 }
 0x382   : > { %2728 = vrot.lane.b32.xlu1 %v7699_v19, %s5691_s11 }
 0x383   : > { %2726 = vrot.lane.b32.xlu0 %v7703_v0, %s5691_s11  ;;  %v7789_v32 = vpop.permute.xlu1 %2596 }
 0x384   : > { %9512 = vst [vmem:[#allocation13_spill] sm:$0xff] %v7789_v32  ;;  %v7793_v39 = vpop.permute.xlu0 %2594 }
 0x385   : > { %9513 = vst [vmem:[#allocation70_spill] sm:$0xff] %v7793_v39 }
 0x386   : > { %2732 = vrot.lane.b32.xlu1 %v7707_v37, %s5691_s11 }
 0x387   : > { %2730 = vrot.lane.b32.xlu0 %v7711_v30, %s5691_s11 }
 0x38a   : > { %2736 = vrot.lane.b32.xlu1 %v7715_v53, %s5691_s11 }
 0x38b   : > { %2734 = vrot.lane.b32.xlu0 %v7719_v24, %s5691_s11 }
 0x38e   : > { %2740 = vrot.lane.b32.xlu1 %v7723_v43, %s5691_s11 }
 0x38f   : > { %2738 = vrot.lane.b32.xlu0 %v7727_v57, %s5691_s11 }
 0x392   : > { %2744 = vrot.lane.b32.xlu1 %v2336_v23, %s5691_s11  ;;  %v7801_v23 = vpop.permute.xlu1 %2600 }
 0x393   : > { %2742 = vrot.lane.b32.xlu0 %v2335_v54, %s5691_s11  ;;  %9514 = vst [vmem:[#allocation8_spill] sm:$0xff] %v7801_v23  ;;  %v7803_v54 = vpop.permute.xlu0 %2598 }
 0x394   : > { %9515 = vst [vmem:[#allocation20_spill] sm:$0xff] %v7803_v54  ;;  %v8062_v54 = vld [vmem:[#allocation2 + $0xb0] sm:$0xff] }
 0x395   : > { %9558 = vst [vmem:[#allocation39_spill] sm:$0xff] %v8062_v54 }
 0x396   : > { %2748 = vrot.lane.b32.xlu1 %v2338_v1, %s5691_s11  ;;  %v7805_v1 = vld [vmem:[#allocation2 + $0x78] sm:$0xff] }
 0x397   : > { %2746 = vrot.lane.b32.xlu0 %v2337_v55, %s5691_s11  ;;  %v3818_v55 = vld [vmem:[%s9129_s3] sm:$0xff] }
 0x39a   : > { %2752 = vrot.lane.b32.xlu1 %v2340_v18, %s5691_s11  ;;  %v3819_v18 = vld [vmem:[%s9129_s3 + $0x8] sm:$0xff] }
 0x39b   : > { %2750 = vrot.lane.b32.xlu0 %v2339_v22, %s5691_s11  ;;  %v7817_v22 = vpop.permute.xlu1 %2604 }
 0x39c   : > { %9516 = vst [vmem:[#allocation12_spill] sm:$0xff] %v7817_v22 }
 0x39e   : > { %2756 = vrot.lane.b32.xlu1 %v2342_v16, %s5691_s11  ;;  %v5531_v16 = vpack.c.bf16 %v3819_v18, %v3818_v55 }
 0x39f   : > { %2754 = vrot.lane.b32.xlu0 %v2341_v33, %s5691_s11  ;;  %v7819_v33 = vpop.permute.xlu0 %2602 }
 0x3a0   : > { %9517 = vst [vmem:[#allocation21_spill] sm:$0xff] %v7819_v33  ;;  %5532 = vmatprep.subr.bf16.mxu1 %v5531_v16  ;;  %v7968_v33 = vld [vmem:[#allocation2 + $0x80] sm:$0xff] }
 0x3a1   : > { %5534 = vmatpush3.bf16.msra.mxu1 %v5531_v16  ;;  %9542 = vst [vmem:[#allocation74_spill] sm:$0xff] %v7968_v33 }
 0x3a2   : > { %2760 = vrot.lane.b32.xlu1 %v2344_v34, %s5691_s11  ;;  %v3821_v34 = vld [vmem:[%s9129_s3 + $0x18] sm:$0xff] }
 0x3a3   : > { %2758 = vrot.lane.b32.xlu0 %v2343_v46, %s5691_s11  ;;  %v7831_v46 = vpop.permute.xlu1 %2608  ;;  %v7833_v18 = vpop.permute.xlu0 %2606 }
 0x3a4   : > { %9518 = vst [vmem:[#allocation72_spill] sm:$0xff] %v7831_v46  ;;  %9519 = vst [vmem:[#allocation17_spill] sm:$0xff] %v7833_v18 }
 0x3a6   : > { %2828 = vrot.lane.b32.xlu1 %v7755_v28, %s5692_s12 }
 0x3a7   : > { %2826 = vrot.lane.b32.xlu0 %v7759_v62, %s5692_s12  ;;  %v7845_v16 = vpop.permute.xlu0 %2610 }
 0x3a8   : > { %9521 = vst [vmem:[#allocation19_spill] sm:$0xff] %v7845_v16 }
 0x3aa   : > { %2832 = vrot.lane.b32.xlu1 %v7767_v15, %s5692_s12 }
 0x3ab   : > { %2830 = vrot.lane.b32.xlu0 %v7771_v4, %s5692_s12 }
 0x3ae   : > { %2836 = vrot.lane.b32.xlu1 %v7779_v45, %s5692_s12 }
 0x3af   : > { %2834 = vrot.lane.b32.xlu0 %v7783_v47, %s5692_s12 }
 0x3b2   : > { %2840 = vrot.lane.b32.xlu1 %v7791_v42, %s5692_s12 }
 0x3b3   : > { %2838 = vrot.lane.b32.xlu0 %v7795_v7, %s5692_s12 }
 0x3b6   : > { %2954 = vrot.lane.b32.xlu1 %v7530_v5, %s5693_s13  ;;  %v3820_v5 = vld [vmem:[%s9129_s3 + $0x10] sm:$0xff] }
 0x3b7   : > { %2842 = vrot.lane.b32.xlu0 %v7805_v1, %s5692_s12  ;;  %v5535_v55 = vpack.c.bf16 %v3821_v34, %v3820_v5  ;;  %v7854_v5 = vpop.permute.xlu0 %2614 }
 0x3b8   : > { %9523 = vst [vmem:[#allocation23_spill] sm:$0xff] %v7854_v5 }
 0x3b9   : > { %5536 = vmatprep.subr.bf16.mxu1 %v5535_v55 }
 0x3ba   : > { %3082 = vrot.lane.b32.xlu1 %v7655_v49, %s5694_s14  ;;  %5538 = vmatpush3.bf16.msra.mxu1 %v5535_v55  ;;  %v7842_v49 = vpop.permute.xlu1 %2612 }
 0x3bb   : > { %2956 = vrot.lane.b32.xlu0 %v7525_v61, %s5693_s13  ;;  %v3822_v61 = vld [vmem:[%s9129_s3 + $0x20] sm:$0xf]  ;;  %9520 = vst [vmem:[#allocation16_spill] sm:$0xff] %v7842_v49  ;;  %v7862_v55 = vpop.permute.xlu0 %2618 }
 0x3bc   : > { %5473 = vmatprep.subr.msk.mxu1 %vm1910_vm0, %v3822_v61  ;;  %9525 = vst [vmem:[#allocation27_spill] sm:$0xff] %v7862_v55 }
 0x3be   : > { %3210 = vrot.lane.b32.xlu1 %v7771_v4, %s5695_s15  ;;  %5474 = vmatpush3.msk.msra.mxu1 %vm1910_vm0, %v3822_v61  ;;  %vm4944_vm0 = vcmask 457728  }
 0x3bf   : > { %3084 = vrot.lane.b32.xlu0 %v7651_v25, %s5694_s14  ;;  %v7852_v25 = vpop.permute.xlu1 %2616 }
 0x3c0   : > { %9522 = vst [vmem:[#allocation18_spill] sm:$0xff] %v7852_v25  ;;  %v7870_v25 = vpop.permute.xlu0 %2622 }
 0x3c1   : > { %9527 = vst [vmem:[#allocation7_spill] sm:$0xff] %v7870_v25 }
 0x3c2   : > { %3338 = vrot.lane.b32.xlu1 %v7542_v17, %s5696_s17 }
 0x3c3   : > { %3212 = vrot.lane.b32.xlu0 %v7767_v15, %s5695_s15  ;;  %v7860_v34 = vpop.permute.xlu1 %2620 }
 0x3c4   : > { %9524 = vst [vmem:[#allocation22_spill] sm:$0xff] %v7860_v34 }
 0x3c6   : > { %3340 = vrot.lane.b32.xlu1 %v7537_v2, %s5696_s17 }
 0x3c7   : > { %2958 = vrot.lane.b32.xlu0 %v7542_v17, %s5693_s13  ;;  %v7868_v61 = vpop.permute.xlu1 %2624 }
 0x3c8   : > { %9526 = vst [vmem:[#allocation95_spill] sm:$0xff] %v7868_v61 }
 0x3c9   : > { %v7878_v34 = vpop.permute.xlu0 %2626 }
 0x3ca   : > { %2960 = vrot.lane.b32.xlu1 %v7537_v2, %s5693_s13  ;;  %9529 = vst [vmem:[#allocation57_spill] sm:$0xff] %v7878_v34 }
 0x3cb   : > { %3466 = vrot.lane.b32.xlu0 %v7663_v3, %s5697_s23  ;;  %v7876_v17 = vpop.permute.xlu1 %2628 }
 0x3cc   : > { %9528 = vst [vmem:[#allocation26_spill] sm:$0xff] %v7876_v17 }
 0x3ce   : > { %3468 = vrot.lane.b32.xlu1 %v7659_v10, %s5697_s23 }
 0x3cf   : > { %3086 = vrot.lane.b32.xlu0 %v7663_v3, %s5694_s14 }
 0x3d2   : > { %3214 = vrot.lane.b32.xlu1 %v7783_v47, %s5695_s15 }
 0x3d3   : > { %3088 = vrot.lane.b32.xlu0 %v7659_v10, %s5694_s14 }
 0x3d4   : > { %v7884_v2 = vpop.permute.xlu1 %2632 }
 0x3d5   : > { %9530 = vst [vmem:[#allocation73_spill] sm:$0xff] %v7884_v2  ;;  %v7886_v61 = vpop.permute.xlu0 %2630 }
 0x3d6   : > { %9531 = vst [vmem:[#allocation131_spill] sm:$0xff] %v7886_v61  ;;  %3342 = vrot.lane.b32.xlu1 %v7555_v63, %s5696_s17 }
 0x3d7   : > { %3216 = vrot.lane.b32.xlu0 %v7779_v45, %s5695_s15 }
 0x3d8   : > { %v7892_v3 = vpop.permute.xlu1 %2700 }
 0x3d9   : > { %v7894_v17 = vpop.permute.xlu0 %2698 }
 0x3da   : > { %3344 = vrot.lane.b32.xlu1 %v7550_v27, %s5696_s17 }
 0x3db   : > { %2962 = vrot.lane.b32.xlu0 %v7555_v63, %s5693_s13 }
 0x3dc   : > { %v7900_v10 = vpop.permute.xlu1 %2704 }
 0x3dd   : > { %v7902_v2 = vpop.permute.xlu0 %2702 }
 0x3de   : > { %2964 = vrot.lane.b32.xlu1 %v7550_v27, %s5693_s13 }
 0x3df   : > { %3470 = vrot.lane.b32.xlu0 %v7671_v52, %s5697_s23 }
 0x3e0   : > { %v7908_v61 = vpop.permute.xlu1 %2708 }
 0x3e1   : > { %v7910_v34 = vpop.permute.xlu0 %2706 }
 0x3e2   : > { %3472 = vrot.lane.b32.xlu1 %v7667_v21, %s5697_s23 }
 0x3e3   : > { %3090 = vrot.lane.b32.xlu0 %v7671_v52, %s5694_s14 }
 0x3e4   : > { %v7916_v63 = vpop.permute.xlu1 %2712 }
 0x3e5   : > { %v7918_v25 = vpop.permute.xlu0 %2710 }
 0x3e6   : > { %3218 = vrot.lane.b32.xlu1 %v7795_v7, %s5695_s15 }
 0x3e7   : > { %3092 = vrot.lane.b32.xlu0 %v7667_v21, %s5694_s14 }
 0x3e8   : > { %v7924_v27 = vpop.permute.xlu1 %2716 }
 0x3e9   : > { %v7926_v55 = vpop.permute.xlu0 %2714 }
 0x3ea   : > { %3346 = vrot.lane.b32.xlu1 %v7566_v60, %s5696_s17 }
 0x3eb   : > { %3220 = vrot.lane.b32.xlu0 %v7791_v42, %s5695_s15 }
 0x3ec   : > { %v7932_v52 = vpop.permute.xlu1 %2720 }
 0x3ed   : > { %9532 = vst [vmem:[#allocation94_spill] sm:$0xff] %v7932_v52  ;;  %v7934_v5 = vpop.permute.xlu0 %2718 }
 0x3ee   : > { %9533 = vst [vmem:[#allocation6_spill] sm:$0xff] %v7934_v5  ;;  %3348 = vrot.lane.b32.xlu1 %v7561_v6, %s5696_s17 }
 0x3ef   : > { %2966 = vrot.lane.b32.xlu0 %v7566_v60, %s5693_s13 }
 0x3f0   : > { %v7940_v21 = vpop.permute.xlu1 %2724 }
 0x3f1   : > { %9534 = vst [vmem:[#allocation31_spill] sm:$0xff] %v7940_v21  ;;  %v7942_v49 = vpop.permute.xlu0 %2722 }
 0x3f2   : > { %9535 = vst [vmem:[#allocation56_spill] sm:$0xff] %v7942_v49  ;;  %2968 = vrot.lane.b32.xlu1 %v7561_v6, %s5693_s13  ;;  %v2485_v49 = vld [vmem:[#allocation2 + $0xb1] sm:$0xff] }
 0x3f3   : > { %3474 = vrot.lane.b32.xlu0 %v7679_v8, %s5697_s23 }
 0x3f4   : > { %v7948_v16 = vpop.permute.xlu1 %2728 }
 0x3f5   : > { %9536 = vst [vmem:[#allocation75_spill] sm:$0xff] %v7948_v16  ;;  %v7950_v46 = vpop.permute.xlu0 %2726  ;;  %v8054_v16 = vld [vmem:[#allocation2 + $0xa8] sm:$0xff] }
 0x3f6   : > { %9537 = vst [vmem:[#allocation130_spill] sm:$0xff] %v7950_v46  ;;  %3476 = vrot.lane.b32.xlu1 %v7675_v35, %s5697_s23  ;;  %9557 = vst [vmem:[#allocation14_spill] sm:$0xff] %v8054_v16  ;;  %v2484_v46 = vld [vmem:[#allocation2 + $0xa9] sm:$0xff] }
 0x3f7   : > { %3094 = vrot.lane.b32.xlu0 %v7679_v8, %s5694_s14 }
 0x3f8   : > { %v7956_v60 = vpop.permute.xlu1 %2732 }
 0x3f9   : > { %9538 = vst [vmem:[#allocation97_spill] sm:$0xff] %v7956_v60  ;;  %v7958_v18 = vpop.permute.xlu0 %2730 }
 0x3fa   : > { %9539 = vst [vmem:[#allocation11_spill] sm:$0xff] %v7958_v18  ;;  %3222 = vrot.lane.b32.xlu1 %v7805_v1, %s5695_s15 }
 0x3fb   : > { %3096 = vrot.lane.b32.xlu0 %v7675_v35, %s5694_s14 }
 0x3fc   : > { %v7964_v6 = vpop.permute.xlu1 %2736 }
 0x3fd   : > { %9540 = vst [vmem:[#allocation30_spill] sm:$0xff] %v7964_v6  ;;  %v7966_v22 = vpop.permute.xlu0 %2734 }
 0x3fe   : > { %9541 = vst [vmem:[#allocation61_spill] sm:$0xff] %v7966_v22  ;;  %3350 = vrot.lane.b32.xlu1 %v7578_v14, %s5696_s17 }
 0x3ff   : > { %3224 = vrot.lane.b32.xlu0 %v7968_v33, %s5695_s15 }
 0x400   : > { %v7974_v8 = vpop.permute.xlu1 %2740 }
 0x401   : > { %9543 = vst [vmem:[#allocation133_spill] sm:$0xff] %v7974_v8  ;;  %v7976_v60 = vpop.permute.xlu0 %2738 }
 0x402   : > { %9544 = vst [vmem:[#allocation96_spill] sm:$0xff] %v7976_v60  ;;  %2970 = vrot.lane.b32.xlu1 %v7578_v14, %s5693_s13 }
 0x403   : > { %2844 = vrot.lane.b32.xlu0 %v7968_v33, %s5692_s12 }
 0x404   : > { %v7982_v35 = vpop.permute.xlu1 %2744 }
 0x405   : > { %9545 = vst [vmem:[#allocation10_spill] sm:$0xff] %v7982_v35  ;;  %v7984_v6 = vpop.permute.xlu0 %2742 }
 0x406   : > { %9546 = vst [vmem:[#allocation35_spill] sm:$0xff] %v7984_v6  ;;  %3478 = vrot.lane.b32.xlu1 %v7687_v38, %s5697_s23 }
 0x407   : > { %3352 = vrot.lane.b32.xlu0 %v7573_v41, %s5696_s17 }
 0x408   : > { %v7990_v22 = vpop.permute.xlu1 %2748 }
 0x409   : > { %9547 = vst [vmem:[#allocation60_spill] sm:$0xff] %v7990_v22  ;;  %v7992_v8 = vpop.permute.xlu0 %2746  ;;  %v8008_v22 = vld [vmem:[#allocation2 + $0x90] sm:$0xff] }
 0x40a   : > { %9548 = vst [vmem:[#allocation77_spill] sm:$0xff] %v7992_v8  ;;  %3098 = vrot.lane.b32.xlu1 %v7687_v38, %s5694_s14  ;;  %9552 = vst [vmem:[#allocation34_spill] sm:$0xff] %v8008_v22 }
 0x40b   : > { %2972 = vrot.lane.b32.xlu0 %v7573_v41, %s5693_s13 }
 0x40c   : > { %v7998_v14 = vpop.permute.xlu1 %2752 }
 0x40d   : > { %9549 = vst [vmem:[#allocation132_spill] sm:$0xff] %v7998_v14  ;;  %v8000_v35 = vpop.permute.xlu0 %2750  ;;  %v8020_v14 = vld [vmem:[#allocation2 + $0x98] sm:$0xff] }
 0x40e   : > { %9550 = vst [vmem:[#allocation99_spill] sm:$0xff] %v8000_v35  ;;  %3100 = vrot.lane.b32.xlu1 %v7683_v40, %s5694_s14  ;;  %9556 = vst [vmem:[#allocation98_spill] sm:$0xff] %v8020_v14 }
 0x40f   : > { %3480 = vrot.lane.b32.xlu0 %v7683_v40, %s5697_s23 }
 0x410   : > { %v8006_v6 = vpop.permute.xlu1 %2756 }
 0x411   : > { %9551 = vst [vmem:[#allocation15_spill] sm:$0xff] %v8006_v6  ;;  %v8010_v8 = vpop.permute.xlu0 %2754 }
 0x412   : > { %9553 = vst [vmem:[#allocation65_spill] sm:$0xff] %v8010_v8  ;;  %2846 = vrot.lane.b32.xlu1 %v8008_v22, %s5692_s12 }
 0x413   : > { %3226 = vrot.lane.b32.xlu0 %v8008_v22, %s5695_s15  ;;  %v2250_v22 = vld [vmem:[#allocation2 + $0x8] sm:$0xff] }
 0x414   : > { %v8016_v41 = vpop.permute.xlu1 %2760  ;;  %v3563_v31 = vsel %vm1537_vm1, %v2250_v22, %v7733_v29 }
 0x415   : > { %9554 = vst [vmem:[#allocation76_spill] sm:$0xff] %v8016_v41  ;;  %v8018_v38 = vpop.permute.xlu0 %2758 }
 0x416   : > { %9555 = vst [vmem:[#allocation135_spill] sm:$0xff] %v8018_v38  ;;  %3354 = vrot.lane.b32.xlu1 %v7590_v11, %s5696_s17 }
 0x417   : > { %3228 = vrot.lane.b32.xlu0 %v8020_v14, %s5695_s15 }
 0x418   : > { %v2829_v40 = vpop.permute.xlu1 %2828 }
 0x419   : > { %v2827_v6 = vpop.permute.xlu0 %2826 }
 0x41a   : > { %2974 = vrot.lane.b32.xlu1 %v7590_v11, %s5693_s13 }
 0x41b   : > { %2848 = vrot.lane.b32.xlu0 %v8020_v14, %s5692_s12  ;;  %v2249_v14 = vld [vmem:[#allocation2] sm:$0xff] }
 0x41c   : > { %v8030_v8 = vpop.permute.xlu1 %2832  ;;  %v3562_v39 = vsel %vm1537_vm1, %v2249_v14, %v7736_v56  ;;  %v3595_v56 = vsel %vm1570_vm2, %v3563_v31, %v7892_v3 }
 0x41d   : > { %v8032_v41 = vpop.permute.xlu0 %2830  ;;  %v3594_v52 = vsel %vm1570_vm2, %v3562_v39, %v7894_v17  ;;  %v3627_v39 = vsel %vm1603_vm3, %v3595_v56, %v2829_v40  ;;  %v8108_v40 = vld [vmem:[#allocation2 + $0xc8] sm:$0xff] }
 0x41e   : > { %3482 = vrot.lane.b32.xlu1 %v7695_v12, %s5697_s23  ;;  %v3626_v33 = vsel %vm1603_vm3, %v3594_v52, %v2827_v6 }
 0x41f   : > { %3356 = vrot.lane.b32.xlu0 %v7585_v58, %s5696_s17 }
 0x420   : > { %v8038_v38 = vpop.permute.xlu1 %2836 }
 0x421   : > { %v8040_v35 = vpop.permute.xlu0 %2834 }
 0x422   : > { %3102 = vrot.lane.b32.xlu1 %v7695_v12, %s5694_s14 }
 0x423   : > { %2976 = vrot.lane.b32.xlu0 %v7585_v58, %s5693_s13 }
 0x424   : > { %v8046_v11 = vpop.permute.xlu1 %2840 }
 0x425   : > { %v8048_v60 = vpop.permute.xlu0 %2838 }
 0x426   : > { %3104 = vrot.lane.b32.xlu1 %v7691_v26, %s5694_s14 }
 0x427   : > { %3484 = vrot.lane.b32.xlu0 %v7691_v26, %s5697_s23 }
 0x428   : > { %v2955_v18 = vpop.permute.xlu1 %2954 }
 0x429   : > { %v8056_v23 = vpop.permute.xlu0 %2842  ;;  %v3658_v5 = vsel %vm1636_vm4, %v3626_v33, %v2955_v18 }
 0x42a   : > { %2850 = vrot.lane.b32.xlu1 %v8054_v16, %s5692_s12 }
 0x42b   : > { %3230 = vrot.lane.b32.xlu0 %v8054_v16, %s5695_s15 }
 0x42c   : > { %v3083_v58 = vpop.permute.xlu1 %3082 }
 0x42d   : > { %v2957_v12 = vpop.permute.xlu0 %2956  ;;  %v3690_v14 = vsel %vm1669_vm5, %v3658_v5, %v3083_v58  ;;  %v8100_v5 = vld [vmem:[#allocation2 + $0xc0] sm:$0xff] }
 0x42e   : > { %3358 = vrot.lane.b32.xlu1 %v2484_v46, %s5696_s17  ;;  %v3659_v6 = vsel %vm1636_vm4, %v3627_v39, %v2957_v12 }
 0x42f   : > { %3232 = vrot.lane.b32.xlu0 %v8062_v54, %s5695_s15 }
 0x430   : > { %v3211_v26 = vpop.permute.xlu1 %3210 }
 0x431   : > { %v3085_v21 = vpop.permute.xlu0 %3084  ;;  %v3722_v17 = vsel %vm1702_vm6, %v3690_v14, %v3211_v26  ;;  %v3564_v26 = vsel %vm1537_vm1, %v7759_v62, %v7743_v50  ;;  %v2487_v50 = vld [vmem:[#allocation2 + $0xc9] sm:$0xff] }
 0x432   : > { %2978 = vrot.lane.b32.xlu1 %v2484_v46, %s5693_s13  ;;  %v3691_v33 = vsel %vm1669_vm5, %v3659_v6, %v3085_v21  ;;  %v2486_v21 = vld [vmem:[#allocation2 + $0xc1] sm:$0xff] }
 0x433   : > { %2852 = vrot.lane.b32.xlu0 %v8062_v54, %s5692_s12 }
 0x434   : > { %v3339_v32 = vpop.permute.xlu1 %3338 }
 0x435   : > { %v3213_v16 = vpop.permute.xlu0 %3212  ;;  %v3754_v29 = vsel %vm1735_vm7, %v3722_v17, %v3339_v32  ;;  %v3565_v17 = vsel %vm1537_vm1, %v7755_v28, %v7741_v48 }
 0x436   : > { %3486 = vrot.lane.b32.xlu1 %v7703_v0, %s5697_s23  ;;  %v3723_v31 = vsel %vm1702_vm6, %v3691_v33, %v3213_v16  ;;  %v3597_v62 = vsel %vm1570_vm2, %v3565_v17, %v7900_v10 }
 0x437   : > { %3360 = vrot.lane.b32.xlu0 %v2485_v49, %s5696_s17 }
 0x438   : > { %v3341_v46 = vpop.permute.xlu1 %3340 }
 0x439   : > { %v2959_v54 = vpop.permute.xlu0 %2958  ;;  %v3755_v18 = vsel %vm1735_vm7, %v3723_v31, %v3341_v46  ;;  %v3596_v46 = vsel %vm1570_vm2, %v3564_v26, %v7902_v2 }
 0x43a   : > { %3106 = vrot.lane.b32.xlu1 %v7703_v0, %s5694_s14  ;;  %v3628_v14 = vsel %vm1603_vm3, %v3596_v46, %v8032_v41  ;;  %v3629_v41 = vsel %vm1603_vm3, %v3597_v62, %v8030_v8 }
 0x43b   : > { %2980 = vrot.lane.b32.xlu0 %v2485_v49, %s5693_s13  ;;  %v3660_v6 = vsel %vm1636_vm4, %v3628_v14, %v2959_v54 }
 0x43c   : > { %v2961_v52 = vpop.permute.xlu1 %2960 }
 0x43d   : > { %v3467_v22 = vpop.permute.xlu0 %3466  ;;  %v3661_v48 = vsel %vm1636_vm4, %v3629_v41, %v2961_v52 }
 0x43e   : > { %3108 = vrot.lane.b32.xlu1 %v7699_v19, %s5694_s14  ;;  %v3786_v0 = vsel %vm1768_vm8, %v3754_v29, %v3467_v22 }
 0x43f   : > { %3488 = vrot.lane.b32.xlu0 %v7699_v19, %s5697_s23  ;;  %5475 = vmatprep.mubr.msk.f32.mxu1 %vm1813_vm9, %v3786_v0 }
 0x440   : > { %v3469_v49 = vpop.permute.xlu1 %3468 }
 0x441   : > { %v3787_v32 = vsel %vm1768_vm8, %v3755_v18, %v3469_v49  ;;  %v3087_v3 = vpop.permute.xlu0 %3086  ;;  %v8152_v49 = vld [vmem:[#allocation2 + $0xd8] sm:$0xff] }
 0x442   : > { %2854 = vrot.lane.b32.xlu1 %v8100_v5, %s5692_s12  ;;  %5476 = vmatmul.mubr.msk.f32.vlgmr.msra.gmra.mrb[0].mxu1 %vm1813_vm9, %v3787_v32  ;;  %v3692_v2 = vsel %vm1669_vm5, %v3660_v6, %v3087_v3 }
 0x443   : > { %3234 = vrot.lane.b32.xlu0 %v8100_v5, %s5695_s15 }
 0x444   : > { %v3215_v16 = vpop.permute.xlu1 %3214 }
 0x445   : > { %v3089_v19 = vpop.permute.xlu0 %3088  ;;  %v3724_v29 = vsel %vm1702_vm6, %v3692_v2, %v3215_v16 }
 0x446   : > { %3362 = vrot.lane.b32.xlu1 %v2486_v21, %s5696_s17  ;;  %v3693_v33 = vsel %vm1669_vm5, %v3661_v48, %v3089_v19  ;;  %v2488_v19 = vld [vmem:[#allocation2 + $0xd9] sm:$0xff] }
 0x447   : > { %3236 = vrot.lane.b32.xlu0 %v8108_v40, %s5695_s15 }
 0x448   : > { %v3343_v58 = vpop.permute.xlu1 %3342 }
 0x449   : > { %v3217_v12 = vpop.permute.xlu0 %3216  ;;  %v3756_v28 = vsel %vm1735_vm7, %v3724_v29, %v3343_v58 }
 0x44a   : > { %2982 = vrot.lane.b32.xlu1 %v2486_v21, %s5693_s13  ;;  %v3725_v10 = vsel %vm1702_vm6, %v3693_v33, %v3217_v12  ;;  %v8158_v21 = vld [vmem:[#allocation2 + $0xe0] sm:$0xff] }
 0x44b   : > { %2856 = vrot.lane.b32.xlu0 %v8108_v40, %s5692_s12 }
 0x44c   : > { %v3345_v56 = vpop.permute.xlu1 %3344 }
 0x44d   : > { %v2963_v39 = vpop.permute.xlu0 %2962  ;;  %v3757_v8 = vsel %vm1735_vm7, %v3725_v10, %v3345_v56  ;;  %v3567_v56 = vsel %vm1537_vm1, %v7767_v15, %v7747_v13 }
 0x44e   : > { %3490 = vrot.lane.b32.xlu1 %v7711_v30, %s5697_s23 }
 0x44f   : > { %3364 = vrot.lane.b32.xlu0 %v2487_v50, %s5696_s17 }
 0x450   : > { %v2965_v22 = vpop.permute.xlu1 %2964 }
 0x451   : > { %v3471_v54 = vpop.permute.xlu0 %3470 }
 0x452   : > { %v3788_v0 = vsel %vm1768_vm8, %v3756_v28, %v3471_v54  ;;  %3110 = vrot.lane.b32.xlu1 %v7711_v30, %s5694_s14  ;;  %v8202_v54 = vld [vmem:[#allocation2 + $0xf0] sm:$0xff] }
 0x453   : > { %2984 = vrot.lane.b32.xlu0 %v2487_v50, %s5693_s13  ;;  %5478 = vmatprep.mubr.msk.f32.mxu1 %vm1813_vm9, %v3788_v0  ;;  %v2489_v50 = vld [vmem:[#allocation2 + $0xe1] sm:$0xff] }
 0x454   : > { %v3473_v31 = vpop.permute.xlu1 %3472 }
 0x455   : > { %v3789_v52 = vsel %vm1768_vm8, %v3757_v8, %v3473_v31  ;;  %v3091_v18 = vpop.permute.xlu0 %3090 }
 0x456   : > { %3112 = vrot.lane.b32.xlu1 %v7707_v37, %s5694_s14  ;;  %5479 = vmatmul.mubr.msk.f32.gmra.mrb[2].mxu1 %vm1813_vm9, %v3789_v52  ;;  %v2490_v52 = vld [vmem:[#allocation2 + $0xf1] sm:$0xff] }
 0x457   : > { %3492 = vrot.lane.b32.xlu0 %v7707_v37, %s5697_s23  ;;  %v3566_v37 = vsel %vm1537_vm1, %v7771_v4, %v7749_v20  ;;  %v3599_v20 = vsel %vm1570_vm2, %v3567_v56, %v7908_v61 }
 0x458   : > { %v3219_v30 = vpop.permute.xlu1 %3218  ;;  %v3598_v58 = vsel %vm1570_vm2, %v3566_v37, %v7910_v34  ;;  %v3631_v34 = vsel %vm1603_vm3, %v3599_v20, %v8038_v38 }
 0x459   : > { %v3093_v32 = vpop.permute.xlu0 %3092  ;;  %v3630_v26 = vsel %vm1603_vm3, %v3598_v58, %v8040_v35  ;;  %v3663_v13 = vsel %vm1636_vm4, %v3631_v34, %v2965_v22  ;;  %v8254_v34 = vld [vmem:[#allocation2 + $0x108] sm:$0xff] }
 0x45a   : > { %2858 = vrot.lane.b32.xlu1 %v8152_v49, %s5692_s12  ;;  %v3662_v14 = vsel %vm1636_vm4, %v3630_v26, %v2963_v39  ;;  %v3695_v6 = vsel %vm1669_vm5, %v3663_v13, %v3093_v32  ;;  %v2491_v26 = vld [vmem:[#allocation2 + $0xf9] sm:$0xff] }
 0x45b   : > { %3238 = vrot.lane.b32.xlu0 %v8152_v49, %s5695_s15  ;;  %v3694_v4 = vsel %vm1669_vm5, %v3662_v14, %v3091_v18  ;;  %v8218_v18 = vld [vmem:[#allocation2 + $0xf8] sm:$0xff] }
 0x45c   : > { %v3347_v3 = vpop.permute.xlu1 %3346  ;;  %v3726_v35 = vsel %vm1702_vm6, %v3694_v4, %v3219_v30 }
 0x45d   : > { %v3221_v16 = vpop.permute.xlu0 %3220  ;;  %v3758_v15 = vsel %vm1735_vm7, %v3726_v35, %v3347_v3  ;;  %v3569_v3 = vsel %vm1537_vm1, %v7779_v45, %v7753_v36 }
 0x45e   : > { %3366 = vrot.lane.b32.xlu1 %v2488_v19, %s5696_s17  ;;  %v3727_v62 = vsel %vm1702_vm6, %v3695_v6, %v3221_v16  ;;  %v3601_v16 = vsel %vm1570_vm2, %v3569_v3, %v7916_v63  ;;  %v2492_v6 = vld [vmem:[#allocation2 + $0x109] sm:$0xff] }
 0x45f   : > { %3240 = vrot.lane.b32.xlu0 %v8158_v21, %s5695_s15  ;;  %v3633_v37 = vsel %vm1603_vm3, %v3601_v16, %v8046_v11 }
 0x460   : > { %v3349_v12 = vpop.permute.xlu1 %3348 }
 0x461   : > { %v2967_v46 = vpop.permute.xlu0 %2966  ;;  %v3759_v38 = vsel %vm1735_vm7, %v3727_v62, %v3349_v12 }
 0x462   : > { %2986 = vrot.lane.b32.xlu1 %v2488_v19, %s5693_s13 }
 0x463   : > { %2860 = vrot.lane.b32.xlu0 %v8158_v21, %s5692_s12 }
 0x464   : > { %v2969_v17 = vpop.permute.xlu1 %2968 }
 0x465   : > { %v3475_v39 = vpop.permute.xlu0 %3474  ;;  %v3665_v12 = vsel %vm1636_vm4, %v3633_v37, %v2969_v17  ;;  %v2494_v37 = vld [vmem:[#allocation2 + $0x121] sm:$0xff] }
 0x466   : > { %v3790_v61 = vsel %vm1768_vm8, %v3758_v15, %v3475_v39  ;;  %3494 = vrot.lane.b32.xlu1 %v7719_v24, %s5697_s23 }
 0x467   : > { %3368 = vrot.lane.b32.xlu0 %v2489_v50, %s5696_s17  ;;  %5481 = vmatprep.mubr.msk.f32.mxu1 %vm1813_vm9, %v3790_v61  ;;  %v8270_v61 = vld [vmem:[#allocation2 + $0x110] sm:$0xff] }
 0x468   : > { %v3477_v2 = vpop.permute.xlu1 %3476 }
 0x469   : > { %v3791_v41 = vsel %vm1768_vm8, %v3759_v38, %v3477_v2  ;;  %v3095_v29 = vpop.permute.xlu0 %3094  ;;  %v3571_v38 = vsel %vm1537_vm1, %v7791_v42, %v7765_v9 }
 0x46a   : > { %3114 = vrot.lane.b32.xlu1 %v7719_v24, %s5694_s14  ;;  %5482 = vmatmul.mubr.msk.f32.gmra.mrb[4].mxu1 %vm1813_vm9, %v3791_v41  ;;  %v3568_v24 = vsel %vm1537_vm1, %v7783_v47, %v7757_v44  ;;  %v3603_v2 = vsel %vm1570_vm2, %v3571_v38, %v7924_v27 }
 0x46b   : > { %2988 = vrot.lane.b32.xlu0 %v2489_v50, %s5693_s13  ;;  %v3600_v0 = vsel %vm1570_vm2, %v3568_v24, %v7918_v25 }
 0x46c   : > { %v3223_v22 = vpop.permute.xlu1 %3222 }
 0x46d   : > { %v3097_v48 = vpop.permute.xlu0 %3096 }
 0x46e   : > { %3116 = vrot.lane.b32.xlu1 %v7715_v53, %s5694_s14 }
 0x46f   : > { %3496 = vrot.lane.b32.xlu0 %v7715_v53, %s5697_s23  ;;  %v3632_v53 = vsel %vm1603_vm3, %v3600_v0, %v8048_v60 }
 0x470   : > { %v3351_v28 = vpop.permute.xlu1 %3350  ;;  %v3664_v8 = vsel %vm1636_vm4, %v3632_v53, %v2967_v46  ;;  %v3697_v46 = vsel %vm1669_vm5, %v3665_v12, %v3097_v48  ;;  %v2524_v48 = vld [vmem:[#allocation2 + $0x10a] sm:$0xff] }
 0x471   : > { %v3225_v33 = vpop.permute.xlu0 %3224  ;;  %v3696_v44 = vsel %vm1669_vm5, %v3664_v8, %v3095_v29 }
 0x472   : > { %2862 = vrot.lane.b32.xlu1 %v8202_v54, %s5692_s12  ;;  %v3728_v47 = vsel %vm1702_vm6, %v3696_v44, %v3223_v22  ;;  %v3729_v36 = vsel %vm1702_vm6, %v3697_v46, %v3225_v33  ;;  %v2493_v33 = vld [vmem:[#allocation2 + $0x111] sm:$0xff]  ;;  %v8302_v44 = vld [vmem:[#allocation2 + $0x120] sm:$0xff] }
 0x473   : > { %3242 = vrot.lane.b32.xlu0 %v8202_v54, %s5695_s15  ;;  %v3760_v25 = vsel %vm1735_vm7, %v3728_v47, %v3351_v28 }
 0x474   : > { %v2971_v10 = vpop.permute.xlu1 %2970 }
 0x475   : > { %v8216_v31 = vpop.permute.xlu0 %2844 }
 0x476   : > { %3370 = vrot.lane.b32.xlu1 %v2490_v52, %s5696_s17  ;;  %v3635_v29 = vsel %vm1603_vm3, %v3603_v2, %v8216_v31  ;;  %v2430_v31 = vld [vmem:[#allocation2 + $0x112] sm:$0xff] }
 0x477   : > { %3244 = vrot.lane.b32.xlu0 %v8218_v18, %s5695_s15  ;;  %v2369_v2 = vld [vmem:[#allocation2 + $0x138] sm:$0xff] }
 0x478   : > { %v3479_v60 = vpop.permute.xlu1 %3478 }
 0x479   : > { %v3792_v30 = vsel %vm1768_vm8, %v3760_v25, %v3479_v60  ;;  %v3353_v32 = vpop.permute.xlu0 %3352  ;;  %v3572_v25 = vsel %vm1537_vm1, %v7805_v1, %v7781_v51  ;;  %v9559_v60 = vld [vmem:[#allocation6_spill] sm:$0xff] }
 0x47a   : > { %2990 = vrot.lane.b32.xlu1 %v2490_v52, %s5693_s13  ;;  %5484 = vmatprep.mubr.msk.f32.mxu1 %vm1813_vm9, %v3792_v30  ;;  %v3761_v63 = vsel %vm1735_vm7, %v3729_v36, %v3353_v32  ;;  %v3604_v30 = vsel %vm1570_vm2, %v3572_v25, %v9559_v60  ;;  %v9566_v25 = vld [vmem:[#allocation13_spill] sm:$0xff]  ;;  %v9567_v60 = vld [vmem:[#allocation98_spill] sm:$0xff] }
 0x47b   : > { %2864 = vrot.lane.b32.xlu0 %v8218_v18, %s5692_s12 }
 0x47c   : > { %v3099_v19 = vpop.permute.xlu1 %3098 }
 0x47d   : > { %v2973_v58 = vpop.permute.xlu0 %2972 }
 0x47e   : > { %3498 = vrot.lane.b32.xlu1 %v7727_v57, %s5697_s23  ;;  %v3667_v28 = vsel %vm1636_vm4, %v3635_v29, %v2973_v58  ;;  %v8317_v58 = vld [vmem:[#allocation2 + $0x128] sm:$0xff]  ;;  %v9564_v29 = vld [vmem:[#allocation34_spill] sm:$0xff] }
 0x47f   : > { %3372 = vrot.lane.b32.xlu0 %v2491_v26, %s5696_s17 }
 0x480   : > { %v3101_v45 = vpop.permute.xlu1 %3100 }
 0x481   : > { %v3481_v56 = vpop.permute.xlu0 %3480  ;;  %v3699_v24 = vsel %vm1669_vm5, %v3667_v28, %v3101_v45  ;;  %v9560_v45 = vld [vmem:[#allocation71_spill] sm:$0xff] }
 0x482   : > { %v3793_v14 = vsel %vm1768_vm8, %v3761_v63, %v3481_v56  ;;  %3118 = vrot.lane.b32.xlu1 %v7727_v57, %s5694_s14  ;;  %v3570_v57 = vsel %vm1537_vm1, %v7795_v7, %v7769_v59  ;;  %v9561_v63 = vld [vmem:[#allocation74_spill] sm:$0xff] }
 0x483   : > { %2992 = vrot.lane.b32.xlu0 %v2491_v26, %s5693_s13  ;;  %5485 = vmatmul.mubr.msk.f32.gmra.mrb[6].mxu1 %vm1813_vm9, %v3793_v14  ;;  %v3602_v17 = vsel %vm1570_vm2, %v3570_v57, %v7926_v55  ;;  %v3573_v56 = vsel %vm1537_vm1, %v9561_v63, %v9560_v45  ;;  %v9562_v14 = vld [vmem:[#allocation94_spill] sm:$0xff]  ;;  %v2526_v57 = vld [vmem:[#allocation2 + $0x122] sm:$0xff] }
 0x484   : > { %v2847_v11 = vpop.permute.xlu1 %2846 }
 0x485   : > { %v3227_v20 = vpop.permute.xlu0 %3226  ;;  %v3636_v32 = vsel %vm1603_vm3, %v3604_v30, %v2847_v11  ;;  %v3605_v11 = vsel %vm1570_vm2, %v3573_v56, %v9562_v14  ;;  %v3575_v30 = vsel %vm1537_vm1, %v9567_v60, %v9566_v25 }
 0x486   : > { %3120 = vrot.lane.b32.xlu1 %v7723_v43, %s5694_s14 }
 0x487   : > { %3500 = vrot.lane.b32.xlu0 %v7723_v43, %s5697_s23  ;;  %v3634_v43 = vsel %vm1603_vm3, %v3602_v17, %v8056_v23 }
 0x488   : > { %v3355_v4 = vpop.permute.xlu1 %3354  ;;  %v3666_v15 = vsel %vm1636_vm4, %v3634_v43, %v2971_v10  ;;  %v2495_v43 = vld [vmem:[#allocation2 + $0x129] sm:$0xff] }
 0x489   : > { %v3229_v35 = vpop.permute.xlu0 %3228  ;;  %v3698_v59 = vsel %vm1669_vm5, %v3666_v15, %v3099_v19 }
 0x48a   : > { %2866 = vrot.lane.b32.xlu1 %v8254_v34, %s5692_s12  ;;  %v3730_v7 = vsel %vm1702_vm6, %v3698_v59, %v3227_v20  ;;  %v3731_v9 = vsel %vm1702_vm6, %v3699_v24, %v3229_v35 }
 0x48b   : > { %3246 = vrot.lane.b32.xlu0 %v8254_v34, %s5695_s15  ;;  %v3762_v55 = vsel %vm1735_vm7, %v3730_v7, %v3355_v4 }
 0x48c   : > { %v2975_v13 = vpop.permute.xlu1 %2974 }
 0x48d   : > { %v8268_v39 = vpop.permute.xlu0 %2848  ;;  %v3668_v16 = vsel %vm1636_vm4, %v3636_v32, %v2975_v13  ;;  %v9568_v32 = vld [vmem:[#allocation31_spill] sm:$0xff] }
 0x48e   : > { %3374 = vrot.lane.b32.xlu1 %v2492_v6, %s5696_s17  ;;  %v3637_v4 = vsel %vm1603_vm3, %v3605_v11, %v8268_v39 }
 0x48f   : > { %3248 = vrot.lane.b32.xlu0 %v8270_v61, %s5695_s15 }
 0x490   : > { %v3483_v23 = vpop.permute.xlu1 %3482 }
 0x491   : > { %v3794_v50 = vsel %vm1768_vm8, %v3762_v55, %v3483_v23  ;;  %v3357_v62 = vpop.permute.xlu0 %3356 }
 0x492   : > { %2994 = vrot.lane.b32.xlu1 %v2492_v6, %s5693_s13  ;;  %5487 = vmatprep.mubr.msk.f32.mxu1 %vm1813_vm9, %v3794_v50  ;;  %v3763_v27 = vsel %vm1735_vm7, %v3731_v9, %v3357_v62  ;;  %v2432_v50 = vld [vmem:[#allocation2 + $0x12a] sm:$0xff] }
 0x493   : > { %2868 = vrot.lane.b32.xlu0 %v8270_v61, %s5692_s12 }
 0x494   : > { %v3103_v41 = vpop.permute.xlu1 %3102 }
 0x495   : > { %v2977_v22 = vpop.permute.xlu0 %2976  ;;  %v3700_v51 = vsel %vm1669_vm5, %v3668_v16, %v3103_v41  ;;  %v9563_v41 = vld [vmem:[#allocation70_spill] sm:$0xff] }
 0x496   : > { %3502 = vrot.lane.b32.xlu1 %v2524_v48, %s5697_s23  ;;  %v3669_v17 = vsel %vm1636_vm4, %v3637_v4, %v2977_v22  ;;  %v3574_v22 = vsel %vm1537_vm1, %v9564_v29, %v9563_v41 }
 0x497   : > { %3376 = vrot.lane.b32.xlu0 %v2493_v33, %s5696_s17 }
 0x498   : > { %v3105_v42 = vpop.permute.xlu1 %3104 }
 0x499   : > { %v3485_v0 = vpop.permute.xlu0 %3484  ;;  %v3701_v13 = vsel %vm1669_vm5, %v3669_v17, %v3105_v42  ;;  %v9569_v17 = vld [vmem:[#allocation20_spill] sm:$0xff] }
 0x49a   : > { %v3795_v53 = vsel %vm1768_vm8, %v3763_v27, %v3485_v0  ;;  %3122 = vrot.lane.b32.xlu1 %v2524_v48, %s5694_s14  ;;  %v9565_v48 = vld [vmem:[#allocation56_spill] sm:$0xff] }
 0x49b   : > { %2996 = vrot.lane.b32.xlu0 %v2493_v33, %s5693_s13  ;;  %5488 = vmatmul.mubr.msk.f32.gmra.mrb[8].mxu1 %vm1813_vm9, %v3795_v53  ;;  %v3606_v28 = vsel %vm1570_vm2, %v3574_v22, %v9565_v48  ;;  %v2496_v27 = vld [vmem:[#allocation2 + $0x139] sm:$0xff] }
 0x49c   : > { %v2851_v10 = vpop.permute.xlu1 %2850  ;;  %v2465_v53 = vld [vmem:[#allocation2 + $0x140] sm:$0xff] }
 0x49d   : > { %v3231_v8 = vpop.permute.xlu0 %3230  ;;  %v3638_v33 = vsel %vm1603_vm3, %v3606_v28, %v2851_v10  ;;  %v9572_v48 = vld [vmem:[#allocation8_spill] sm:$0xff]  ;;  %v9573_v28 = vld [vmem:[#allocation39_spill] sm:$0xff] }
 0x49e   : > { %3124 = vrot.lane.b32.xlu1 %v2430_v31, %s5694_s14  ;;  %v3732_v1 = vsel %vm1702_vm6, %v3700_v51, %v3231_v8 }
 0x49f   : > { %3504 = vrot.lane.b32.xlu0 %v2430_v31, %s5697_s23 }
 0x4a0   : > { %v3359_v52 = vpop.permute.xlu1 %3358 }
 0x4a1   : > { %v3233_v47 = vpop.permute.xlu0 %3232  ;;  %v3764_v12 = vsel %vm1735_vm7, %v3732_v1, %v3359_v52  ;;  %v2528_v1 = vld [vmem:[#allocation2 + $0x13a] sm:$0xff] }
 0x4a2   : > { %2870 = vrot.lane.b32.xlu1 %v8302_v44, %s5692_s12  ;;  %v3733_v15 = vsel %vm1702_vm6, %v3701_v13, %v3233_v47 }
 0x4a3   : > { %3250 = vrot.lane.b32.xlu0 %v8302_v44, %s5695_s15 }
 0x4a4   : > { %v2979_v3 = vpop.permute.xlu1 %2978 }
 0x4a5   : > { %v8315_v19 = vpop.permute.xlu0 %2852  ;;  %v3670_v9 = vsel %vm1636_vm4, %v3638_v33, %v2979_v3  ;;  %v3607_v3 = vsel %vm1570_vm2, %v3575_v30, %v9568_v32  ;;  %v3577_v33 = vsel %vm1537_vm1, %v9573_v28, %v9572_v48  ;;  %v2438_v28 = vld [vmem:[#allocation2 + $0x172] sm:$0xff] }
 0x4a6   : > { %3378 = vrot.lane.b32.xlu1 %v2494_v37, %s5696_s17 }
 0x4a7   : > { %3252 = vrot.lane.b32.xlu0 %v8317_v58, %s5695_s15 }
 0x4a8   : > { %v3487_v26 = vpop.permute.xlu1 %3486 }
 0x4a9   : > { %v3796_v46 = vsel %vm1768_vm8, %v3764_v12, %v3487_v26  ;;  %v3361_v36 = vpop.permute.xlu0 %3360  ;;  %v2497_v26 = vld [vmem:[#allocation2 + $0x141] sm:$0xff] }
 0x4aa   : > { %2998 = vrot.lane.b32.xlu1 %v2494_v37, %s5693_s13  ;;  %5490 = vmatprep.mubr.msk.f32.mxu1 %vm1813_vm9, %v3796_v46  ;;  %v3765_v59 = vsel %vm1735_vm7, %v3733_v15, %v3361_v36  ;;  %v3639_v37 = vsel %vm1603_vm3, %v3607_v3, %v8315_v19  ;;  %v9571_v15 = vld [vmem:[#allocation130_spill] sm:$0xff] }
 0x4ab   : > { %2872 = vrot.lane.b32.xlu0 %v8317_v58, %s5692_s12 }
 0x4ac   : > { %v3107_v20 = vpop.permute.xlu1 %3106 }
 0x4ad   : > { %v2981_v35 = vpop.permute.xlu0 %2980  ;;  %v3702_v0 = vsel %vm1669_vm5, %v3670_v9, %v3107_v20  ;;  %v2434_v20 = vld [vmem:[#allocation2 + $0x142] sm:$0xff] }
 0x4ae   : > { %3506 = vrot.lane.b32.xlu1 %v2526_v57, %s5697_s23  ;;  %v3671_v12 = vsel %vm1636_vm4, %v3639_v37, %v2981_v35 }
 0x4af   : > { %3380 = vrot.lane.b32.xlu0 %v2495_v43, %s5696_s17 }
 0x4b0   : > { %v3109_v6 = vpop.permute.xlu1 %3108 }
 0x4b1   : > { %v3489_v7 = vpop.permute.xlu0 %3488  ;;  %v3703_v46 = vsel %vm1669_vm5, %v3671_v12, %v3109_v6  ;;  %v9575_v12 = vld [vmem:[#allocation21_spill] sm:$0xff] }
 0x4b2   : > { %v3797_v55 = vsel %vm1768_vm8, %v3765_v59, %v3489_v7  ;;  %3126 = vrot.lane.b32.xlu1 %v2526_v57, %s5694_s14  ;;  %v2371_v57 = vld [vmem:[#allocation2 + $0x150] sm:$0xff] }
 0x4b3   : > { %3000 = vrot.lane.b32.xlu0 %v2495_v43, %s5693_s13  ;;  %5491 = vmatmul.mubr.msk.f32.gmra.mrb[10].mxu1 %vm1813_vm9, %v3797_v55  ;;  %v9570_v43 = vld [vmem:[#allocation14_spill] sm:$0xff] }
 0x4b4   : > { %v2855_v39 = vpop.permute.xlu1 %2854  ;;  %v3576_v13 = vsel %vm1537_vm1, %v9570_v43, %v9569_v17  ;;  %v9577_v43 = vld [vmem:[#allocation12_spill] sm:$0xff] }
 0x4b5   : > { %v3235_v23 = vpop.permute.xlu0 %3234  ;;  %v3608_v6 = vsel %vm1570_vm2, %v3576_v13, %v9571_v15  ;;  %v3579_v13 = vsel %vm1537_vm1, %v8108_v40, %v9577_v43  ;;  %v9578_v15 = vld [vmem:[#allocation97_spill] sm:$0xff] }
 0x4b6   : > { %3128 = vrot.lane.b32.xlu1 %v2432_v50, %s5694_s14  ;;  %v3734_v8 = vsel %vm1702_vm6, %v3702_v0, %v3235_v23  ;;  %v3640_v59 = vsel %vm1603_vm3, %v3608_v6, %v2855_v39  ;;  %v3611_v6 = vsel %vm1570_vm2, %v3579_v13, %v9578_v15  ;;  %v2473_v13 = vld [vmem:[#allocation2 + $0x1a0] sm:$0xff] }
 0x4b7   : > { %3508 = vrot.lane.b32.xlu0 %v2432_v50, %s5697_s23  ;;  %v2498_v50 = vld [vmem:[#allocation2 + $0x151] sm:$0xff] }
 0x4b8   : > { %v3363_v62 = vpop.permute.xlu1 %3362 }
 0x4b9   : > { %v3237_v38 = vpop.permute.xlu0 %3236  ;;  %v3766_v31 = vsel %vm1735_vm7, %v3734_v8, %v3363_v62  ;;  %v2530_v8 = vld [vmem:[#allocation2 + $0x152] sm:$0xff] }
 0x4ba   : > { %2874 = vrot.lane.b32.xlu1 %v2369_v2, %s5692_s12  ;;  %v3735_v36 = vsel %vm1702_vm6, %v3703_v46, %v3237_v38  ;;  %v2467_v38 = vld [vmem:[#allocation2 + $0x158] sm:$0xff] }
 0x4bb   : > { %3254 = vrot.lane.b32.xlu0 %v2369_v2, %s5695_s15  ;;  %v9576_v46 = vld [vmem:[#allocation11_spill] sm:$0xff] }
 0x4bc   : > { %v2983_v24 = vpop.permute.xlu1 %2982 }
 0x4bd   : > { %v8358_v42 = vpop.permute.xlu0 %2856  ;;  %v3672_v55 = vsel %vm1636_vm4, %v3640_v59, %v2983_v24  ;;  %v9574_v24 = vld [vmem:[#allocation75_spill] sm:$0xff] }
 0x4be   : > { %3382 = vrot.lane.b32.xlu1 %v2496_v27, %s5696_s17  ;;  %v3609_v9 = vsel %vm1570_vm2, %v3577_v33, %v9574_v24 }
 0x4bf   : > { %3256 = vrot.lane.b32.xlu0 %v2465_v53, %s5695_s15  ;;  %v3641_v0 = vsel %vm1603_vm3, %v3609_v9, %v8358_v42  ;;  %v2375_v9 = vld [vmem:[#allocation2 + $0x180] sm:$0xff] }
 0x4c0   : > { %v3491_v52 = vpop.permute.xlu1 %3490 }
 0x4c1   : > { %v3798_v10 = vsel %vm1768_vm8, %v3766_v31, %v3491_v52  ;;  %v3365_v47 = vpop.permute.xlu0 %3364  ;;  %v2499_v52 = vld [vmem:[#allocation2 + $0x159] sm:$0xff] }
 0x4c2   : > { %3002 = vrot.lane.b32.xlu1 %v2496_v27, %s5693_s13  ;;  %5493 = vmatprep.mubr.msk.f32.mxu1 %vm1813_vm9, %v3798_v10  ;;  %v3767_v63 = vsel %vm1735_vm7, %v3735_v36, %v3365_v47 }
 0x4c3   : > { %2876 = vrot.lane.b32.xlu0 %v2465_v53, %s5692_s12 }
 0x4c4   : > { %v3111_v16 = vpop.permute.xlu1 %3110 }
 0x4c5   : > { %v2985_v51 = vpop.permute.xlu0 %2984  ;;  %v3704_v62 = vsel %vm1669_vm5, %v3672_v55, %v3111_v16  ;;  %v2436_v16 = vld [vmem:[#allocation2 + $0x15a] sm:$0xff] }
 0x4c6   : > { %3510 = vrot.lane.b32.xlu1 %v2528_v1, %s5697_s23  ;;  %v3673_v31 = vsel %vm1636_vm4, %v3641_v0, %v2985_v51 }
 0x4c7   : > { %3384 = vrot.lane.b32.xlu0 %v2497_v26, %s5696_s17 }
 0x4c8   : > { %v3113_v45 = vpop.permute.xlu1 %3112 }
 0x4c9   : > { %v3493_v56 = vpop.permute.xlu0 %3492  ;;  %v3705_v10 = vsel %vm1669_vm5, %v3673_v31, %v3113_v45 }
 0x4ca   : > { %v3799_v14 = vsel %vm1768_vm8, %v3767_v63, %v3493_v56  ;;  %3130 = vrot.lane.b32.xlu1 %v2528_v1, %s5694_s14  ;;  %v2373_v1 = vld [vmem:[#allocation2 + $0x168] sm:$0xff] }
 0x4cb   : > { %3004 = vrot.lane.b32.xlu0 %v2497_v26, %s5693_s13  ;;  %5494 = vmatmul.mubr.msk.f32.gmra.mrb[12].mxu1 %vm1813_vm9, %v3799_v14  ;;  %v3578_v26 = vsel %vm1537_vm1, %v8100_v5, %v9575_v12  ;;  %v2469_v5 = vld [vmem:[#allocation2 + $0x170] sm:$0xff] }
 0x4cc   : > { %v2859_v19 = vpop.permute.xlu1 %2858  ;;  %v3610_v36 = vsel %vm1570_vm2, %v3578_v26, %v9576_v46 }
 0x4cd   : > { %v3239_v11 = vpop.permute.xlu0 %3238  ;;  %v3642_v45 = vsel %vm1603_vm3, %v3610_v36, %v2859_v19 }
 0x4ce   : > { %3132 = vrot.lane.b32.xlu1 %v2434_v20, %s5694_s14  ;;  %v3736_v2 = vsel %vm1702_vm6, %v3704_v62, %v3239_v11  ;;  %v2500_v11 = vld [vmem:[#allocation2 + $0x169] sm:$0xff] }
 0x4cf   : > { %3512 = vrot.lane.b32.xlu0 %v2434_v20, %s5697_s23 }
 0x4d0   : > { %v3367_v4 = vpop.permute.xlu1 %3366 }
 0x4d1   : > { %v3241_v35 = vpop.permute.xlu0 %3240  ;;  %v3768_v41 = vsel %vm1735_vm7, %v3736_v2, %v3367_v4 }
 0x4d2   : > { %2878 = vrot.lane.b32.xlu1 %v2371_v57, %s5692_s12  ;;  %v3737_v47 = vsel %vm1702_vm6, %v3705_v10, %v3241_v35 }
 0x4d3   : > { %3258 = vrot.lane.b32.xlu0 %v2371_v57, %s5695_s15 }
 0x4d4   : > { %v2987_v7 = vpop.permute.xlu1 %2986 }
 0x4d5   : > { %v8397_v23 = vpop.permute.xlu0 %2860  ;;  %v3674_v56 = vsel %vm1636_vm4, %v3642_v45, %v2987_v7  ;;  %v2534_v45 = vld [vmem:[#allocation2 + $0x182] sm:$0xff] }
 0x4d6   : > { %3386 = vrot.lane.b32.xlu1 %v2498_v50, %s5696_s17  ;;  %v3643_v7 = vsel %vm1603_vm3, %v3611_v6, %v8397_v23  ;;  %v2472_v6 = vld [vmem:[#allocation2 + $0x198] sm:$0xff] }
 0x4d7   : > { %3260 = vrot.lane.b32.xlu0 %v2467_v38, %s5695_s15 }
 0x4d8   : > { %v3495_v29 = vpop.permute.xlu1 %3494 }
 0x4d9   : > { %v3800_v39 = vsel %vm1768_vm8, %v3768_v41, %v3495_v29  ;;  %v3369_v22 = vpop.permute.xlu0 %3368 }
 0x4da   : > { %3006 = vrot.lane.b32.xlu1 %v2498_v50, %s5693_s13  ;;  %5496 = vmatprep.mubr.msk.f32.mxu1 %vm1813_vm9, %v3800_v39  ;;  %v3769_v60 = vsel %vm1735_vm7, %v3737_v47, %v3369_v22  ;;  %v2532_v50 = vld [vmem:[#allocation2 + $0x16a] sm:$0xff] }
 0x4db   : > { %2880 = vrot.lane.b32.xlu0 %v2467_v38, %s5692_s12  ;;  %v2501_v38 = vld [vmem:[#allocation2 + $0x171] sm:$0xff] }
 0x4dc   : > { %v3115_v27 = vpop.permute.xlu1 %3114 }
 0x4dd   : > { %v2989_v53 = vpop.permute.xlu0 %2988  ;;  %v3706_v20 = vsel %vm1669_vm5, %v3674_v56, %v3115_v27  ;;  %v9579_v27 = vld [vmem:[#allocation17_spill] sm:$0xff] }
 0x4de   : > { %3514 = vrot.lane.b32.xlu1 %v2530_v8, %s5697_s23  ;;  %v3675_v62 = vsel %vm1636_vm4, %v3643_v7, %v2989_v53  ;;  %v3580_v0 = vsel %vm1537_vm1, %v8152_v49, %v9579_v27  ;;  %v9580_v53 = vld [vmem:[#allocation61_spill] sm:$0xff]  ;;  %v9583_v7 = vld [vmem:[#allocation19_spill] sm:$0xff]  ;;  %v9585_v27 = vld [vmem:[#allocation16_spill] sm:$0xff] }
 0x4df   : > { %3388 = vrot.lane.b32.xlu0 %v2499_v52, %s5696_s17  ;;  %v2471_v49 = vld [vmem:[#allocation2 + $0x188] sm:$0xff] }
 0x4e0   : > { %v3117_v25 = vpop.permute.xlu1 %3116  ;;  %v2503_v56 = vld [vmem:[#allocation2 + $0x189] sm:$0xff] }
 0x4e1   : > { %v3497_v30 = vpop.permute.xlu0 %3496  ;;  %v3707_v2 = vsel %vm1669_vm5, %v3675_v62, %v3117_v25  ;;  %v2502_v25 = vld [vmem:[#allocation2 + $0x181] sm:$0xff] }
 0x4e2   : > { %v3801_v32 = vsel %vm1768_vm8, %v3769_v60, %v3497_v30  ;;  %3134 = vrot.lane.b32.xlu1 %v2530_v8, %s5694_s14  ;;  %v3612_v8 = vsel %vm1570_vm2, %v3580_v0, %v9580_v53  ;;  %v3583_v0 = vsel %vm1537_vm1, %v8218_v18, %v9585_v27  ;;  %v9586_v53 = vld [vmem:[#allocation133_spill] sm:$0xff] }
 0x4e3   : > { %3008 = vrot.lane.b32.xlu0 %v2499_v52, %s5693_s13  ;;  %5497 = vmatmul.mubr.msk.f32.gmra.mrb[14].mxu1 %vm1813_vm9, %v3801_v32 }
 0x4e4   : > { %v2863_v42 = vpop.permute.xlu1 %2862 }
 0x4e5   : > { %v3243_v3 = vpop.permute.xlu0 %3242  ;;  %v3644_v31 = vsel %vm1603_vm3, %v3612_v8, %v2863_v42  ;;  %v3615_v8 = vsel %vm1570_vm2, %v3583_v0, %v9586_v53 }
 0x4e6   : > { %3136 = vrot.lane.b32.xlu1 %v2436_v16, %s5694_s14  ;;  %v3738_v4 = vsel %vm1702_vm6, %v3706_v20, %v3243_v3 }
 0x4e7   : > { %3516 = vrot.lane.b32.xlu0 %v2436_v16, %s5697_s23 }
 0x4e8   : > { %v3371_v37 = vpop.permute.xlu1 %3370 }
 0x4e9   : > { %v3245_v51 = vpop.permute.xlu0 %3244  ;;  %v3770_v35 = vsel %vm1735_vm7, %v3738_v4, %v3371_v37  ;;  %v9581_v37 = vld [vmem:[#allocation72_spill] sm:$0xff] }
 0x4ea   : > { %2882 = vrot.lane.b32.xlu1 %v2373_v1, %s5692_s12  ;;  %v3739_v40 = vsel %vm1702_vm6, %v3707_v2, %v3245_v51  ;;  %v3581_v51 = vsel %vm1537_vm1, %v8158_v21, %v9581_v37 }
 0x4eb   : > { %3262 = vrot.lane.b32.xlu0 %v2373_v1, %s5695_s15  ;;  %v9582_v1 = vld [vmem:[#allocation30_spill] sm:$0xff] }
 0x4ec   : > { %v2991_v63 = vpop.permute.xlu1 %2990  ;;  %v3613_v12 = vsel %vm1570_vm2, %v3581_v51, %v9582_v1 }
 0x4ed   : > { %v8436_v14 = vpop.permute.xlu0 %2864  ;;  %v3676_v10 = vsel %vm1636_vm4, %v3644_v31, %v2991_v63 }
 0x4ee   : > { %3390 = vrot.lane.b32.xlu1 %v2500_v11, %s5696_s17  ;;  %v3645_v46 = vsel %vm1603_vm3, %v3613_v12, %v8436_v14  ;;  %v9587_v12 = vld [vmem:[#allocation23_spill] sm:$0xff] }
 0x4ef   : > { %3264 = vrot.lane.b32.xlu0 %v2469_v5, %s5695_s15 }
 0x4f0   : > { %v3499_v57 = vpop.permute.xlu1 %3498 }
 0x4f1   : > { %v3802_v19 = vsel %vm1768_vm8, %v3770_v35, %v3499_v57  ;;  %v3373_v17 = vpop.permute.xlu0 %3372 }
 0x4f2   : > { %3010 = vrot.lane.b32.xlu1 %v2500_v11, %s5693_s13  ;;  %5499 = vmatprep.mubr.msk.f32.mxu1 %vm1813_vm9, %v3802_v19  ;;  %v3771_v29 = vsel %vm1735_vm7, %v3739_v40, %v3373_v17  ;;  %v2440_v17 = vld [vmem:[#allocation2 + $0x18a] sm:$0xff] }
 0x4f3   : > { %2884 = vrot.lane.b32.xlu0 %v2469_v5, %s5692_s12 }
 0x4f4   : > { %v3119_v59 = vpop.permute.xlu1 %3118 }
 0x4f5   : > { %v2993_v55 = vpop.permute.xlu0 %2992  ;;  %v3708_v60 = vsel %vm1669_vm5, %v3676_v10, %v3119_v59 }
 0x4f6   : > { %3518 = vrot.lane.b32.xlu1 %v2532_v50, %s5697_s23  ;;  %v3677_v63 = vsel %vm1636_vm4, %v3645_v46, %v2993_v55  ;;  %v3582_v55 = vsel %vm1537_vm1, %v8202_v54, %v9583_v7  ;;  %v9588_v46 = vld [vmem:[#allocation35_spill] sm:$0xff] }
 0x4f7   : > { %3392 = vrot.lane.b32.xlu0 %v2501_v38, %s5696_s17 }
 0x4f8   : > { %v3121_v41 = vpop.permute.xlu1 %3120 }
 0x4f9   : > { %v3501_v39 = vpop.permute.xlu0 %3500  ;;  %v3709_v11 = vsel %vm1669_vm5, %v3677_v63, %v3121_v41  ;;  %v2504_v41 = vld [vmem:[#allocation2 + $0x199] sm:$0xff] }
 0x4fa   : > { %v3803_v22 = vsel %vm1768_vm8, %v3771_v29, %v3501_v39  ;;  %3138 = vrot.lane.b32.xlu1 %v2532_v50, %s5694_s14  ;;  %v9584_v50 = vld [vmem:[#allocation96_spill] sm:$0xff] }
 0x4fb   : > { %3012 = vrot.lane.b32.xlu0 %v2501_v38, %s5693_s13  ;;  %5500 = vmatmul.mubr.msk.f32.gmra.mrb[16].mxu1 %vm1813_vm9, %v3803_v22  ;;  %v3614_v62 = vsel %vm1570_vm2, %v3582_v55, %v9584_v50  ;;  %v2505_v38 = vld [vmem:[#allocation2 + $0x1a1] sm:$0xff]  ;;  %v5295_v55 = vld [vmem:[%s5793_s9 + $0x19] sm:$0xff] }
 0x4fc   : > { %v8464_v23 = vpop.permute.xlu1 %2866 }
 0x4fd   : > { %v3247_v48 = vpop.permute.xlu0 %3246  ;;  %v3646_v2 = vsel %vm1603_vm3, %v3614_v62, %v8464_v23 }
 0x4fe   : > { %3140 = vrot.lane.b32.xlu1 %v2438_v28, %s5694_s14  ;;  %v3740_v30 = vsel %vm1702_vm6, %v3708_v60, %v3247_v48  ;;  %v2537_v48 = vld [vmem:[#allocation2 + $0x1a2] sm:$0xff] }
 0x4ff   : > { %3520 = vrot.lane.b32.xlu0 %v2438_v28, %s5697_s23 }
 0x500   : > { %v3375_v33 = vpop.permute.xlu1 %3374 }
 0x501   : > { %v3249_v24 = vpop.permute.xlu0 %3248  ;;  %v3772_v32 = vsel %vm1735_vm7, %v3740_v30, %v3375_v33 }
 0x502   : > { %2886 = vrot.lane.b32.xlu1 %v2375_v9, %s5692_s12  ;;  %v3741_v21 = vsel %vm1702_vm6, %v3709_v11, %v3249_v24  ;;  %v2536_v24 = vld [vmem:[#allocation2 + $0x19a] sm:$0xff] }
 0x503   : > { %3266 = vrot.lane.b32.xlu0 %v2375_v9, %s5695_s15 }
 0x504   : > { %v2995_v52 = vpop.permute.xlu1 %2994 }
 0x505   : > { %v8477_v47 = vpop.permute.xlu0 %2868  ;;  %v3678_v29 = vsel %vm1636_vm4, %v3646_v2, %v2995_v52  ;;  %v5300_v2 = vld [vmem:[%s5793_s9 + $0x51] sm:$0xff] }
 0x506   : > { %3394 = vrot.lane.b32.xlu1 %v2502_v25, %s5696_s17  ;;  %v3647_v52 = vsel %vm1603_vm3, %v3615_v8, %v8477_v47 }
 0x507   : > { %3268 = vrot.lane.b32.xlu0 %v2471_v49, %s5695_s15 }
 0x508   : > { %v3503_v3 = vpop.permute.xlu1 %3502 }
 0x509   : > { %v3804_v42 = vsel %vm1768_vm8, %v3772_v32, %v3503_v3  ;;  %v3377_v16 = vpop.permute.xlu0 %3376 }
 0x50a   : > { %3014 = vrot.lane.b32.xlu1 %v2502_v25, %s5693_s13  ;;  %5502 = vmatprep.mubr.msk.f32.mxu1 %vm1813_vm9, %v3804_v42  ;;  %v3773_v5 = vsel %vm1735_vm7, %v3741_v21, %v3377_v16 }
 0x50b   : > { %2888 = vrot.lane.b32.xlu0 %v2471_v49, %s5692_s12 }
 0x50c   : > { %v3123_v26 = vpop.permute.xlu1 %3122 }
 0x50d   : > { %v2997_v36 = vpop.permute.xlu0 %2996  ;;  %v3710_v22 = vsel %vm1669_vm5, %v3678_v29, %v3123_v26  ;;  %v3584_v26 = vsel %vm1537_vm1, %v8254_v34, %v9587_v12 }
 0x50e   : > { %3522 = vrot.lane.b32.xlu1 %v2534_v45, %s5697_s23  ;;  %v3679_v25 = vsel %vm1636_vm4, %v3647_v52, %v2997_v36  ;;  %v3616_v36 = vsel %vm1570_vm2, %v3584_v26, %v9588_v46 }
 0x50f   : > { %3396 = vrot.lane.b32.xlu0 %v2503_v56, %s5696_s17 }
 0x510   : > { %v3125_v20 = vpop.permute.xlu1 %3124 }
 0x511   : > { %v3505_v4 = vpop.permute.xlu0 %3504  ;;  %v3711_v60 = vsel %vm1669_vm5, %v3679_v25, %v3125_v20  ;;  %v8560_v20 = vld [vmem:[%s9130_s4] ss:$0 sm:$0xff] }
 0x512   : > { %v3805_v35 = vsel %vm1768_vm8, %v3773_v5, %v3505_v4  ;;  %3142 = vrot.lane.b32.xlu1 %v2534_v45, %s5694_s14 }
 0x513   : > { %3016 = vrot.lane.b32.xlu0 %v2503_v56, %s5693_s13  ;;  %5503 = vmatmul.mubr.msk.f32.gmra.mrb[18].mxu1 %vm1813_vm9, %v3805_v35 }
 0x514   : > { %v2871_v14 = vpop.permute.xlu1 %2870 }
 0x515   : > { %v8505_v57 = vpop.f32.mrb[0].mxu1  ;;  %v3251_v19 = vpop.permute.xlu0 %3250  ;;  %v3648_v45 = vsel %vm1603_vm3, %v3616_v36, %v2871_v14 }
 0x516   : > { %3144 = vrot.lane.b32.xlu1 %v2440_v17, %s5694_s14  ;;  %v8508_v43 = vpop.f32.mrb[1].mxu1  ;;  %v3742_v54 = vsel %vm1702_vm6, %v3710_v22, %v3251_v19  ;;  %v4001_v19 = vadd.f32 %v8505_v57, %v8560_v20  ;;  %v5299_v22 = vld [vmem:[%s5793_s9 + $0x49] sm:$0xff] }
 0x517   : > { %3524 = vrot.lane.b32.xlu0 %v2440_v17, %s5697_s23  ;;  %v9589_v17 = vld [vmem:[#allocation18_spill] sm:$0xff] }
 0x518   : > { %v3379_v15 = vpop.permute.xlu1 %3378 }
 0x519   : > { %v3253_v59 = vpop.permute.xlu0 %3252  ;;  %v3774_v28 = vsel %vm1735_vm7, %v3742_v54, %v3379_v15  ;;  %v5296_v15 = vld [vmem:[%s5793_s9 + $0x21] sm:$0xff] }
 0x51a   : > { %3272 = vrot.lane.b32.xlu1 %v2473_v13, %s5695_s15  ;;  %v3743_v49 = vsel %vm1702_vm6, %v3711_v60, %v3253_v59  ;;  %v3585_v13 = vsel %vm1537_vm1, %v8270_v61, %v9589_v17  ;;  %v9590_v59 = vld [vmem:[#allocation10_spill] sm:$0xff]  ;;  %v9594_v17 = vld [vmem:[#allocation60_spill] sm:$0xff] }
 0x51b   : > { %3270 = vrot.lane.b32.xlu0 %v2472_v6, %s5695_s15  ;;  %v3996_v6 = vadd.f32 %v8560_v20, %v8508_v43  ;;  %v3617_v7 = vsel %vm1570_vm2, %v3585_v13, %v9590_v59 }
 0x51c   : > { %v2999_v40 = vpop.permute.xlu1 %2998 }
 0x51d   : > { %v2873_v39 = vpop.permute.xlu0 %2872  ;;  %v3680_v56 = vsel %vm1636_vm4, %v3648_v45, %v2999_v40  ;;  %v4187_v40 = vadd.f32 %v5296_v15, %v4001_v19  ;;  %v4186_v54 = vadd.f32 %v5295_v55, %v3996_v6  ;;  %v5298_v15 = vld [vmem:[%s5793_s9 + $0x39] sm:$0xff] }
 0x51e   : > { %3400 = vrot.lane.b32.xlu1 %v2505_v38, %s5696_s17  ;;  %v3649_v62 = vsel %vm1603_vm3, %v3617_v7, %v2873_v39  ;;  %v5297_v7 = vld [vmem:[%s5793_s9 + $0x31] sm:$0xff] }
 0x51f   : > { %3398 = vrot.lane.b32.xlu0 %v2504_v41, %s5696_s17  ;;  %v4219_v27 = vmax.f32 %v4187_v40, 0.0  ;;  %v4218_v8 = vmax.f32 %v4186_v54, 0.0 }
 0x520   : > { %v3507_v33 = vpop.permute.xlu1 %3506 }
 0x521   : > { %v3806_v23 = vsel %vm1768_vm8, %v3774_v28, %v3507_v33  ;;  %v3381_v9 = vpop.permute.xlu0 %3380 }
 0x522   : > { %3528 = vrot.lane.b32.xlu1 %v2537_v48, %s5697_s23  ;;  %5505 = vmatprep.mubr.msk.f32.mxu1 %vm1813_vm9, %v3806_v23  ;;  %v3775_v32 = vsel %vm1735_vm7, %v3743_v49, %v3381_v9 }
 0x523   : > { %3526 = vrot.lane.b32.xlu0 %v2536_v24, %s5697_s23 }
 0x524   : > { %v3127_v31 = vpop.permute.xlu1 %3126 }
 0x525   : > { %v3001_v10 = vpop.permute.xlu0 %3000  ;;  %v3712_v21 = vsel %vm1669_vm5, %v3680_v56, %v3127_v31 }
 0x526   : > { %v3681_v41 = vsel %vm1636_vm4, %v3649_v62, %v3001_v10 }
 0x528   : > { %v3129_v30 = vpop.permute.xlu1 %3128 }
 0x529   : > { %v3509_v18 = vpop.permute.xlu0 %3508  ;;  %v8541_v3 = vpop.f32.mrb[2].mxu1  ;;  %v3713_v43 = vsel %vm1669_vm5, %v3681_v41, %v3129_v30 }
 0x52a   : > { %v3807_v42 = vsel %vm1768_vm8, %v3775_v32, %v3509_v18  ;;  %v8544_v16 = vpop.f32.mrb[3].mxu1 }
 0x52b   : > { %5506 = vmatmul.mubr.msk.f32.gmra.mrb[20].mxu1 %vm1813_vm9, %v3807_v42  ;;  %v9591_v42 = vld [vmem:[#allocation27_spill] sm:$0xff]  ;;  %v4006_v6 = vadd.f32 %v8560_v20, %v8544_v16 }
 0x52c   : > { %v2875_v47 = vpop.permute.xlu1 %2874 }
 0x52d   : > { %v3255_v37 = vpop.permute.xlu0 %3254 }
 0x52e   : > { %v3744_v34 = vsel %vm1702_vm6, %v3712_v21, %v3255_v37  ;;  %v3586_v37 = vsel %vm1537_vm1, %v8302_v44, %v9591_v42 }
 0x530   : > { %v3383_v51 = vpop.permute.xlu1 %3382 }
 0x531   : > { %v3257_v1 = vpop.permute.xlu0 %3256  ;;  %v3776_v5 = vsel %vm1735_vm7, %v3744_v34, %v3383_v51  ;;  %v9592_v51 = vld [vmem:[#allocation77_spill] sm:$0xff] }
 0x532   : > { %v3745_v28 = vsel %vm1702_vm6, %v3713_v43, %v3257_v1  ;;  %v3618_v1 = vsel %vm1570_vm2, %v3586_v37, %v9592_v51 }
 0x533   : > { %v3650_v12 = vsel %vm1603_vm3, %v3618_v1, %v2875_v47  ;;  %v9593_v47 = vld [vmem:[#allocation22_spill] sm:$0xff] }
 0x534   : > { %v3003_v63 = vpop.permute.xlu1 %3002 }
 0x535   : > { %v8554_v11 = vpop.permute.xlu0 %2876  ;;  %v3682_v46 = vsel %vm1636_vm4, %v3650_v12, %v3003_v63  ;;  %v3587_v63 = vsel %vm1537_vm1, %v8317_v58, %v9593_v47 }
 0x536   : > { %v3619_v13 = vsel %vm1570_vm2, %v3587_v63, %v9594_v17 }
 0x537   : > { %v3651_v55 = vsel %vm1603_vm3, %v3619_v13, %v8554_v11 }
 0x538   : > { %v3511_v4 = vpop.permute.xlu1 %3510 }
 0x539   : > { %v3808_v35 = vsel %vm1768_vm8, %v3776_v5, %v3511_v4  ;;  %v3385_v14 = vpop.permute.xlu0 %3384  ;;  %v4255_v4 = vlaneseq }
 0x53a   : > { %5508 = vmatprep.mubr.msk.f32.mxu1 %vm1813_vm9, %v3808_v35  ;;  %v3777_v39 = vsel %vm1735_vm7, %v3745_v28, %v3385_v14  ;;  %v4011_v35 = vadd.f32 %v8541_v3, %v8560_v20  ;;  %v5699_v14 = vmov 1983009808  }
 0x53b   : > { %v4253_v19 = vunpack.c.l.s4 %v5699_v14  ;;  %v8630_v3 = vshrl.u32 %v4255_v4, 7 }
 0x53c   : > { %v3131_v50 = vpop.permute.xlu1 %3130 }
 0x53d   : > { %v3005_v38 = vpop.permute.xlu0 %3004  ;;  %v5483_v57 = vpop.f32.mrb[4].mxu1  ;;  %v3714_v45 = vsel %vm1669_vm5, %v3682_v46, %v3131_v50  ;;  %v4254_v40 = vunpack.c.0.s8 %v4253_v19  ;;  %v9596_v19 = vld [vmem:[#allocation99_spill] sm:$0xff] }
 0x53e   : > { %v4021_v29 = vadd.f32 %v5483_v57, %v8560_v20  ;;  %v4015_v61 = vpop.f32.mrb[5].mxu1  ;;  %v3683_v58 = vsel %vm1636_vm4, %v3651_v55, %v3005_v38  ;;  %v5302_v57 = vld [vmem:[%s5793_s9 + $0x69] sm:$0xff] }
 0x53f   : > { %v4016_v48 = vadd.f32 %v8560_v20, %v4015_v61  ;;  %v5301_v61 = vld [vmem:[%s5793_s9 + $0x61] sm:$0xff] }
 0x540   : > { %v4191_v33 = vadd.f32 %v5300_v2, %v4021_v29  ;;  %v3133_v24 = vpop.permute.xlu1 %3132  ;;  %v4189_v2 = vadd.f32 %v5298_v15, %v4011_v35 }
 0x541   : > { %v4190_v23 = vadd.f32 %v5299_v22, %v4016_v48  ;;  %v3513_v9 = vpop.permute.xlu0 %3512  ;;  %v3715_v41 = vsel %vm1669_vm5, %v3683_v58, %v3133_v24  ;;  %v4188_v22 = vadd.f32 %v5297_v7, %v4006_v6  ;;  %v8641_v24 = vsub.s32 %v4254_v40, %v8630_v3 }
 0x542   : > { %v4223_v0 = vmax.f32 %v4191_v33, 0.0  ;;  %v3809_v53 = vsel %vm1768_vm8, %v3777_v39, %v3513_v9 }
 0x543   : > { %v4222_v31 = vmax.f32 %v4190_v23, 0.0  ;;  %5509 = vmatmul.mubr.msk.f32.gmra.mrb[22].mxu1 %vm1813_vm9, %v3809_v53  ;;  %v4221_v23 = vmax.f32 %v4189_v2, 0.0 }
 0x544   : > { %v8588_v52 = vcombine.low %v4219_v27, %v4223_v0  ;;  %v8590_v10 = vcombine.high %v4219_v27, %v4223_v0  ;;  %v8592_v25 = vpop.permute.xlu1 %2878  ;;  %v4220_v27 = vmax.f32 %v4188_v22, 0.0 }
 0x545   : > { %v8594_v60 = vcombine.low %v4218_v8, %v4222_v31  ;;  %v8596_v49 = vcombine.high %v4218_v8, %v4222_v31  ;;  %v3259_v30 = vpop.permute.xlu0 %3258  ;;  %v2275_v8 = vld [vmem:[#allocation2 + $0x138] sm:$0xff] }
 0x546   : > { %v3746_v56 = vsel %vm1702_vm6, %v3714_v45, %v3259_v30  ;;  %v8648_v1 = vrot.slane %v8588_v52, %v8641_v24  ;;  %v8652_v12 = vrot.slane %v8590_v10, %v8641_v24 }
 0x548   : > { %v3387_v32 = vpop.permute.xlu1 %3386 }
 0x549   : > { %v3261_v18 = vpop.permute.xlu0 %3260  ;;  %v3778_v21 = vsel %vm1735_vm7, %v3746_v56, %v3387_v32  ;;  %v8662_v56 = vrot.slane %v8594_v60, %v8641_v24 }
 0x54a   : > { %v3747_v54 = vsel %vm1702_vm6, %v3715_v41, %v3261_v18  ;;  %v9595_v18 = vld [vmem:[#allocation7_spill] sm:$0xff]  ;;  %v2276_v41 = vld [vmem:[#allocation2 + $0x140] sm:$0xff] }
 0x54b   : > { %v3588_v42 = vsel %vm1537_vm1, %v2275_v8, %v9595_v18 }
 0x54c   : > { %v8604_v26 = vpop.permute.xlu1 %3006  ;;  %v3620_v17 = vsel %vm1570_vm2, %v3588_v42, %v9596_v19 }
 0x54d   : > { %v8607_v36 = vpop.permute.xlu0 %2880  ;;  %v3652_v13 = vsel %vm1603_vm3, %v3620_v17, %v8592_v25 }
 0x54e   : > { %v3684_v6 = vsel %vm1636_vm4, %v3652_v13, %v8604_v26 }
 0x550   : > { %v3515_v44 = vpop.permute.xlu1 %3514 }
 0x551   : > { %v3810_v34 = vsel %vm1768_vm8, %v3778_v21, %v3515_v44  ;;  %v3389_v5 = vpop.permute.xlu0 %3388  ;;  %v8666_v21 = vrot.slane %v8596_v49, %v8641_v24 }
 0x552   : > { %5511 = vmatprep.mubr.msk.f32.mxu1 %vm1813_vm9, %v3810_v34  ;;  %v3779_v38 = vsel %vm1735_vm7, %v3747_v54, %v3389_v5 }
 0x554   : > { %v3135_v59 = vpop.permute.xlu1 %3134 }
 0x555   : > { %v8627_v50 = vpop.permute.xlu0 %3008  ;;  %v3716_v55 = vsel %vm1669_vm5, %v3684_v6, %v3135_v59 }
 0x556   : > { %v5486_v62 = vpop.f32.mrb[6].mxu1 }
 0x557   : > { %v4031_v29 = vadd.f32 %v5486_v62, %v8560_v20  ;;  %v4025_v16 = vpop.f32.mrb[7].mxu1 }
 0x558   : > { %v4026_v11 = vadd.f32 %v8560_v20, %v4025_v16  ;;  %v3137_v43 = vpop.permute.xlu1 %3136  ;;  %v9598_v16 = vld [vmem:[#allocation132_spill] sm:$0xff] }
 0x559   : > { %v4193_v48 = vadd.f32 %v5302_v57, %v4031_v29  ;;  %v3517_v28 = vpop.permute.xlu0 %3516  ;;  %v9597_v29 = vld [vmem:[#allocation95_spill] sm:$0xff] }
 0x55a   : > { %v4192_v33 = vadd.f32 %v5301_v61, %v4026_v11  ;;  %v3811_v39 = vsel %vm1768_vm8, %v3779_v38, %v3517_v28  ;;  %v3589_v25 = vsel %vm1537_vm1, %v2276_v41, %v9597_v29 }
 0x55b   : > { %v4225_v9 = vmax.f32 %v4193_v48, 0.0  ;;  %5512 = vmatmul.mubr.msk.f32.gmra.mrb[24].mxu1 %vm1813_vm9, %v3811_v39  ;;  %v3621_v26 = vsel %vm1570_vm2, %v3589_v25, %v9598_v16 }
 0x55c   : > { %v4224_v0 = vmax.f32 %v4192_v33, 0.0  ;;  %v2883_v53 = vpop.permute.xlu1 %2882  ;;  %v3653_v59 = vsel %vm1603_vm3, %v3621_v26, %v8607_v36 }
 0x55d   : > { %v4538_v31 = vcombine.low %v4221_v23, %v4225_v9  ;;  %v4539_v30 = vcombine.high %v4221_v23, %v4225_v9  ;;  %v3263_v32 = vpop.permute.xlu0 %3262  ;;  %v3685_v54 = vsel %vm1636_vm4, %v3653_v59, %v8627_v50  ;;  %v2277_v50 = vld [vmem:[#allocation2 + $0x150] sm:$0xff] }
 0x55e   : > { %v4266_v37 = vcombine.low %v4220_v27, %v4224_v0  ;;  %v4267_v51 = vcombine.high %v4220_v27, %v4224_v0  ;;  %v3748_v58 = vsel %vm1702_vm6, %v3716_v55, %v3263_v32  ;;  %v3717_v38 = vsel %vm1669_vm5, %v3685_v54, %v3137_v43  ;;  %v2278_v55 = vld [vmem:[#allocation2 + $0x158] sm:$0xff] }
 0x55f   : > { %v8655_v46 = vrot.slane %v4538_v31, %v8641_v24  ;;  %v8658_v45 = vrot.slane %v4539_v30, %v8641_v24  ;;  %v9599_v31 = vld [vmem:[#allocation57_spill] sm:$0xff] }
 0x560   : > { %v8669_v52 = vrot.slane %v4266_v37, %v8641_v24  ;;  %v8672_v10 = vrot.slane %v4267_v51, %v8641_v24  ;;  %v3391_v44 = vpop.permute.xlu1 %3390  ;;  %v3590_v43 = vsel %vm1537_vm1, %v2277_v50, %v9599_v31  ;;  %v9600_v30 = vld [vmem:[#allocation65_spill] sm:$0xff]  ;;  %v9606_v31 = vld [vmem:[#allocation76_spill] sm:$0xff] }
 0x561   : > { %v4586_v34 = vcombine.low %v8648_v1, %v8655_v46  ;;  %v4587_v5 = vcombine.high %v8648_v1, %v8655_v46  ;;  %v4602_v60 = vcombine.low %v8652_v12, %v8658_v45  ;;  %v4603_v49 = vcombine.high %v8652_v12, %v8658_v45  ;;  %v3265_v4 = vpop.permute.xlu0 %3264 }
 0x562   : > { %v4314_v47 = vcombine.low %v8662_v56, %v8669_v52  ;;  %v4315_v63 = vcombine.high %v8662_v56, %v8669_v52  ;;  %v4330_v35 = vcombine.low %v8666_v21, %v8672_v10  ;;  %v4331_v14 = vcombine.high %v8666_v21, %v8672_v10 }
 0x563   : > { %v3780_v62 = vsel %vm1735_vm7, %v3748_v58, %v3391_v44  ;;  %v3749_v28 = vsel %vm1702_vm6, %v3717_v38, %v3265_v4  ;;  %v3622_v32 = vsel %vm1570_vm2, %v3590_v43, %v9600_v30  ;;  %v9601_v58 = vld [vmem:[#allocation26_spill] sm:$0xff] }
 0x564   : > { %v3011_v15 = vpop.permute.xlu1 %3010  ;;  %v3654_v18 = vsel %vm1603_vm3, %v3622_v32, %v2883_v53  ;;  %v3591_v53 = vsel %vm1537_vm1, %v2278_v55, %v9601_v58 }
 0x565   : > { %v2885_v7 = vpop.permute.xlu0 %2884  ;;  %v3686_v37 = vsel %vm1636_vm4, %v3654_v18, %v3011_v15 }
 0x568   : > { %v3519_v57 = vpop.permute.xlu1 %3518 }
 0x569   : > { %v3812_v2 = vsel %vm1768_vm8, %v3780_v62, %v3519_v57  ;;  %v3393_v40 = vpop.permute.xlu0 %3392  ;;  %v9602_v62 = vld [vmem:[#allocation15_spill] sm:$0xff] }
 0x56a   : > { %5514 = vmatprep.mubr.msk.f32.mxu1 %vm1813_vm9, %v3812_v2  ;;  %v3781_v39 = vsel %vm1735_vm7, %v3749_v28, %v3393_v40  ;;  %v3623_v15 = vsel %vm1570_vm2, %v3591_v53, %v9602_v62  ;;  %v5304_v62 = vld [vmem:[%s5793_s9 + $0x81] sm:$0xff] }
 0x56b   : > { %v3655_v2 = vsel %vm1603_vm3, %v3623_v15, %v2885_v7  ;;  %v2279_v7 = vld [vmem:[#allocation2 + $0x168] sm:$0xff] }
 0x56c   : > { %v3139_v61 = vpop.permute.xlu1 %3138 }
 0x56d   : > { %v3013_v22 = vpop.permute.xlu0 %3012  ;;  %v3718_v44 = vsel %vm1669_vm5, %v3686_v37, %v3139_v61 }
 0x56e   : > { %v8709_v11 = vpop.f32.mrb[8].mxu1  ;;  %v3687_v41 = vsel %vm1636_vm4, %v3655_v2, %v3013_v22 }
 0x56f   : > { %v8712_v48 = vpop.f32.mrb[9].mxu1  ;;  %v4041_v53 = vadd.f32 %v8709_v11, %v8560_v20 }
 0x570   : > { %v3141_v33 = vpop.permute.xlu1 %3140  ;;  %v4036_v15 = vadd.f32 %v8560_v20, %v8712_v48 }
 0x571   : > { %v3521_v23 = vpop.permute.xlu0 %3520  ;;  %v3719_v25 = vsel %vm1669_vm5, %v3687_v41, %v3141_v33  ;;  %v4195_v41 = vadd.f32 %v5304_v62, %v4041_v53 }
 0x572   : > { %v3813_v9 = vsel %vm1768_vm8, %v3781_v39, %v3521_v23  ;;  %v2280_v23 = vld [vmem:[#allocation2 + $0x170] sm:$0xff] }
 0x573   : > { %5515 = vmatmul.mubr.msk.f32.gmra.mrb[26].mxu1 %vm1813_vm9, %v3813_v9  ;;  %v9603_v9 = vld [vmem:[#allocation131_spill] sm:$0xff]  ;;  %v4227_v11 = vmax.f32 %v4195_v41, 0.0 }
 0x574   : > { %v2887_v36 = vpop.permute.xlu1 %2886  ;;  %v3592_v22 = vsel %vm1537_vm1, %v2279_v7, %v9603_v9 }
 0x575   : > { %v3267_v27 = vpop.permute.xlu0 %3266 }
 0x576   : > { %v3750_v4 = vsel %vm1702_vm6, %v3718_v44, %v3267_v27  ;;  %v9604_v27 = vld [vmem:[#allocation73_spill] sm:$0xff] }
 0x577   : > { %v3593_v33 = vsel %vm1537_vm1, %v2280_v23, %v9604_v27 }
 0x578   : > { %v3395_v0 = vpop.permute.xlu1 %3394  ;;  %v3625_v43 = vsel %vm1570_vm2, %v3593_v33, %v9606_v31  ;;  %v5700_v33 = vmov 1934713408   ;;  %v5306_v31 = vld [vmem:[%s5793_s9 + $0x99] sm:$0xff] }
 0x579   : > { %v3269_v8 = vpop.permute.xlu0 %3268  ;;  %v3782_v19 = vsel %vm1735_vm7, %v3750_v4, %v3395_v0  ;;  %v9605_v0 = vld [vmem:[#allocation135_spill] sm:$0xff] }
 0x57a   : > { %v3751_v26 = vsel %vm1702_vm6, %v3719_v25, %v3269_v8  ;;  %v3624_v50 = vsel %vm1570_vm2, %v3592_v22, %v9605_v0  ;;  %v4317_v0 = vunpack.c.l.s4 %v5700_v33 }
 0x57b   : > { %v3656_v30 = vsel %vm1603_vm3, %v3624_v50, %v2887_v36 }
 0x57c   : > { %v3015_v42 = vpop.permute.xlu1 %3014 }
 0x57d   : > { %v2889_v51 = vpop.permute.xlu0 %2888  ;;  %v3688_v18 = vsel %vm1636_vm4, %v3656_v30, %v3015_v42  ;;  %v5305_v30 = vld [vmem:[%s5793_s9 + $0x91] sm:$0xff] }
 0x57e   : > { %v3657_v37 = vsel %vm1603_vm3, %v3625_v43, %v2889_v51 }
 0x580   : > { %v3523_v17 = vpop.permute.xlu1 %3522 }
 0x581   : > { %v3814_v13 = vsel %vm1768_vm8, %v3782_v19, %v3523_v17  ;;  %v3397_v6 = vpop.permute.xlu0 %3396 }
 0x582   : > { %5517 = vmatprep.mubr.msk.f32.mxu1 %vm1813_vm9, %v3814_v13  ;;  %v3783_v59 = vsel %vm1735_vm7, %v3751_v26, %v3397_v6 }
 0x584   : > { %v3143_v57 = vpop.permute.xlu1 %3142 }
 0x585   : > { %v3017_v40 = vpop.permute.xlu0 %3016  ;;  %v3720_v44 = vsel %vm1669_vm5, %v3688_v18, %v3143_v57  ;;  %v5303_v57 = vld [vmem:[%s5793_s9 + $0x79] sm:$0xff]  ;;  %v5310_v18 = vld [vmem:[%s5793_s9 + $0xc9] sm:$0xff] }
 0x586   : > { %v5492_v29 = vpop.f32.mrb[10].mxu1  ;;  %v3689_v4 = vsel %vm1636_vm4, %v3657_v37, %v3017_v40  ;;  %v5308_v40 = vld [vmem:[%s5793_s9 + $0xb1] sm:$0xff] }
 0x587   : > { %v4045_v16 = vpop.f32.mrb[11].mxu1  ;;  %v4051_v50 = vadd.f32 %v5492_v29, %v8560_v20 }
 0x588   : > { %v3145_v61 = vpop.permute.xlu1 %3144  ;;  %v4046_v43 = vadd.f32 %v8560_v20, %v4045_v16 }
 0x589   : > { %v3525_v54 = vpop.permute.xlu0 %3524  ;;  %v3721_v19 = vsel %vm1669_vm5, %v3689_v4, %v3145_v61  ;;  %v5307_v61 = vld [vmem:[%s5793_s9 + $0xa9] sm:$0xff]  ;;  %v4197_v37 = vadd.f32 %v5306_v31, %v4051_v50 }
 0x58a   : > { %v3815_v38 = vsel %vm1768_vm8, %v3783_v59, %v3525_v54  ;;  %v4194_v59 = vadd.f32 %v5303_v57, %v4036_v15 }
 0x58b   : > { %5518 = vmatmul.mubr.msk.f32.gmra.mrb[28].mxu1 %vm1813_vm9, %v3815_v38 }
 0x58c   : > { %v3273_v28 = vpop.permute.xlu1 %3272  ;;  %v4226_v7 = vmax.f32 %v4194_v59, 0.0 }
 0x58d   : > { %v3271_v39 = vpop.permute.xlu0 %3270  ;;  %v3753_v6 = vsel %vm1702_vm6, %v3721_v19, %v3273_v28  ;;  %v5309_v19 = vld [vmem:[%s5793_s9 + $0xc1] sm:$0xff] }
 0x58e   : > { %v3752_v17 = vsel %vm1702_vm6, %v3720_v44, %v3271_v39 }
 0x590   : > { %v3401_v8 = vpop.permute.xlu1 %3400 }
 0x591   : > { %v3399_v32 = vpop.permute.xlu0 %3398  ;;  %v3785_v55 = vsel %vm1735_vm7, %v3753_v6, %v3401_v8  ;;  %v4318_v8 = vunpack.c.0.s8 %v4317_v0 }
 0x592   : > { %v3784_v36 = vsel %vm1735_vm7, %v3752_v17, %v3399_v32 }
 0x593   : > { %v8780_v17 = vsub.s32 %v4318_v8, %v8630_v3 }
 0x594   : > { %v3529_v13 = vpop.permute.xlu1 %3528 }
 0x595   : > { %v3527_v42 = vpop.permute.xlu0 %3526  ;;  %v3817_v58 = vsel %vm1768_vm8, %v3785_v55, %v3529_v13  ;;  %v4196_v13 = vadd.f32 %v5305_v30, %v4046_v43  ;;  %v8787_v16 = vrot.slane %v4586_v34, %v8780_v17  ;;  %v8799_v53 = vrot.slane %v4314_v47, %v8780_v17 }
 0x596   : > { %v3816_v51 = vsel %vm1768_vm8, %v3784_v36, %v3527_v42  ;;  %v4229_v42 = vmax.f32 %v4197_v37, 0.0  ;;  %v4329_v34 = vrot.slane %v4315_v63, %v8780_v17  ;;  %v4338_v1 = vrot.slane %v4330_v35, %v8780_v17 }
 0x597   : > { %5520 = vmatprep.mubr.msk.f32.mxu1 %vm1813_vm9, %v3816_v51  ;;  %v8793_v51 = vrot.slane %v4587_v5, %v8780_v17  ;;  %v4228_v3 = vmax.f32 %v4196_v13, 0.0  ;;  %v4345_v46 = vrot.slane %v4331_v14, %v8780_v17  ;;  %v8817_v56 = vrot.slane %v4602_v60, %v8780_v17 }
 0x598   : > { %5521 = vmatmul.mubr.msk.f32.gmra.mrb[30].mxu1 %vm1813_vm9, %v3817_v58  ;;  %v8823_v52 = vrot.slane %v4603_v49, %v8780_v17 }
 0x59e   : > { %v5495_v2 = vpop.f32.mrb[12].mxu1 }
 0x59f   : > { %v4061_v25 = vadd.f32 %v5495_v2, %v8560_v20  ;;  %v4055_v26 = vpop.f32.mrb[13].mxu1 }
 0x5a0   : > { %v4056_v54 = vadd.f32 %v8560_v20, %v4055_v26 }
 0x5a1   : > { %v4199_v38 = vadd.f32 %v5308_v40, %v4061_v25 }
 0x5a2   : > { %v4198_v28 = vadd.f32 %v5307_v61, %v4056_v54 }
 0x5a3   : > { %v4231_v39 = vmax.f32 %v4199_v38, 0.0 }
 0x5a4   : > { %v4230_v48 = vmax.f32 %v4198_v28, 0.0 }
 0x5a5   : > { %v4554_v23 = vcombine.low %v4227_v11, %v4231_v39  ;;  %v4555_v9 = vcombine.high %v4227_v11, %v4231_v39 }
 0x5a6   : > { %v4282_v22 = vcombine.low %v4226_v7, %v4230_v48  ;;  %v4283_v27 = vcombine.high %v4226_v7, %v4230_v48 }
 0x5a7   : > { %v4562_v63 = vrot.slane %v4554_v23, %v8641_v24  ;;  %v4569_v35 = vrot.slane %v4555_v9, %v8641_v24 }
 0x5a8   : > { %v4290_v14 = vrot.slane %v4282_v22, %v8641_v24  ;;  %v4297_v57 = vrot.slane %v4283_v27, %v8641_v24 }
 0x5b6   : > { %v5498_v32 = vpop.f32.mrb[14].mxu1 }
 0x5b7   : > { %v4071_v44 = vadd.f32 %v5498_v32, %v8560_v20  ;;  %v4065_v4 = vpop.f32.mrb[15].mxu1 }
 0x5b8   : > { %v4066_v6 = vadd.f32 %v8560_v20, %v4065_v4 }
 0x5b9   : > { %v4201_v36 = vadd.f32 %v5310_v18, %v4071_v44 }
 0x5ba   : > { %v4200_v29 = vadd.f32 %v5309_v19, %v4066_v6 }
 0x5bb   : > { %v4233_v55 = vmax.f32 %v4201_v36, 0.0 }
 0x5bc   : > { %v4232_v58 = vmax.f32 %v4200_v29, 0.0 }
 0x5bd   : > { %v4570_v62 = vcombine.low %v4229_v42, %v4233_v55  ;;  %v4571_v15 = vcombine.high %v4229_v42, %v4233_v55  ;;  %v5312_v42 = vld [vmem:[%s5793_s9 + $0xe1] sm:$0xff] }
 0x5be   : > { %v4298_v5 = vcombine.low %v4228_v3, %v4232_v58  ;;  %v4299_v47 = vcombine.high %v4228_v3, %v4232_v58  ;;  %v5316_v3 = vld [vmem:[%s5793_s9 + $0x111] sm:$0xff] }
 0x5bf   : > { %v4578_v21 = vrot.slane %v4570_v62, %v8641_v24  ;;  %v4585_v10 = vrot.slane %v4571_v15, %v8641_v24  ;;  %v5315_v15 = vld [vmem:[%s5793_s9 + $0x109] sm:$0xff] }
 0x5c0   : > { %v4306_v60 = vrot.slane %v4298_v5, %v8641_v24  ;;  %v4313_v2 = vrot.slane %v4299_v47, %v8641_v24 }
 0x5c1   : > { %v4618_v40 = vcombine.low %v4562_v63, %v4578_v21  ;;  %v4619_v12 = vcombine.high %v4562_v63, %v4578_v21  ;;  %v4634_v45 = vcombine.low %v4569_v35, %v4585_v10  ;;  %v4635_v49 = vcombine.high %v4569_v35, %v4585_v10 }
 0x5c2   : > { %v4346_v41 = vcombine.low %v4290_v14, %v4306_v60  ;;  %v4347_v25 = vcombine.high %v4290_v14, %v4306_v60  ;;  %v4362_v26 = vcombine.low %v4297_v57, %v4313_v2  ;;  %v4363_v61 = vcombine.high %v4297_v57, %v4313_v2  ;;  %v5314_v2 = vld [vmem:[%s5793_s9 + $0xf9] sm:$0xff] }
 0x5c3   : > { %v4626_v59 = vrot.slane %v4618_v40, %v8780_v17  ;;  %v4633_v54 = vrot.slane %v4619_v12, %v8780_v17  ;;  %v4642_v38 = vrot.slane %v4634_v45, %v8780_v17  ;;  %v4649_v28 = vrot.slane %v4635_v49, %v8780_v17  ;;  %v5313_v12 = vld [vmem:[%s5793_s9 + $0xf1] sm:$0xff]  ;;  %v5318_v49 = vld [vmem:[%s5793_s9 + $0x129] sm:$0xff] }
 0x5c4   : > { %v8838_v11 = vrot.slane %v4346_v41, %v8780_v17  ;;  %v4361_v39 = vrot.slane %v4347_v25, %v8780_v17  ;;  %v4370_v7 = vrot.slane %v4362_v26, %v8780_v17  ;;  %v4377_v48 = vrot.slane %v4363_v61, %v8780_v17  ;;  %v5317_v61 = vld [vmem:[%s5793_s9 + $0x121] sm:$0xff] }
 0x5c5   : > { %v4650_v23 = vcombine.low %v8787_v16, %v4626_v59  ;;  %v4651_v9 = vcombine.high %v8787_v16, %v4626_v59  ;;  %v4652_v22 = vcombine.low %v8793_v51, %v4633_v54  ;;  %v4653_v27 = vcombine.high %v8793_v51, %v4633_v54  ;;  %v5311_v16 = vld [vmem:[%s5793_s9 + $0xd9] sm:$0xff] }
 0x5c6   : > { %v4379_v33 = vcombine.high %v8799_v53, %v8838_v11  ;;  %v4380_v0 = vcombine.low %v4329_v34, %v4361_v39  ;;  %v4381_v50 = vcombine.high %v4329_v34, %v4361_v39  ;;  %v4382_v8 = vcombine.low %v4338_v1, %v4370_v7 }
 0x5c7   : > { %v4383_v31 = vcombine.high %v4338_v1, %v4370_v7  ;;  %v4384_v43 = vcombine.low %v4345_v46, %v4377_v48  ;;  %v4385_v30 = vcombine.high %v4345_v46, %v4377_v48  ;;  %v4654_v32 = vcombine.low %v8817_v56, %v4642_v38 }
 0x5c8   : > { %4796 = vrot.lane.b32.xlu0 %v4379_v33, %s5690_s10  ;;  %v4655_v18 = vcombine.high %v8817_v56, %v4642_v38  ;;  %v4656_v37 = vcombine.low %v8823_v52, %v4649_v28  ;;  %v4657_v44 = vcombine.high %v8823_v52, %v4649_v28  ;;  %v4378_v4 = vcombine.low %v8799_v53, %v8838_v11  ;;  %v5322_v53 = vld [vmem:[%s5793_s9 + $0x159] sm:$0xff] }
 0x5cc   : > { %4804 = vrot.lane.b32.xlu0 %v4380_v0, %s5691_s11 }
 0x5ce   : > { %v5501_v19 = vpop.f32.mrb[16].mxu1 }
 0x5cf   : > { %v4075_v13 = vpop.f32.mrb[17].mxu1  ;;  %v4081_v29 = vadd.f32 %v5501_v19, %v8560_v20 }
 0x5d0   : > { %4812 = vrot.lane.b32.xlu0 %v4381_v50, %s5692_s12  ;;  %v4076_v55 = vadd.f32 %v8560_v20, %v4075_v13 }
 0x5d1   : > { %v4203_v58 = vadd.f32 %v5312_v42, %v4081_v29 }
 0x5d2   : > { %v4202_v1 = vadd.f32 %v5311_v16, %v4076_v55 }
 0x5d3   : > { %v4235_v56 = vmax.f32 %v4203_v58, 0.0 }
 0x5d4   : > { %4820 = vrot.lane.b32.xlu0 %v4382_v8, %s5693_s13  ;;  %v4234_v63 = vmax.f32 %v4202_v1, 0.0 }
 0x5d8   : > { %4828 = vrot.lane.b32.xlu0 %v4383_v31, %s5694_s14 }
 0x5dc   : > { %4836 = vrot.lane.b32.xlu0 %v4384_v43, %s5695_s15 }
 0x5e0   : > { %4844 = vrot.lane.b32.xlu0 %v4385_v30, %s5696_s17 }
 0x5e4   : > { %4852 = vrot.lane.b32.xlu0 %v4650_v23, %s5697_s23 }
 0x5e6   : > { %v5504_v6 = vpop.f32.mrb[18].mxu1 }
 0x5e7   : > { %v4085_v36 = vpop.f32.mrb[19].mxu1  ;;  %v4091_v60 = vadd.f32 %v5504_v6, %v8560_v20 }
 0x5e8   : > { %4860 = vrot.lane.b32.xlu0 %v4651_v9, %s5701_s25  ;;  %v4086_v40 = vadd.f32 %v8560_v20, %v4085_v36 }
 0x5e9   : > { %v4205_v41 = vadd.f32 %v5314_v2, %v4091_v60 }
 0x5ea   : > { %v4204_v59 = vadd.f32 %v5313_v12, %v4086_v40  ;;  %v5323_v12 = vld [vmem:[%s5793_s9 + $0x169] sm:$0xff] }
 0x5eb   : > { %v4237_v39 = vmax.f32 %v4205_v41, 0.0 }
 0x5ec   : > { %4868 = vrot.lane.b32.xlu0 %v4652_v22, %s5702_s26  ;;  %v4236_v48 = vmax.f32 %v4204_v59, 0.0 }
 0x5f0   : > { %4876 = vrot.lane.b32.xlu0 %v4653_v27, %s5703_s30 }
 0x5f4   : > { %4884 = vrot.lane.b32.xlu0 %v4654_v32, %s5704_s6 }
 0x5f8   : > { %4892 = vrot.lane.b32.xlu0 %v4655_v18, %s5705_s7 }
 0x5fc   : > { %4900 = vrot.lane.b32.xlu0 %v4656_v37, %s9170_s8 }
 0x5fe   : > { %v5507_v51 = vpop.f32.mrb[20].mxu1 }
 0x5ff   : > { %v4101_v34 = vadd.f32 %v5507_v51, %v8560_v20  ;;  %v4095_v62 = vpop.f32.mrb[21].mxu1 }
 0x600   : > { %v4096_v46 = vadd.f32 %v8560_v20, %v4095_v62  ;;  %4908 = vrot.lane.b32.xlu0 %v4657_v44, %s9169_s16  ;;  %s215_s16 = sand.u32 1, %s5680_s19  }
 0x601   : > { %v4207_v5 = vadd.f32 %v5316_v3, %v4101_v34  ;;  %s5033_s8 = sshll.u32 %s215_s16, 4 }
 0x602   : > { %v4206_v47 = vadd.f32 %v5315_v15, %v4096_v46 }
 0x603   : > { %v4239_v52 = vmax.f32 %v4207_v5, 0.0 }
 0x604   : > { %v4238_v35 = vmax.f32 %v4206_v47, 0.0 }
 0x605   : > { %v4658_v21 = vcombine.low %v4235_v56, %v4239_v52  ;;  %v4659_v10 = vcombine.high %v4235_v56, %v4239_v52 }
 0x606   : > { %v4386_v14 = vcombine.low %v4234_v63, %v4238_v35  ;;  %v4387_v57 = vcombine.high %v4234_v63, %v4238_v35  ;;  %v5320_v63 = vld [vmem:[%s5793_s9 + $0x141] sm:$0xff] }
 0x607   : > { %v8887_v0 = vrot.slane %v4658_v21, %v8641_v24  ;;  %v8890_v50 = vrot.slane %v4659_v10, %v8641_v24  ;;  %v5319_v21 = vld [vmem:[%s5793_s9 + $0x139] sm:$0xff] }
 0x608   : > { %v8899_v43 = vrot.slane %v4386_v14, %v8641_v24  ;;  %v8902_v30 = vrot.slane %v4387_v57, %v8641_v24  ;;  %v5324_v14 = vld [vmem:[%s5793_s9 + $0x171] sm:$0xff] }
 0x616   : > { %v5510_v45 = vpop.f32.mrb[22].mxu1 }
 0x617   : > { %v4111_v25 = vadd.f32 %v5510_v45, %v8560_v20  ;;  %v4105_v26 = vpop.f32.mrb[23].mxu1 }
 0x618   : > { %v4106_v54 = vadd.f32 %v8560_v20, %v4105_v26 }
 0x619   : > { %v4209_v38 = vadd.f32 %v5318_v49, %v4111_v25 }
 0x61a   : > { %v4208_v28 = vadd.f32 %v5317_v61, %v4106_v54 }
 0x61b   : > { %v4241_v7 = vmax.f32 %v4209_v38, 0.0 }
 0x61c   : > { %v4240_v23 = vmax.f32 %v4208_v28, 0.0 }
 0x61d   : > { %v4674_v9 = vcombine.low %v4237_v39, %v4241_v7  ;;  %v4675_v22 = vcombine.high %v4237_v39, %v4241_v7 }
 0x61e   : > { %v4402_v27 = vcombine.low %v4236_v48, %v4240_v23  ;;  %v4403_v33 = vcombine.high %v4236_v48, %v4240_v23 }
 0x61f   : > { %v8893_v8 = vrot.slane %v4674_v9, %v8641_v24  ;;  %v8896_v31 = vrot.slane %v4675_v22, %v8641_v24 }
 0x620   : > { %v8905_v32 = vrot.slane %v4402_v27, %v8641_v24  ;;  %v8908_v18 = vrot.slane %v4403_v33, %v8641_v24 }
 0x621   : > { %v4722_v37 = vcombine.low %v8887_v0, %v8893_v8  ;;  %v4723_v44 = vcombine.high %v8887_v0, %v8893_v8  ;;  %v4738_v19 = vcombine.low %v8890_v50, %v8896_v31  ;;  %v4739_v13 = vcombine.high %v8890_v50, %v8896_v31 }
 0x622   : > { %v4450_v6 = vcombine.low %v8899_v43, %v8905_v32  ;;  %v4451_v36 = vcombine.high %v8899_v43, %v8905_v32  ;;  %v4466_v29 = vcombine.low %v8902_v30, %v8908_v18  ;;  %v4467_v42 = vcombine.high %v8902_v30, %v8908_v18 }
 0x624   : > { %v4465_v50 = vrot.slane %v4451_v36, %v8780_v17  ;;  %v4481_v43 = vrot.slane %v4467_v42, %v8780_v17 }
 0x62e   : > { %v5513_v55 = vpop.f32.mrb[24].mxu1 }
 0x62f   : > { %v4115_v16 = vpop.f32.mrb[25].mxu1  ;;  %v4121_v52 = vadd.f32 %v5513_v55, %v8560_v20 }
 0x630   : > { %v4116_v35 = vadd.f32 %v8560_v20, %v4115_v16  ;;  %v5321_v16 = vld [vmem:[%s5793_s9 + $0x151] sm:$0xff] }
 0x631   : > { %v4211_v60 = vadd.f32 %v5320_v63, %v4121_v52 }
 0x632   : > { %v4210_v45 = vadd.f32 %v5319_v21, %v4116_v35  ;;  %v5325_v35 = vld [vmem:[%s5793_s9 + $0x181] sm:$0xff] }
 0x633   : > { %v4243_v61 = vmax.f32 %v4211_v60, 0.0 }
 0x634   : > { %v4242_v54 = vmax.f32 %v4210_v45, 0.0 }
 0x63a   : > { %v4797_v51 = vpop.permute.xlu0 %4796 }
 0x63b   : > { %v4914_v28 = vsel %vm1537_vm1, %v4378_v4, %v4797_v51 }
 0x63e   : > { %v4805_v3 = vpop.permute.xlu0 %4804 }
 0x63f   : > { %v4916_v48 = vsel %vm1570_vm2, %v4914_v28, %v4805_v3 }
 0x642   : > { %v4813_v58 = vpop.permute.xlu0 %4812 }
 0x643   : > { %v4918_v27 = vsel %vm1603_vm3, %v4916_v48, %v4813_v58 }
 0x646   : > { %v5516_v34 = vpop.f32.mrb[26].mxu1  ;;  %v4821_v62 = vpop.permute.xlu0 %4820 }
 0x647   : > { %v4125_v15 = vpop.f32.mrb[27].mxu1  ;;  %v4131_v33 = vadd.f32 %v5516_v34, %v8560_v20  ;;  %v4920_v55 = vsel %vm1636_vm4, %v4918_v27, %v4821_v62  ;;  %v5326_v34 = vld [vmem:[%s5793_s9 + $0x189] sm:$0xff]  ;;  %s9013_s9 = scalar_lea.vmem [#allocation3], %s5033_s8 }
 0x648   : > { %v4126_v11 = vadd.f32 %v8560_v20, %v4125_v15 }
 0x649   : > { %v4213_v62 = vadd.f32 %v5322_v53, %v4131_v33 }
 0x64a   : > { %v4829_v1 = vpop.permute.xlu0 %4828 }
 0x64b   : > { %v4922_v4 = vsel %vm1669_vm5, %v4920_v55, %v4829_v1 }
 0x64e   : > { %v4837_v46 = vpop.permute.xlu0 %4836 }
 0x64f   : > { %v4924_v51 = vsel %vm1702_vm6, %v4922_v4, %v4837_v46  ;;  %v4212_v46 = vadd.f32 %v5321_v16, %v4126_v11 }
 0x652   : > { %v4845_v5 = vpop.permute.xlu0 %4844 }
 0x653   : > { %v4926_v52 = vsel %vm1735_vm7, %v4924_v51, %v4845_v5 }
 0x656   : > { %v4853_v47 = vpop.permute.xlu0 %4852 }
 0x657   : > { %v4928_v15 = vsel %vm1768_vm8, %v4926_v52, %v4853_v47  ;;  %v8966_v47 = vrot.slane %v4722_v37, %v8780_v17  ;;  %v8985_v37 = vrot.slane %v4739_v13, %v8780_v17 }
 0x65a   : > { %v4861_v56 = vpop.permute.xlu0 %4860 }
 0x65b   : > { %v4930_v21 = vsel %vm1813_vm9, %v4928_v15, %v4861_v56  ;;  %v8972_v56 = vrot.slane %v4723_v44, %v8780_v17  ;;  %v8992_v44 = vrot.slane %v4450_v6, %v8780_v17  ;;  %v4474_v6 = vrot.slane %v4466_v29, %v8780_v17 }
 0x65e   : > { %v5519_v10 = vpop.f32.mrb[28].mxu1  ;;  %v4869_v57 = vpop.permute.xlu0 %4868 }
 0x65f   : > { %v4141_v2 = vadd.f32 %v5519_v10, %v8560_v20  ;;  %v4135_v40 = vpop.f32.mrb[29].mxu1  ;;  %v4933_v10 = vsel %vm4932_vm12, %v4930_v21, %v4869_v57  ;;  %v8979_v57 = vrot.slane %v4738_v19, %v8780_v17 }
 0x660   : > { %v4136_v49 = vadd.f32 %v8560_v20, %v4135_v40  ;;  %v4245_v40 = vmax.f32 %v4213_v62, 0.0 }
 0x661   : > { %v4215_v41 = vadd.f32 %v5324_v14, %v4141_v2 }
 0x662   : > { %v4214_v25 = vadd.f32 %v5323_v12, %v4136_v49  ;;  %v4877_v26 = vpop.permute.xlu0 %4876  ;;  %v4244_v12 = vmax.f32 %v4212_v46, 0.0 }
 0x663   : > { %v4247_v59 = vmax.f32 %v4215_v41, 0.0 }
 0x664   : > { %v4246_v38 = vmax.f32 %v4214_v25, 0.0 }
 0x665   : > { %v4690_v39 = vcombine.low %v4243_v61, %v4247_v59  ;;  %v4691_v7 = vcombine.high %v4243_v61, %v4247_v59 }
 0x666   : > { %v8939_v23 = vcombine.low %v4242_v54, %v4246_v38  ;;  %v8941_v9 = vcombine.high %v4242_v54, %v4246_v38  ;;  %v4885_v22 = vpop.permute.xlu0 %4884 }
 0x667   : > { %v4698_v32 = vrot.slane %v4690_v39, %v8641_v24  ;;  %v4705_v36 = vrot.slane %v4691_v7, %v8641_v24 }
 0x668   : > { %v4426_v29 = vrot.slane %v8939_v23, %v8641_v24  ;;  %v4433_v30 = vrot.slane %v8941_v9, %v8641_v24 }
 0x66a   : > { %v4893_v3 = vpop.permute.xlu0 %4892 }
 0x66b   : > { %v5522_v58 = vpop.f32.mrb[30].mxu1 }
 0x66c   : > { %v4151_v1 = vadd.f32 %v5522_v58, %v8560_v20  ;;  %v4145_v63 = vpop.f32.mrb[31].mxu1 }
 0x66d   : > { %v4146_v5 = vadd.f32 %v8560_v20, %v4145_v63  ;;  %v4936_v20 = vsel %vm4935_vm13, %v4933_v10, %v4877_v26 }
 0x66e   : > { %v4217_v14 = vadd.f32 %v5326_v34, %v4151_v1  ;;  %v4901_v60 = vpop.permute.xlu0 %4900  ;;  %v4939_v0 = vsel %vm4938_vm14, %v4936_v20, %v4885_v22 }
 0x66f   : > { %v4216_v2 = vadd.f32 %v5325_v35, %v4146_v5  ;;  %v4942_v19 = vsel %vm4941_vm15, %v4939_v0, %v4893_v3 }
 0x670   : > { %v4249_v8 = vmax.f32 %v4217_v14, 0.0  ;;  %v4945_v49 = vsel %vm4944_vm0, %v4942_v19, %v4901_v60 }
 0x671   : > { %v4248_v45 = vmax.f32 %v4216_v2, 0.0 }
 0x672   : > { %v4706_v31 = vcombine.low %v4245_v40, %v4249_v8  ;;  %v4707_v13 = vcombine.high %v4245_v40, %v4249_v8  ;;  %v4909_v41 = vpop.permute.xlu0 %4908 }
 0x673   : > { %v4434_v25 = vcombine.low %v4244_v12, %v4248_v45  ;;  %v4435_v26 = vcombine.high %v4244_v12, %v4248_v45  ;;  %v4948_v61 = vsel %vm4947_vm10, %v4945_v49, %v4909_v41 }
 0x674   : > { %v4714_v59 = vrot.slane %v4706_v31, %v8641_v24  ;;  %v4721_v54 = vrot.slane %v4707_v13, %v8641_v24  ;;  %4951 = vst.msk [vmem:[%s9013_s9] sm:$0xff] %vm4950_vm11, %v4948_v61 }
 0x675   : > { %v4442_v18 = vrot.slane %v4434_v25, %v8641_v24  ;;  %v4449_v42 = vrot.slane %v4435_v26, %v8641_v24 }
 0x676   : > { %v4754_v38 = vcombine.low %v4698_v32, %v4714_v59  ;;  %v4755_v28 = vcombine.high %v4698_v32, %v4714_v59  ;;  %v4770_v39 = vcombine.low %v4705_v36, %v4721_v54  ;;  %v4771_v7 = vcombine.high %v4705_v36, %v4721_v54 }
 0x677   : > { %v4482_v48 = vcombine.low %v4426_v29, %v4442_v18  ;;  %v4483_v22 = vcombine.high %v4426_v29, %v4442_v18  ;;  %v4498_v27 = vcombine.low %v4433_v30, %v4449_v42  ;;  %v4499_v33 = vcombine.high %v4433_v30, %v4449_v42 }
 0x678   : > { %v4762_v55 = vrot.slane %v4754_v38, %v8780_v17  ;;  %v4769_v53 = vrot.slane %v4755_v28, %v8780_v17  ;;  %v4778_v23 = vrot.slane %v4770_v39, %v8780_v17  ;;  %v4785_v9 = vrot.slane %v4771_v7, %v8780_v17 }
 0x679   : > { %v4490_v11 = vrot.slane %v4482_v48, %v8780_v17  ;;  %v4497_v24 = vrot.slane %v4483_v22, %v8780_v17  ;;  %v4506_v4 = vrot.slane %v4498_v27, %v8780_v17  ;;  %v4513_v16 = vrot.slane %v4499_v33, %v8780_v17 }
 0x67a   : > { %v4786_v51 = vcombine.low %v8966_v47, %v4762_v55  ;;  %v4787_v3 = vcombine.high %v8966_v47, %v4762_v55  ;;  %v4788_v52 = vcombine.low %v8972_v56, %v4769_v53  ;;  %v4789_v58 = vcombine.high %v8972_v56, %v4769_v53 }
 0x67b   : > { %v4515_v34 = vcombine.high %v8992_v44, %v4490_v11  ;;  %v4516_v62 = vcombine.low %v4465_v50, %v4497_v24  ;;  %v4517_v15 = vcombine.high %v4465_v50, %v4497_v24  ;;  %v4518_v1 = vcombine.low %v4474_v6, %v4506_v4 }
 0x67c   : > { %v4519_v63 = vcombine.high %v4474_v6, %v4506_v4  ;;  %v4520_v35 = vcombine.low %v4481_v43, %v4513_v16  ;;  %v4521_v46 = vcombine.high %v4481_v43, %v4513_v16  ;;  %v4790_v21 = vcombine.low %v8979_v57, %v4778_v23 }
 0x67d   : > { %4798 = vrot.lane.b32.xlu1 %v4515_v34, %s5690_s10  ;;  %v4791_v17 = vcombine.high %v8979_v57, %v4778_v23  ;;  %v4792_v5 = vcombine.low %v8985_v37, %v4785_v9  ;;  %v4793_v10 = vcombine.high %v8985_v37, %v4785_v9  ;;  %v4514_v14 = vcombine.low %v8992_v44, %v4490_v11  ;;  %s9607_s10 = smov 56  }
 0x681   : > { %4806 = vrot.lane.b32.xlu1 %v4516_v62, %s5691_s11 }
 0x685   : > { %4814 = vrot.lane.b32.xlu1 %v4517_v15, %s5692_s12  ;;  %s9608_s12 = smov 60  }
 0x689   : > { %4822 = vrot.lane.b32.xlu1 %v4518_v1, %s5693_s13  ;;  %s4967_s13 = sshll.u32 %s9013_s9, 4  ;;  %s9070_s13 = int_to_ptr.vmem [resolvable:$true] %s4967_s13 }
 0x68d   : > { %4830 = vrot.lane.b32.xlu1 %v4519_v63, %s5694_s14  ;;  %s5332_s14 = sshll.u32 %s5761_s22, 8  ;;  %s9084_s22 = scalar_lea.sflag [#allocation4], %s215_s16 }
 0x691   : > { %4838 = vrot.lane.b32.xlu1 %v4520_v35, %s5695_s15 }
 0x695   : > { %4846 = vrot.lane.b32.xlu1 %v4521_v46, %s5696_s17 }
 0x699   : > { %4854 = vrot.lane.b32.xlu1 %v4786_v51, %s5697_s23  ;;  %s9077_s23 = scalar_lea.hbm %s9131_s5, %s5332_s14 }
 0x69d   : > { %4862 = vrot.lane.b32.xlu1 %v4787_v3, %s5701_s25  ;;  %s5626_s25 = scalar_lea.vmem %s9070_s13, 256 }
 0x69e   : > { %p5627_p11 = scmp.ne.s32.totalorder %s9070_s13, %s5626_s25 }
 0x6a0   : > { %p5628_p12 = pnand %p5627_p11, %p5778_p5 }
 0x6a1   : > { %4870 = vrot.lane.b32.xlu1 %v4788_v52, %s5702_s26  ;;  %s5708_s26 = smov [#allocation3]  }
 0x6a2   : > { %p5629_p13 = pneg %p5628_p12 }
 0x6a5   : > { %4878 = vrot.lane.b32.xlu1 %v4789_v58, %s5703_s30  ;;  %s5630_s30 = sshll.u32 %s5708_s26, 4  ;;  %s5631_s30 = int_to_ptr.vmem [resolvable:$false] %s5630_s30 }
 0x6a6   : > { %p5633_p0 = scmp.lt.s32.totalorder %s9070_s13, %s5631_s30 }
 0x6a9   : > { %4886 = vrot.lane.b32.xlu1 %v4790_v21, %s5704_s6  ;;  %s5632_s6 = scalar_lea.vmem %s5631_s30, 512 }
 0x6aa   : > { %p5634_p1 = scmp.lt.s32.totalorder %s5632_s6, %s5626_s25 }
 0x6ac   : > { %p5635_p2 = por %p5634_p1, %p5633_p0 }
 0x6ad   : > { %4894 = vrot.lane.b32.xlu1 %v4791_v17, %s5705_s7 }
 0x6ae   : > { %p5636_p3 = pnand %p5635_p2, %p5629_p13 }
 0x6b1   : > { %4902 = vrot.lane.b32.xlu1 %v4792_v5, %s9607_s10 }
 0x6b5   : > { %4910 = vrot.lane.b32.xlu1 %v4793_v10, %s9608_s12 }
 0x6ef   : > { %v4799_v60 = vpop.permute.xlu1 %4798 }
 0x6f0   : > { %v4915_v12 = vsel %vm1537_vm1, %v4514_v14, %v4799_v60 }
 0x6f3   : > { %v4807_v47 = vpop.permute.xlu1 %4806 }
 0x6f4   : > { %v4917_v19 = vsel %vm1570_vm2, %v4915_v12, %v4807_v47 }
 0x6f7   : > { %v4815_v56 = vpop.permute.xlu1 %4814 }
 0x6f8   : > { %v4919_v50 = vsel %vm1603_vm3, %v4917_v19, %v4815_v56 }
 0x6fb   : > { %v4823_v20 = vpop.permute.xlu1 %4822 }
 0x6fc   : > { %v4921_v31 = vsel %vm1636_vm4, %v4919_v50, %v4823_v20 }
 0x6ff   : > { %v4831_v2 = vpop.permute.xlu1 %4830 }
 0x700   : > { %v4923_v13 = vsel %vm1669_vm5, %v4921_v31, %v4831_v2 }
 0x703   : > { %v4839_v57 = vpop.permute.xlu1 %4838 }
 0x704   : > { %v4925_v49 = vsel %vm1702_vm6, %v4923_v13, %v4839_v57 }
 0x707   : > { %v4847_v37 = vpop.permute.xlu1 %4846 }
 0x708   : > { %v4927_v6 = vsel %vm1735_vm7, %v4925_v49, %v4847_v37 }
 0x70b   : > { %v4855_v40 = vpop.permute.xlu1 %4854 }
 0x70c   : > { %v4929_v25 = vsel %vm1768_vm8, %v4927_v6, %v4855_v40 }
 0x70f   : > { %v4863_v0 = vpop.permute.xlu1 %4862 }
 0x710   : > { %v4931_v26 = vsel %vm1813_vm9, %v4929_v25, %v4863_v0 }
 0x713   : > { %v4871_v8 = vpop.permute.xlu1 %4870 }
 0x714   : > { %v4934_v61 = vsel %vm4932_vm12, %v4931_v26, %v4871_v8 }
 0x717   : > { %v4879_v44 = vpop.permute.xlu1 %4878 }
 0x718   : > { %v4937_v32 = vsel %vm4935_vm13, %v4934_v61, %v4879_v44 }
 0x71b   : > { %v4887_v45 = vpop.permute.xlu1 %4886 }
 0x71c   : > { %v4940_v36 = vsel %vm4938_vm14, %v4937_v32, %v4887_v45 }
 0x71f   : > { %v4895_v41 = vpop.permute.xlu1 %4894 }
 0x720   : > { %v4943_v59 = vsel %vm4941_vm15, %v4940_v36, %v4895_v41 }
 0x723   : > { %v4903_v43 = vpop.permute.xlu1 %4902 }
 0x724   : > { %v4946_v54 = vsel %vm4944_vm0, %v4943_v59, %v4903_v43 }
 0x727   : > { %v4911_v29 = vpop.permute.xlu1 %4910 }
 0x728   : > { %v4949_v30 = vsel %vm4947_vm10, %v4946_v54, %v4911_v29 }
 0x729   : > { %4952 = vst.msk [vmem:[%s9013_s9 + $0x8] sm:$0xff] %vm4950_vm11, %v4949_v30 }
 0x72a   : > { %5639 = shalt.err (!%p5636_p3)
}
 0x72b   : > { %s5640_s7 = scalar_lea.hbm %s9077_s23, 256  ;;  %s5644_s9 = scalar_lea.hbm %s9131_s5, 512 }
 0x72c   : > { %p5641_p4 = scmp.ne.s32.totalorder %s9077_s23, %s5640_s7  ;;  %p5645_p9 = scmp.lt.u32.totalorder %s9077_s23, %s9131_s5 }
 0x72d   : > { %p5646_p10 = scmp.lt.u32.totalorder %s5644_s9, %s5640_s7  ;;  %p5648_p12 = scmp.lt.u32.totalorder %s5640_s7, %s9077_s23 }
 0x72e   : > { %p5642_p7 = pnand %p5641_p4, %p5778_p5 }
 0x72f   : > { %p5647_p11 = por %p5646_p10, %p5645_p9 }
 0x730   : > { %p5643_p8 = pneg %p5642_p7 }
 0x731   : > { %p5649_p13 = por %p5648_p12, %p5647_p11 }
 0x733   : > { %p5650_p0 = pnand %p5649_p13, %p5643_p8 }
 0x735   : > { %5653 = shalt.err (!%p5650_p0)
}
 0x736   : > { %s5709_s14 = smov 128  }
 0x737   : > { %5540 = dma.vmem_to_hbm [thread:$0]  (%p5778_p5), %s9070_s13, 256, %s9077_s23, %s9084_s22, %s5709_s14, %s5709_s14, %s5691_s11  }
 0x738 PF: > { %p5546_p1 = scmp.ge.s32.totalorder %s5688_s21, 2  ;;  %s4982_s15 = sand.u32 1, %s5676_s18  }
 0x739   : > { %s4983_s17 = scalar_lea.sflag [#allocation4], %s4982_s15 }
 0x73a   : > { %p5543_p2 = pnand %p5546_p1, %p5782_p6 }
 0x73c   : > { %5671 = dma.done.wait (!%p5543_p2), %s4983_s17, 256  }
 0x73d   : > { %5673 = vsyncadd (!%p5543_p2), %s4983_s17, 4294967040  ;;  %p15_p3 = scmp.ge.s32.totalorder %s5765_s24, 4   ;;  %s9609_s18 = smov %s5680_s19 }
 0x73e   : > { %s9610_s19 = smov %s5684_s20  ;;  %s9611_s20 = smov %s5776_s27 }
 0x73f   : > { %s9612_s21 = smov %s5765_s24  ;;  %17 = sbr.rel (!%p15_p3) target bundleno = 3 (0x3), region = 80 }
 0x746   :  { %4988 = vsyncpa [#allocation4], 1 }
 0x747   :  { %4990 = vsyncpa [#allocation4 + $0x1], 1 }

</bundles_post_ra>
